<compile_context>
chip_gen: v6e
topology: v6e:2x2x1
jax: 0.10.0
libtpu: 0.0.40
codegen_flags: <defaults>
</compile_context>

<pallas_src>
import jax
import jax.numpy as jnp
from jax.experimental import pallas as pl
from jax.experimental.pallas import tpu as pltpu

EPS = 1e-5
NUM_CLASSES = 8
SEQ_LEN = 128           # forced by Linear(128, 64) after Flatten
MAX_B_TILE = 128        # fills v5e's 4x128x128 MXU; 256 is also fine on v6e/v7x

# (c_out, c_in, conv input/output length) for the four conv+BN+ReLU+pool blocks.
CONV_LAYERS = ((8, 1, 128), (16, 8, 64), (32, 16, 32), (32, 32, 16))


# ----------------------------------------------------------------------------
# Pallas kernel: whole network for one (b_tile, 128) batch tile.
# ----------------------------------------------------------------------------
def zolotyh_kernel(x_ref,
                   w1, s1, t1, w2, s2, t2, w3, s3, t3, w4, s4, t4,
                   w5c, f1w, sd1, td1, f2w, sd2, td2, f3c, bias,
                   o_ref):
    f32, bf16 = jnp.float32, jnp.bfloat16
    x = x_ref[...].astype(bf16)                                    # (B, 128)

    def conv_bn_relu_pool(m, w_ref, s_ref, t_ref):
        # Fused Conv1d(k=3, pad=1) + BatchNorm + ReLU + MaxPool1d(2).
        # w_ref columns are pre-permuted to [even output positions | odd output
        # positions], so the pool is an aligned half-split max and the pooled
        # result is already densely packed as (channel, pooled position).
        z = jnp.dot(m, w_ref[...], preferred_element_type=f32)
        half = z.shape[-1] // 2
        s, t = s_ref[...], t_ref[...]
        a0 = jnp.maximum(z[:, :half] * s + t, 0.0)
        a1 = jnp.maximum(z[:, half:] * s + t, 0.0)
        return jnp.maximum(a0, a1).astype(bf16)

    # ---- features_up: 4 x (conv + BN + ReLU + pool), conv5 folded w/ classifier
    m = conv_bn_relu_pool(x, w1, s1, t1)                           # (B, 8*64)
    m = conv_bn_relu_pool(m, w2, s2, t2)                           # (B, 16*32)
    m = conv_bn_relu_pool(m, w3, s3, t3)                           # (B, 32*16)
    m = conv_bn_relu_pool(m, w4, s4, t4)                           # (B, 32*8)
    up = jnp.dot(m, w5c[...], preferred_element_type=f32)          # (B, 8)

    # ---- features_down: Linear + BN + ReLU (x2), fc3 folded with classifier
    h = jnp.dot(x, f1w[...], preferred_element_type=f32)
    h = jnp.maximum(h * sd1[...] + td1[...], 0.0).astype(bf16)     # (B, 64)
    h = jnp.dot(h, f2w[...], preferred_element_type=f32)
    h = jnp.maximum(h * sd2[...] + td2[...], 0.0).astype(bf16)     # (B, 16)
    down = jnp.dot(h, f3c[...], preferred_element_type=f32)        # (B, 8)

    # ---- classifier (already folded into w5c / f3c / bias) ----
    o_ref[...] = up + down + bias[...]


# ----------------------------------------------------------------------------
# Wrapper-side constant folding (run ONCE per parameter set via prepare_params).
# ----------------------------------------------------------------------------
def _conv_matrix(w, l_in):
    """Dense matrix M with (m @ M)[:, co*l_in + l] equal to the Conv1d(k=3,
    padding=1) response (no bias) at (channel co, position l), for an input
    stored densely as lanes (ci, position)."""
    c_out, c_in, _ = w.shape                   # PyTorch layout (Cout, Cin, 3)
    j = jnp.arange(l_in)[:, None]              # input position
    l = jnp.arange(l_in)[None, :]              # output position
    mat = jnp.zeros((c_in, l_in, c_out, l_in), jnp.float32)
    for d in (-1, 0, 1):                       # tap offset; zero padding implicit
        sel = (j == l + d).astype(jnp.float32)
        tap = w[:, :, d + 1]                   # (c_out, c_in)
        mat = mat + tap.T[:, None, :, None] * sel[None, :, None, :]
    return mat.reshape(c_in * l_in, c_out * l_in)


def _conv_pool_matrix(w, l_in):
    """Conv matrix with output columns permuted to [even positions | odd
    positions]: MaxPool1d(2) becomes an aligned half-split + max in the kernel,
    and its result is densely packed as (channel, pooled position)."""
    assert l_in % 2 == 0, "MaxPool1d(2) needs an even length"
    c_out = w.shape[0]
    m = _conv_matrix(w, l_in).reshape(-1, c_out, l_in)
    even = m[:, :, 0::2].reshape(m.shape[0], -1)
    odd = m[:, :, 1::2].reshape(m.shape[0], -1)
    return jnp.concatenate([even, odd], axis=1)          # (K, c_out*l_in)


def _bn_scale_shift(gamma, beta, mean, var, bias, repeat):
    """Fold conv/linear bias + inference BatchNorm into per-lane scale/shift."""
    s = gamma / jnp.sqrt(var + EPS)
    t = beta + (bias - mean) * s
    if repeat > 1:
        s = jnp.repeat(s, repeat)
        t = jnp.repeat(t, repeat)
    return s[None, :].astype(jnp.float32), t[None, :].astype(jnp.float32)


def prepare_params(P):
    """Fold conv taps, the MaxPool even/odd column permutation, inference
    BatchNorm, biases and the final 8->num_classes classifier into the kernel's
    constant operands.  Call once per parameter set and reuse across forwards."""
    consts = []
    l = SEQ_LEN
    for i, (_c_out, _c_in, l_in) in enumerate(CONV_LAYERS, start=1):
        assert l == l_in
        consts.append(_conv_pool_matrix(P[f"c{i}w"], l_in).astype(jnp.bfloat16))
        s, t = _bn_scale_shift(P[f"bn{i}g"], P[f"bn{i}b"], P[f"bn{i}m"],
                               P[f"bn{i}v"], P[f"c{i}b"], l_in // 2)
        consts += [s, t]
        l = l_in // 2
    # conv5 (1 output channel, no BN) folded with the classifier.
    w5 = _conv_matrix(P["c5w"], l)                                # (32*8, 8)
    consts.append((w5 @ P["cw"]).astype(jnp.bfloat16))            # (256, NUM_CLASSES)
    # features_down linears + folded BN.
    for i in (1, 2):
        consts.append(P[f"f{i}w"].astype(jnp.bfloat16))
        s, t = _bn_scale_shift(P[f"bnd{i}g"], P[f"bnd{i}b"], P[f"bnd{i}m"],
                               P[f"bnd{i}v"], P[f"f{i}b"], 1)
        consts += [s, t]
    consts.append((P["f3w"] @ P["cw"]).astype(jnp.bfloat16))      # (16, NUM_CLASSES)
    # Fused bias: (conv5 bias over its 8 positions + fc3 bias) @ cw + cb.
    b5_vec = jnp.broadcast_to(P["c5b"].astype(jnp.float32), (l,))
    bias = ((b5_vec + P["f3b"]) @ P["cw"] + P["cb"]).reshape(1, NUM_CLASSES)
    consts.append(bias.astype(jnp.float32))
    return tuple(consts)


def _round_up(n, m):
    return ((n + m - 1) // m) * m


@jax.jit
def zolotyh_forward(x, consts):
    """Batched forward.  `consts` must come from prepare_params (built once per
    parameter set, outside this per-call jit)."""
    n = x.shape[0]
    x2d = x.reshape(n, -1).astype(jnp.float32)                    # (N, 128)
    b_tile = min(MAX_B_TILE, _round_up(n, 8))                     # sublane multiple
    n_pad = _round_up(n, b_tile)
    if n_pad != n:
        # Padded rows produce garbage logits; they are sliced off below.
        x2d = jnp.pad(x2d, ((0, n_pad - n), (0, 0)))

    grid = (n_pad // b_tile,)
    in_specs = [pl.BlockSpec((b_tile, SEQ_LEN), lambda i: (i, 0))]
    # Grid-invariant weights / scale-shift vectors: whole-array blocks whose
    # block index never changes, so they are only DMA'd once.
    in_specs += [pl.BlockSpec(c.shape, lambda i: (0, 0)) for c in consts]
    out_specs = pl.BlockSpec((b_tile, NUM_CLASSES), lambda i: (i, 0))

    out = pl.pallas_call(
        zolotyh_kernel,
        out_shape=jax.ShapeDtypeStruct((n_pad, NUM_CLASSES), jnp.float32),
        grid=grid,
        in_specs=in_specs,
        out_specs=out_specs,
        compiler_params=pltpu.CompilerParams(
            dimension_semantics=("parallel",),      # batch tiles shard across v7x TCs
            vmem_limit_bytes=32 * 1024 * 1024),
    )(x2d, *consts)
    return out[:n]


# ----------------------------------------------------------------------------
# Deterministic parameter initialization (synthetic; no checkpoint).
# ----------------------------------------------------------------------------
def init_params(key):
    keys = iter(jax.random.split(key, 64))

    def nrm(shape, scale=0.1):
        return scale * jax.random.normal(next(keys), shape, jnp.float32)

    P = {}
    conv_shapes = {1: (8, 1), 2: (16, 8), 3: (32, 16), 4: (32, 32), 5: (1, 32)}
    for i, (cout, cin) in conv_shapes.items():
        P[f"c{i}w"] = nrm((cout, cin, 3))
        P[f"c{i}b"] = nrm((cout,))
        if i <= 4:  # conv5 has no BN
            P[f"bn{i}g"] = 1.0 + nrm((cout,))
            P[f"bn{i}b"] = nrm((cout,))
            P[f"bn{i}m"] = nrm((cout,))
            P[f"bn{i}v"] = 1.0 + 0.2 * jax.random.uniform(next(keys), (cout,),
                                                          jnp.float32)
    fc_shapes = {1: (128, 64), 2: (64, 16), 3: (16, 8)}
    for i, (fi, fo) in fc_shapes.items():
        P[f"f{i}w"] = nrm((fi, fo))          # stored as (in, out): y = x @ W + b
        P[f"f{i}b"] = nrm((fo,))
        if i <= 2:
            P[f"bnd{i}g"] = 1.0 + nrm((fo,))
            P[f"bnd{i}b"] = nrm((fo,))
            P[f"bnd{i}m"] = nrm((fo,))
            P[f"bnd{i}v"] = 1.0 + 0.2 * jax.random.uniform(next(keys), (fo,),
                                                           jnp.float32)
    P["cw"] = nrm((8, NUM_CLASSES))
    P["cb"] = nrm((NUM_CLASSES,))
    return P


# ----------------------------------------------------------------------------
# Plain-JAX reference (same math, eval-mode BN) for a correctness check.
# ----------------------------------------------------------------------------
def reference_forward(x, P):
    def conv1d(h, w, b):
        L = h.shape[-1]
        hp = jnp.pad(h, ((0, 0), (0, 0), (1, 1)))
        out = sum(jnp.einsum("oc,ncl->nol", w[:, :, k], hp[:, :, k:k + L])
                  for k in range(3))
        return out + b[None, :, None]

    def bn_c(h, i):
        g, b, m, v = (P[f"bn{i}g"], P[f"bn{i}b"], P[f"bn{i}m"], P[f"bn{i}v"])
        return ((h - m[None, :, None]) / jnp.sqrt(v[None, :, None] + EPS)
                * g[None, :, None] + b[None, :, None])

    def pool(h):
        n, c, L = h.shape
        return h.reshape(n, c, L // 2, 2).max(axis=-1)

    u = x
    for i in (1, 2, 3, 4):
        u = pool(jax.nn.relu(bn_c(conv1d(u, P[f"c{i}w"], P[f"c{i}b"]), i)))
    u = conv1d(u, P["c5w"], P["c5b"])
    out_up = u.reshape(u.shape[0], -1)

    d = x.reshape(x.shape[0], -1)

    def bn_d(h, i):
        g, b, m, v = (P[f"bnd{i}g"], P[f"bnd{i}b"], P[f"bnd{i}m"], P[f"bnd{i}v"])
        return (h - m) / jnp.sqrt(v + EPS) * g + b

    d = jax.nn.relu(bn_d(d @ P["f1w"] + P["f1b"], 1))
    d = jax.nn.relu(bn_d(d @ P["f2w"] + P["f2b"], 2))
    out_down = d @ P["f3w"] + P["f3b"]

    mid = out_up + out_down
    return mid @ P["cw"] + P["cb"]


if __name__ == "__main__":
    key = jax.random.PRNGKey(0)
    kx, kp = jax.random.split(key)
    x = jax.random.normal(kx, (2, 1, SEQ_LEN), jnp.float32)   # (N, C=1, L=128)
    params = init_params(kp)

    consts = prepare_params(params)          # built once, reused across forwards
    out = zolotyh_forward(x, consts)
    out = jax.block_until_ready(out)
    assert out.shape == (2, NUM_CLASSES) and out.dtype == jnp.float32

    ref = reference_forward(x, params)
    max_err = float(jnp.max(jnp.abs(out - ref)))
    # bf16 MXU operands (f32 accumulation) vs. the all-f32 plain-JAX reference.
    if max_err > 5e-2:
        raise AssertionError(f"kernel mismatch vs reference: max_err={max_err}")

    print("KERNEL_OK")
</pallas_src>

<mosaic_0001>
module attributes {stable_mosaic.version = 11 : i64} {
  func.func @zolotyh_kernel(%arg0: i32, %arg1: memref<8x128xf32, #tpu.memory_space<vmem>>, %arg2: memref<128x1024xbf16, #tpu.memory_space<vmem>>, %arg3: memref<1x512xf32, #tpu.memory_space<vmem>>, %arg4: memref<1x512xf32, #tpu.memory_space<vmem>>, %arg5: memref<512x1024xbf16, #tpu.memory_space<vmem>>, %arg6: memref<1x512xf32, #tpu.memory_space<vmem>>, %arg7: memref<1x512xf32, #tpu.memory_space<vmem>>, %arg8: memref<512x1024xbf16, #tpu.memory_space<vmem>>, %arg9: memref<1x512xf32, #tpu.memory_space<vmem>>, %arg10: memref<1x512xf32, #tpu.memory_space<vmem>>, %arg11: memref<512x512xbf16, #tpu.memory_space<vmem>>, %arg12: memref<1x256xf32, #tpu.memory_space<vmem>>, %arg13: memref<1x256xf32, #tpu.memory_space<vmem>>, %arg14: memref<256x8xbf16, #tpu.memory_space<vmem>>, %arg15: memref<128x64xbf16, #tpu.memory_space<vmem>>, %arg16: memref<1x64xf32, #tpu.memory_space<vmem>>, %arg17: memref<1x64xf32, #tpu.memory_space<vmem>>, %arg18: memref<64x16xbf16, #tpu.memory_space<vmem>>, %arg19: memref<1x16xf32, #tpu.memory_space<vmem>>, %arg20: memref<1x16xf32, #tpu.memory_space<vmem>>, %arg21: memref<16x8xbf16, #tpu.memory_space<vmem>>, %arg22: memref<1x8xf32, #tpu.memory_space<vmem>>, %arg23: memref<8x8xf32, #tpu.memory_space<vmem>>) attributes {dimension_semantics = [#tpu.dimension_semantics<parallel>], iteration_bounds = array<i64: 1>, scalar_prefetch = 0 : i64, scratch_operands = 0 : i64, tpu.core_type = #tpu.core_type<tc>, window_params = [{transform_indices = @transform_0, window_bounds = array<i64: 8, 128>}, {pipeline_mode = #tpu.pipeline_mode<synchronous>, transform_indices = @transform_1, window_bounds = array<i64: 128, 1024>}, {pipeline_mode = #tpu.pipeline_mode<synchronous>, transform_indices = @transform_2, window_bounds = array<i64: 1, 512>}, {pipeline_mode = #tpu.pipeline_mode<synchronous>, transform_indices = @transform_3, window_bounds = array<i64: 1, 512>}, {pipeline_mode = #tpu.pipeline_mode<synchronous>, transform_indices = @transform_4, window_bounds = array<i64: 512, 1024>}, {pipeline_mode = #tpu.pipeline_mode<synchronous>, transform_indices = @transform_5, window_bounds = array<i64: 1, 512>}, {pipeline_mode = #tpu.pipeline_mode<synchronous>, transform_indices = @transform_6, window_bounds = array<i64: 1, 512>}, {pipeline_mode = #tpu.pipeline_mode<synchronous>, transform_indices = @transform_7, window_bounds = array<i64: 512, 1024>}, {pipeline_mode = #tpu.pipeline_mode<synchronous>, transform_indices = @transform_8, window_bounds = array<i64: 1, 512>}, {pipeline_mode = #tpu.pipeline_mode<synchronous>, transform_indices = @transform_9, window_bounds = array<i64: 1, 512>}, {pipeline_mode = #tpu.pipeline_mode<synchronous>, transform_indices = @transform_10, window_bounds = array<i64: 512, 512>}, {pipeline_mode = #tpu.pipeline_mode<synchronous>, transform_indices = @transform_11, window_bounds = array<i64: 1, 256>}, {pipeline_mode = #tpu.pipeline_mode<synchronous>, transform_indices = @transform_12, window_bounds = array<i64: 1, 256>}, {pipeline_mode = #tpu.pipeline_mode<synchronous>, transform_indices = @transform_13, window_bounds = array<i64: 256, 8>}, {pipeline_mode = #tpu.pipeline_mode<synchronous>, transform_indices = @transform_14, window_bounds = array<i64: 128, 64>}, {pipeline_mode = #tpu.pipeline_mode<synchronous>, transform_indices = @transform_15, window_bounds = array<i64: 1, 64>}, {pipeline_mode = #tpu.pipeline_mode<synchronous>, transform_indices = @transform_16, window_bounds = array<i64: 1, 64>}, {pipeline_mode = #tpu.pipeline_mode<synchronous>, transform_indices = @transform_17, window_bounds = array<i64: 64, 16>}, {pipeline_mode = #tpu.pipeline_mode<synchronous>, transform_indices = @transform_18, window_bounds = array<i64: 1, 16>}, {pipeline_mode = #tpu.pipeline_mode<synchronous>, transform_indices = @transform_19, window_bounds = array<i64: 1, 16>}, {pipeline_mode = #tpu.pipeline_mode<synchronous>, transform_indices = @transform_20, window_bounds = array<i64: 16, 8>}, {pipeline_mode = #tpu.pipeline_mode<synchronous>, transform_indices = @transform_21, window_bounds = array<i64: 1, 8>}, {transform_indices = @transform_22, window_bounds = array<i64: 8, 8>}]} {
    %c0 = arith.constant 0 : index
    %c0_0 = arith.constant 0 : index
    %0 = vector.load %arg1[%c0, %c0_0] : memref<8x128xf32, #tpu.memory_space<vmem>>, vector<8x128xf32>
    %1 = arith.truncf %0 : vector<8x128xf32> to vector<8x128xbf16>
    %c0_1 = arith.constant 0 : index
    %c0_2 = arith.constant 0 : index
    %2 = vector.load %arg2[%c0_1, %c0_2] : memref<128x1024xbf16, #tpu.memory_space<vmem>>, vector<128x1024xbf16>
    %cst = arith.constant dense<0.000000e+00> : vector<8x1024xf32>
    %3 = tpu.matmul %1, %2, %cst {dimension_numbers = #tpu.dot_dimension_numbers<[1], [0], [0], [1], [0, 0, 1, 1], [], []>} : vector<8x128xbf16>, vector<128x1024xbf16>, vector<8x1024xf32> -> vector<8x1024xf32>
    %c0_3 = arith.constant 0 : index
    %c0_4 = arith.constant 0 : index
    %4 = vector.load %arg3[%c0_3, %c0_4] : memref<1x512xf32, #tpu.memory_space<vmem>>, vector<1x512xf32>
    %c0_5 = arith.constant 0 : index
    %c0_6 = arith.constant 0 : index
    %5 = vector.load %arg4[%c0_5, %c0_6] : memref<1x512xf32, #tpu.memory_space<vmem>>, vector<1x512xf32>
    %6 = vector.extract_strided_slice %3 {offsets = [0, 0], sizes = [8, 512], strides = [1, 1]} : vector<8x1024xf32> to vector<8x512xf32>
    %7 = vector.broadcast %4 : vector<1x512xf32> to vector<8x512xf32>
    %8 = arith.mulf %6, %7 : vector<8x512xf32>
    %9 = vector.broadcast %5 : vector<1x512xf32> to vector<8x512xf32>
    %10 = arith.addf %8, %9 : vector<8x512xf32>
    %cst_7 = arith.constant 0.000000e+00 : f32
    %11 = vector.broadcast %cst_7 : f32 to vector<8x512xf32>
    %12 = arith.maximumf %10, %11 : vector<8x512xf32>
    %13 = vector.extract_strided_slice %3 {offsets = [0, 512], sizes = [8, 512], strides = [1, 1]} : vector<8x1024xf32> to vector<8x512xf32>
    %14 = vector.broadcast %4 : vector<1x512xf32> to vector<8x512xf32>
    %15 = arith.mulf %13, %14 : vector<8x512xf32>
    %16 = vector.broadcast %5 : vector<1x512xf32> to vector<8x512xf32>
    %17 = arith.addf %15, %16 : vector<8x512xf32>
    %cst_8 = arith.constant 0.000000e+00 : f32
    %18 = vector.broadcast %cst_8 : f32 to vector<8x512xf32>
    %19 = arith.maximumf %17, %18 : vector<8x512xf32>
    %20 = arith.maximumf %12, %19 : vector<8x512xf32>
    %21 = arith.truncf %20 : vector<8x512xf32> to vector<8x512xbf16>
    %c0_9 = arith.constant 0 : index
    %c0_10 = arith.constant 0 : index
    %22 = vector.load %arg5[%c0_9, %c0_10] : memref<512x1024xbf16, #tpu.memory_space<vmem>>, vector<512x1024xbf16>
    %cst_11 = arith.constant dense<0.000000e+00> : vector<8x1024xf32>
    %23 = tpu.matmul %21, %22, %cst_11 {dimension_numbers = #tpu.dot_dimension_numbers<[1], [0], [0], [1], [0, 0, 1, 1], [], []>} : vector<8x512xbf16>, vector<512x1024xbf16>, vector<8x1024xf32> -> vector<8x1024xf32>
    %c0_12 = arith.constant 0 : index
    %c0_13 = arith.constant 0 : index
    %24 = vector.load %arg6[%c0_12, %c0_13] : memref<1x512xf32, #tpu.memory_space<vmem>>, vector<1x512xf32>
    %c0_14 = arith.constant 0 : index
    %c0_15 = arith.constant 0 : index
    %25 = vector.load %arg7[%c0_14, %c0_15] : memref<1x512xf32, #tpu.memory_space<vmem>>, vector<1x512xf32>
    %26 = vector.extract_strided_slice %23 {offsets = [0, 0], sizes = [8, 512], strides = [1, 1]} : vector<8x1024xf32> to vector<8x512xf32>
    %27 = vector.broadcast %24 : vector<1x512xf32> to vector<8x512xf32>
    %28 = arith.mulf %26, %27 : vector<8x512xf32>
    %29 = vector.broadcast %25 : vector<1x512xf32> to vector<8x512xf32>
    %30 = arith.addf %28, %29 : vector<8x512xf32>
    %cst_16 = arith.constant 0.000000e+00 : f32
    %31 = vector.broadcast %cst_16 : f32 to vector<8x512xf32>
    %32 = arith.maximumf %30, %31 : vector<8x512xf32>
    %33 = vector.extract_strided_slice %23 {offsets = [0, 512], sizes = [8, 512], strides = [1, 1]} : vector<8x1024xf32> to vector<8x512xf32>
    %34 = vector.broadcast %24 : vector<1x512xf32> to vector<8x512xf32>
    %35 = arith.mulf %33, %34 : vector<8x512xf32>
    %36 = vector.broadcast %25 : vector<1x512xf32> to vector<8x512xf32>
    %37 = arith.addf %35, %36 : vector<8x512xf32>
    %cst_17 = arith.constant 0.000000e+00 : f32
    %38 = vector.broadcast %cst_17 : f32 to vector<8x512xf32>
    %39 = arith.maximumf %37, %38 : vector<8x512xf32>
    %40 = arith.maximumf %32, %39 : vector<8x512xf32>
    %41 = arith.truncf %40 : vector<8x512xf32> to vector<8x512xbf16>
    %c0_18 = arith.constant 0 : index
    %c0_19 = arith.constant 0 : index
    %42 = vector.load %arg8[%c0_18, %c0_19] : memref<512x1024xbf16, #tpu.memory_space<vmem>>, vector<512x1024xbf16>
    %cst_20 = arith.constant dense<0.000000e+00> : vector<8x1024xf32>
    %43 = tpu.matmul %41, %42, %cst_20 {dimension_numbers = #tpu.dot_dimension_numbers<[1], [0], [0], [1], [0, 0, 1, 1], [], []>} : vector<8x512xbf16>, vector<512x1024xbf16>, vector<8x1024xf32> -> vector<8x1024xf32>
    %c0_21 = arith.constant 0 : index
    %c0_22 = arith.constant 0 : index
    %44 = vector.load %arg9[%c0_21, %c0_22] : memref<1x512xf32, #tpu.memory_space<vmem>>, vector<1x512xf32>
    %c0_23 = arith.constant 0 : index
    %c0_24 = arith.constant 0 : index
    %45 = vector.load %arg10[%c0_23, %c0_24] : memref<1x512xf32, #tpu.memory_space<vmem>>, vector<1x512xf32>
    %46 = vector.extract_strided_slice %43 {offsets = [0, 0], sizes = [8, 512], strides = [1, 1]} : vector<8x1024xf32> to vector<8x512xf32>
    %47 = vector.broadcast %44 : vector<1x512xf32> to vector<8x512xf32>
    %48 = arith.mulf %46, %47 : vector<8x512xf32>
    %49 = vector.broadcast %45 : vector<1x512xf32> to vector<8x512xf32>
    %50 = arith.addf %48, %49 : vector<8x512xf32>
    %cst_25 = arith.constant 0.000000e+00 : f32
    %51 = vector.broadcast %cst_25 : f32 to vector<8x512xf32>
    %52 = arith.maximumf %50, %51 : vector<8x512xf32>
    %53 = vector.extract_strided_slice %43 {offsets = [0, 512], sizes = [8, 512], strides = [1, 1]} : vector<8x1024xf32> to vector<8x512xf32>
    %54 = vector.broadcast %44 : vector<1x512xf32> to vector<8x512xf32>
    %55 = arith.mulf %53, %54 : vector<8x512xf32>
    %56 = vector.broadcast %45 : vector<1x512xf32> to vector<8x512xf32>
    %57 = arith.addf %55, %56 : vector<8x512xf32>
    %cst_26 = arith.constant 0.000000e+00 : f32
    %58 = vector.broadcast %cst_26 : f32 to vector<8x512xf32>
    %59 = arith.maximumf %57, %58 : vector<8x512xf32>
    %60 = arith.maximumf %52, %59 : vector<8x512xf32>
    %61 = arith.truncf %60 : vector<8x512xf32> to vector<8x512xbf16>
    %c0_27 = arith.constant 0 : index
    %c0_28 = arith.constant 0 : index
    %62 = vector.load %arg11[%c0_27, %c0_28] : memref<512x512xbf16, #tpu.memory_space<vmem>>, vector<512x512xbf16>
    %cst_29 = arith.constant dense<0.000000e+00> : vector<8x512xf32>
    %63 = tpu.matmul %61, %62, %cst_29 {dimension_numbers = #tpu.dot_dimension_numbers<[1], [0], [0], [1], [0, 0, 1, 1], [], []>} : vector<8x512xbf16>, vector<512x512xbf16>, vector<8x512xf32> -> vector<8x512xf32>
    %c0_30 = arith.constant 0 : index
    %c0_31 = arith.constant 0 : index
    %64 = vector.load %arg12[%c0_30, %c0_31] : memref<1x256xf32, #tpu.memory_space<vmem>>, vector<1x256xf32>
    %c0_32 = arith.constant 0 : index
    %c0_33 = arith.constant 0 : index
    %65 = vector.load %arg13[%c0_32, %c0_33] : memref<1x256xf32, #tpu.memory_space<vmem>>, vector<1x256xf32>
    %66 = vector.extract_strided_slice %63 {offsets = [0, 0], sizes = [8, 256], strides = [1, 1]} : vector<8x512xf32> to vector<8x256xf32>
    %67 = vector.broadcast %64 : vector<1x256xf32> to vector<8x256xf32>
    %68 = arith.mulf %66, %67 : vector<8x256xf32>
    %69 = vector.broadcast %65 : vector<1x256xf32> to vector<8x256xf32>
    %70 = arith.addf %68, %69 : vector<8x256xf32>
    %cst_34 = arith.constant 0.000000e+00 : f32
    %71 = vector.broadcast %cst_34 : f32 to vector<8x256xf32>
    %72 = arith.maximumf %70, %71 : vector<8x256xf32>
    %73 = vector.extract_strided_slice %63 {offsets = [0, 256], sizes = [8, 256], strides = [1, 1]} : vector<8x512xf32> to vector<8x256xf32>
    %74 = vector.broadcast %64 : vector<1x256xf32> to vector<8x256xf32>
    %75 = arith.mulf %73, %74 : vector<8x256xf32>
    %76 = vector.broadcast %65 : vector<1x256xf32> to vector<8x256xf32>
    %77 = arith.addf %75, %76 : vector<8x256xf32>
    %cst_35 = arith.constant 0.000000e+00 : f32
    %78 = vector.broadcast %cst_35 : f32 to vector<8x256xf32>
    %79 = arith.maximumf %77, %78 : vector<8x256xf32>
    %80 = arith.maximumf %72, %79 : vector<8x256xf32>
    %81 = arith.truncf %80 : vector<8x256xf32> to vector<8x256xbf16>
    %c0_36 = arith.constant 0 : index
    %c0_37 = arith.constant 0 : index
    %82 = vector.load %arg14[%c0_36, %c0_37] : memref<256x8xbf16, #tpu.memory_space<vmem>>, vector<256x8xbf16>
    %cst_38 = arith.constant dense<0.000000e+00> : vector<8x8xf32>
    %83 = tpu.matmul %81, %82, %cst_38 {dimension_numbers = #tpu.dot_dimension_numbers<[1], [0], [0], [1], [0, 0, 1, 1], [], []>} : vector<8x256xbf16>, vector<256x8xbf16>, vector<8x8xf32> -> vector<8x8xf32>
    %c0_39 = arith.constant 0 : index
    %c0_40 = arith.constant 0 : index
    %84 = vector.load %arg15[%c0_39, %c0_40] : memref<128x64xbf16, #tpu.memory_space<vmem>>, vector<128x64xbf16>
    %cst_41 = arith.constant dense<0.000000e+00> : vector<8x64xf32>
    %85 = tpu.matmul %1, %84, %cst_41 {dimension_numbers = #tpu.dot_dimension_numbers<[1], [0], [0], [1], [0, 0, 1, 1], [], []>} : vector<8x128xbf16>, vector<128x64xbf16>, vector<8x64xf32> -> vector<8x64xf32>
    %c0_42 = arith.constant 0 : index
    %c0_43 = arith.constant 0 : index
    %86 = vector.load %arg16[%c0_42, %c0_43] : memref<1x64xf32, #tpu.memory_space<vmem>>, vector<1x64xf32>
    %87 = vector.broadcast %86 : vector<1x64xf32> to vector<8x64xf32>
    %88 = arith.mulf %85, %87 : vector<8x64xf32>
    %c0_44 = arith.constant 0 : index
    %c0_45 = arith.constant 0 : index
    %89 = vector.load %arg17[%c0_44, %c0_45] : memref<1x64xf32, #tpu.memory_space<vmem>>, vector<1x64xf32>
    %90 = vector.broadcast %89 : vector<1x64xf32> to vector<8x64xf32>
    %91 = arith.addf %88, %90 : vector<8x64xf32>
    %cst_46 = arith.constant 0.000000e+00 : f32
    %92 = vector.broadcast %cst_46 : f32 to vector<8x64xf32>
    %93 = arith.maximumf %91, %92 : vector<8x64xf32>
    %94 = arith.truncf %93 : vector<8x64xf32> to vector<8x64xbf16>
    %c0_47 = arith.constant 0 : index
    %c0_48 = arith.constant 0 : index
    %95 = vector.load %arg18[%c0_47, %c0_48] : memref<64x16xbf16, #tpu.memory_space<vmem>>, vector<64x16xbf16>
    %cst_49 = arith.constant dense<0.000000e+00> : vector<8x16xf32>
    %96 = tpu.matmul %94, %95, %cst_49 {dimension_numbers = #tpu.dot_dimension_numbers<[1], [0], [0], [1], [0, 0, 1, 1], [], []>} : vector<8x64xbf16>, vector<64x16xbf16>, vector<8x16xf32> -> vector<8x16xf32>
    %c0_50 = arith.constant 0 : index
    %c0_51 = arith.constant 0 : index
    %97 = vector.load %arg19[%c0_50, %c0_51] : memref<1x16xf32, #tpu.memory_space<vmem>>, vector<1x16xf32>
    %98 = vector.broadcast %97 : vector<1x16xf32> to vector<8x16xf32>
    %99 = arith.mulf %96, %98 : vector<8x16xf32>
    %c0_52 = arith.constant 0 : index
    %c0_53 = arith.constant 0 : index
    %100 = vector.load %arg20[%c0_52, %c0_53] : memref<1x16xf32, #tpu.memory_space<vmem>>, vector<1x16xf32>
    %101 = vector.broadcast %100 : vector<1x16xf32> to vector<8x16xf32>
    %102 = arith.addf %99, %101 : vector<8x16xf32>
    %cst_54 = arith.constant 0.000000e+00 : f32
    %103 = vector.broadcast %cst_54 : f32 to vector<8x16xf32>
    %104 = arith.maximumf %102, %103 : vector<8x16xf32>
    %105 = arith.truncf %104 : vector<8x16xf32> to vector<8x16xbf16>
    %c0_55 = arith.constant 0 : index
    %c0_56 = arith.constant 0 : index
    %106 = vector.load %arg21[%c0_55, %c0_56] : memref<16x8xbf16, #tpu.memory_space<vmem>>, vector<16x8xbf16>
    %cst_57 = arith.constant dense<0.000000e+00> : vector<8x8xf32>
    %107 = tpu.matmul %105, %106, %cst_57 {dimension_numbers = #tpu.dot_dimension_numbers<[1], [0], [0], [1], [0, 0, 1, 1], [], []>} : vector<8x16xbf16>, vector<16x8xbf16>, vector<8x8xf32> -> vector<8x8xf32>
    %108 = arith.addf %83, %107 : vector<8x8xf32>
    %c0_58 = arith.constant 0 : index
    %c0_59 = arith.constant 0 : index
    %109 = vector.load %arg22[%c0_58, %c0_59] : memref<1x8xf32, #tpu.memory_space<vmem>>, vector<1x8xf32>
    %110 = vector.broadcast %109 : vector<1x8xf32> to vector<8x8xf32>
    %111 = arith.addf %108, %110 : vector<8x8xf32>
    %c0_60 = arith.constant 0 : index
    %c0_61 = arith.constant 0 : index
    %112 = vector.load %arg23[%c0_60, %c0_61] : memref<8x8xf32, #tpu.memory_space<vmem>>, vector<8x8xf32>
    tpu.vector_store %arg23[%c0_60, %c0_61], %111 {strides = array<i32>} : memref<8x8xf32, #tpu.memory_space<vmem>>, vector<8x8xf32>,
    return
  }
  func.func @transform_0(%arg0: i32) -> (i32, i32) {
    %c0_i32 = arith.constant 0 : i32
    %c0_i32_0 = arith.constant 0 : i32
    return %arg0, %c0_i32 : i32, i32
  }
  func.func @transform_1(%arg0: i32) -> (i32, i32) {
    %c0_i32 = arith.constant 0 : i32
    %c0_i32_0 = arith.constant 0 : i32
    %c0_i32_1 = arith.constant 0 : i32
    return %c0_i32, %c0_i32_0 : i32, i32
  }
  func.func @transform_2(%arg0: i32) -> (i32, i32) {
    %c0_i32 = arith.constant 0 : i32
    %c0_i32_0 = arith.constant 0 : i32
    %c0_i32_1 = arith.constant 0 : i32
    return %c0_i32, %c0_i32_0 : i32, i32
  }
  func.func @transform_3(%arg0: i32) -> (i32, i32) {
    %c0_i32 = arith.constant 0 : i32
    %c0_i32_0 = arith.constant 0 : i32
    %c0_i32_1 = arith.constant 0 : i32
    return %c0_i32, %c0_i32_0 : i32, i32
  }
  func.func @transform_4(%arg0: i32) -> (i32, i32) {
    %c0_i32 = arith.constant 0 : i32
    %c0_i32_0 = arith.constant 0 : i32
    %c0_i32_1 = arith.constant 0 : i32
    return %c0_i32, %c0_i32_0 : i32, i32
  }
  func.func @transform_5(%arg0: i32) -> (i32, i32) {
    %c0_i32 = arith.constant 0 : i32
    %c0_i32_0 = arith.constant 0 : i32
    %c0_i32_1 = arith.constant 0 : i32
    return %c0_i32, %c0_i32_0 : i32, i32
  }
  func.func @transform_6(%arg0: i32) -> (i32, i32) {
    %c0_i32 = arith.constant 0 : i32
    %c0_i32_0 = arith.constant 0 : i32
    %c0_i32_1 = arith.constant 0 : i32
    return %c0_i32, %c0_i32_0 : i32, i32
  }
  func.func @transform_7(%arg0: i32) -> (i32, i32) {
    %c0_i32 = arith.constant 0 : i32
    %c0_i32_0 = arith.constant 0 : i32
    %c0_i32_1 = arith.constant 0 : i32
    return %c0_i32, %c0_i32_0 : i32, i32
  }
  func.func @transform_8(%arg0: i32) -> (i32, i32) {
    %c0_i32 = arith.constant 0 : i32
    %c0_i32_0 = arith.constant 0 : i32
    %c0_i32_1 = arith.constant 0 : i32
    return %c0_i32, %c0_i32_0 : i32, i32
  }
  func.func @transform_9(%arg0: i32) -> (i32, i32) {
    %c0_i32 = arith.constant 0 : i32
    %c0_i32_0 = arith.constant 0 : i32
    %c0_i32_1 = arith.constant 0 : i32
    return %c0_i32, %c0_i32_0 : i32, i32
  }
  func.func @transform_10(%arg0: i32) -> (i32, i32) {
    %c0_i32 = arith.constant 0 : i32
    %c0_i32_0 = arith.constant 0 : i32
    %c0_i32_1 = arith.constant 0 : i32
    return %c0_i32, %c0_i32_0 : i32, i32
  }
  func.func @transform_11(%arg0: i32) -> (i32, i32) {
    %c0_i32 = arith.constant 0 : i32
    %c0_i32_0 = arith.constant 0 : i32
    %c0_i32_1 = arith.constant 0 : i32
    return %c0_i32, %c0_i32_0 : i32, i32
  }
  func.func @transform_12(%arg0: i32) -> (i32, i32) {
    %c0_i32 = arith.constant 0 : i32
    %c0_i32_0 = arith.constant 0 : i32
    %c0_i32_1 = arith.constant 0 : i32
    return %c0_i32, %c0_i32_0 : i32, i32
  }
  func.func @transform_13(%arg0: i32) -> (i32, i32) {
    %c0_i32 = arith.constant 0 : i32
    %c0_i32_0 = arith.constant 0 : i32
    %c0_i32_1 = arith.constant 0 : i32
    return %c0_i32, %c0_i32_0 : i32, i32
  }
  func.func @transform_14(%arg0: i32) -> (i32, i32) {
    %c0_i32 = arith.constant 0 : i32
    %c0_i32_0 = arith.constant 0 : i32
    %c0_i32_1 = arith.constant 0 : i32
    return %c0_i32, %c0_i32_0 : i32, i32
  }
  func.func @transform_15(%arg0: i32) -> (i32, i32) {
    %c0_i32 = arith.constant 0 : i32
    %c0_i32_0 = arith.constant 0 : i32
    %c0_i32_1 = arith.constant 0 : i32
    return %c0_i32, %c0_i32_0 : i32, i32
  }
  func.func @transform_16(%arg0: i32) -> (i32, i32) {
    %c0_i32 = arith.constant 0 : i32
    %c0_i32_0 = arith.constant 0 : i32
    %c0_i32_1 = arith.constant 0 : i32
    return %c0_i32, %c0_i32_0 : i32, i32
  }
  func.func @transform_17(%arg0: i32) -> (i32, i32) {
    %c0_i32 = arith.constant 0 : i32
    %c0_i32_0 = arith.constant 0 : i32
    %c0_i32_1 = arith.constant 0 : i32
    return %c0_i32, %c0_i32_0 : i32, i32
  }
  func.func @transform_18(%arg0: i32) -> (i32, i32) {
    %c0_i32 = arith.constant 0 : i32
    %c0_i32_0 = arith.constant 0 : i32
    %c0_i32_1 = arith.constant 0 : i32
    return %c0_i32, %c0_i32_0 : i32, i32
  }
  func.func @transform_19(%arg0: i32) -> (i32, i32) {
    %c0_i32 = arith.constant 0 : i32
    %c0_i32_0 = arith.constant 0 : i32
    %c0_i32_1 = arith.constant 0 : i32
    return %c0_i32, %c0_i32_0 : i32, i32
  }
  func.func @transform_20(%arg0: i32) -> (i32, i32) {
    %c0_i32 = arith.constant 0 : i32
    %c0_i32_0 = arith.constant 0 : i32
    %c0_i32_1 = arith.constant 0 : i32
    return %c0_i32, %c0_i32_0 : i32, i32
  }
  func.func @transform_21(%arg0: i32) -> (i32, i32) {
    %c0_i32 = arith.constant 0 : i32
    %c0_i32_0 = arith.constant 0 : i32
    %c0_i32_1 = arith.constant 0 : i32
    return %c0_i32, %c0_i32_0 : i32, i32
  }
  func.func @transform_22(%arg0: i32) -> (i32, i32) {
    %c0_i32 = arith.constant 0 : i32
    %c0_i32_0 = arith.constant 0 : i32
    return %arg0, %c0_i32 : i32, i32
  }
}

</mosaic_0001>

<bundles_post_ra>
// kernel: zolotyh_forward.1
= control target key start
LH: loop header
LB: loop body
LE: loop exit
PB: predicated region body
PF: predicated region fallthrough
CT: control target
= control target key end

     0   :  { %s7694_s0 = inlined_call_operand.vmem [shape: f32[8,128], index: 0, kind: input, shape index: {}]   ;;  %s7695_s1 = inlined_call_operand.hbm [shape: bf16[128,1024], index: 1, kind: input, shape index: {}]   ;;  %s7696_s2 = inlined_call_operand.vmem [shape: f32[1,512], index: 2, kind: input, shape index: {}]   ;;  %s7697_s3 = inlined_call_operand.vmem [shape: f32[1,512], index: 3, kind: input, shape index: {}]   ;;  %s7698_s4 = inlined_call_operand.hbm [shape: bf16[512,1024], index: 4, kind: input, shape index: {}]   ;;  %s7699_s5 = inlined_call_operand.vmem [shape: f32[1,512], index: 5, kind: input, shape index: {}]   ;;  %s7700_s6 = inlined_call_operand.vmem [shape: f32[1,512], index: 6, kind: input, shape index: {}]   ;;  %s7701_s7 = inlined_call_operand.hbm [shape: bf16[512,1024], index: 7, kind: input, shape index: {}]   ;;  %s7702_s8 = inlined_call_operand.vmem [shape: f32[1,512], index: 8, kind: input, shape index: {}]   ;;  %s7703_s9 = inlined_call_operand.vmem [shape: f32[1,512], index: 9, kind: input, shape index: {}]   ;;  %s7704_s10 = inlined_call_operand.hbm [shape: bf16[512,512], index: 10, kind: input, shape index: {}]   ;;  %s7705_s11 = inlined_call_operand.vmem [shape: f32[1,256], index: 11, kind: input, shape index: {}]   ;;  %s7706_s12 = inlined_call_operand.vmem [shape: f32[1,256], index: 12, kind: input, shape index: {}]   ;;  %s7707_s13 = inlined_call_operand.vmem [shape: bf16[256,8], index: 13, kind: input, shape index: {}]   ;;  %s7708_s14 = inlined_call_operand.vmem [shape: bf16[128,64], index: 14, kind: input, shape index: {}]   ;;  %s7709_s15 = inlined_call_operand.vmem [shape: f32[1,64], index: 15, kind: input, shape index: {}]   ;;  %s7710_s16 = inlined_call_operand.vmem [shape: f32[1,64], index: 16, kind: input, shape index: {}]   ;;  %s7711_s17 = inlined_call_operand.vmem [shape: bf16[64,16], index: 17, kind: input, shape index: {}]   ;;  %s7712_s18 = inlined_call_operand.vmem [shape: f32[1,16], index: 18, kind: input, shape index: {}]   ;;  %s7713_s19 = inlined_call_operand.vmem [shape: f32[1,16], index: 19, kind: input, shape index: {}]   ;;  %s7714_s20 = inlined_call_operand.vmem [shape: bf16[16,8], index: 20, kind: input, shape index: {}]   ;;  %s7715_s21 = inlined_call_operand.vmem [shape: f32[1,8], index: 21, kind: input, shape index: {}]   ;;  %s7716_s22 = inlined_call_operand.vmem [shape: f32[8,8], index: 22, kind: output, shape index: {}]  }
   0x1   :  { %7717 = sst [smem:[#allocation12_spill]] %s7694_s0 }
   0x2   :  { %7718 = sst [smem:[#allocation13_spill]] %s7695_s1 }
   0x3   :  { %7719 = sst [smem:[#allocation14_spill]] %s7696_s2 }
   0x4   :  { %7720 = sst [smem:[#allocation15_spill]] %s7697_s3 }
   0x5   :  { %7721 = sst [smem:[#allocation16_spill]] %s7698_s4 }
   0x6   :  { %7722 = sst [smem:[#allocation17_spill]] %s7699_s5 }
   0x7   :  { %7723 = sst [smem:[#allocation18_spill]] %s7700_s6 }
   0x8   :  { %7724 = sst [smem:[#allocation19_spill]] %s7716_s22 }
   0x9   :  { %27 = vsyncpa [#allocation3], 0 }
   0xa   :  { %28 = vsyncpa [#allocation5], 0 }
   0xb   :  { %29 = vsyncpa [#allocation8], 0  ;;  %s7192_s3 = smov [#allocation4]   ;;  %s7193_s29 = smov [#allocation2]  }
   0xc   :  { %s53_s28 = sshll.u32 %s7192_s3, 4  ;;  %s37_s30 = sshll.u32 %s7193_s29, 4  ;;  %s54_s28 = int_to_ptr.vmem [resolvable:$true] %s53_s28  ;;  %s38_s30 = int_to_ptr.vmem [resolvable:$true] %s37_s30 }
   0xd   :  { %s7114_s4 = scalar_lea.vmem %s54_s28, 32768  ;;  %p7119_p1 = scmp.lt.s32.totalorder %s54_s28, %s54_s28 }
   0xe   :  { %p7115_p0 = scmp.ne.s32.totalorder %s54_s28, %s7114_s4  ;;  %p7120_p2 = scmp.lt.s32.totalorder %s7114_s4, %s7114_s4 }
  0x10   :  { %p7121_p3 = por %p7120_p2, %p7119_p1 }
  0x12   :  { %p7122_p4 = pnand %p7121_p3, %p7115_p0 }
  0x14   :  { %7125 = shalt.err (!%p7122_p4)
}
  0x15   :  { %s7194_s0 = smov 512   ;;  %s7195_s23 = smov 32  }
  0x16   :  { %s7725_s24 = sld [smem:[#allocation16_spill]]  ;;  %s7134_s6 = scalar_lea.vmem %s38_s30, 8192 }
  0x17   :  { %p7135_p5 = scmp.ne.s32.totalorder %s38_s30, %s7134_s6  ;;  %p7139_p6 = scmp.lt.s32.totalorder %s38_s30, %s38_s30 }
  0x18   :  { %p7140_p7 = scmp.lt.s32.totalorder %s7134_s6, %s7134_s6 }
  0x1a   :  { %p7141_p8 = por %p7140_p7, %p7139_p6 }
  0x1c   :  { %59 = dma.hbm_to_vmem [thread:$0]  %s7725_s24, 32768, %s54_s28, [#allocation5], %s7194_s0, %s7194_s0, %s7195_s23  }
  0x1d   :  { %p7142_p9 = pnand %p7141_p8, %p7135_p5 }
  0x1f   :  { %7145 = shalt.err (!%p7142_p9)
}
  0x20   :  { %s7726_s2 = sld [smem:[#allocation13_spill]]  ;;  %s7196_s27 = smov [#allocation6]  }
  0x21   :  { %s69_s3 = sshll.u32 %s7196_s27, 4  ;;  %s7197_s29 = smov [#allocation7]   ;;  %s70_s3 = int_to_ptr.vmem [resolvable:$true] %s69_s3 }
  0x22   :  { %s85_s4 = sshll.u32 %s7197_s29, 4  ;;  %s7154_s22 = scalar_lea.vmem %s70_s3, 32768  ;;  %s86_s4 = int_to_ptr.vmem [resolvable:$true] %s85_s4 }
  0x23   :  { %p7155_p10 = scmp.ne.s32.totalorder %s70_s3, %s7154_s22  ;;  %p7159_p11 = scmp.lt.s32.totalorder %s70_s3, %s70_s3 }
  0x24   :  { %p7160_p12 = scmp.lt.s32.totalorder %s7154_s22, %s7154_s22 }
  0x26   :  { %43 = dma.hbm_to_vmem [thread:$0]  %s7726_s2, 8192, %s38_s30, [#allocation3], %s7194_s0, %s7194_s0, %s7195_s23  }
  0x27   :  { %p7161_p13 = por %p7160_p12, %p7159_p11 }
  0x29   :  { %p7162_p0 = pnand %p7161_p13, %p7155_p10 }
  0x2b   :  { %7165 = shalt.err (!%p7162_p0)
}
  0x2c   :  { %75 = dma.hbm_to_vmem [thread:$0]  %s7701_s7, 32768, %s70_s3, [#allocation5], %s7194_s0, %s7194_s0, %s7195_s23  }
  0x2d   :  { %s7174_s5 = scalar_lea.vmem %s86_s4, 16384  ;;  %p7179_p2 = scmp.lt.s32.totalorder %s86_s4, %s86_s4 }
  0x2e   :  { %p7175_p1 = scmp.ne.s32.totalorder %s86_s4, %s7174_s5  ;;  %p7180_p3 = scmp.lt.s32.totalorder %s7174_s5, %s7174_s5 }
  0x30   :  { %p7181_p4 = por %p7180_p3, %p7179_p2 }
  0x32   :  { %p7182_p5 = pnand %p7181_p4, %p7175_p1 }
  0x34   :  { %7185 = shalt.err (!%p7182_p5)
}
  0x35   :  { %s7198_s30 = smov 256   ;;  %s7199_s24 = smov 16  }
  0x36   :  { %91 = dma.hbm_to_vmem [thread:$0]  %s7704_s10, 16384, %s86_s4, [#allocation8], %s7198_s30, %s7198_s30, %s7199_s24  }
  0x37   :  { %7186 = dma.done.wait [#allocation3], 8192  }
  0x38   :  { %7187 = vsyncadd [#allocation3], 4294959104 }
  0x39   :  { %7188 = dma.done.wait [#allocation5], 65536  }
  0x3a   :  { %7189 = vsyncadd [#allocation5], 4294901760 }
  0x3b   :  { %7190 = dma.done.wait [#allocation8], 16384  }
  0x3c   :  { %7191 = vsyncadd [#allocation8], 4294950912  ;;  %v7200_v0 = vmov 0   ;;  %v185_v1 = vld [vmem:[#allocation2 + $0x1c0] sm:$0xff]  ;;  %v186_v3 = vld [vmem:[#allocation2 + $0x1c8] sm:$0xff]  ;;  %s7727_s22 = sld [smem:[#allocation12_spill]] }
  0x3d   :  { %545 = vmatprep.mubr.bf16.mxu0 %v7200_v0  ;;  %586 = vmatprep.mubr.bf16.mxu1 %v7200_v0  ;;  %v189_v2 = vld [vmem:[#allocation2 + $0x1e0] sm:$0xff]  ;;  %v190_v5 = vld [vmem:[#allocation2 + $0x1e8] sm:$0xff]  ;;  %v187_v63 = vld [vmem:[#allocation2 + $0x1d0] sm:$0xff]  ;;  %s7728_s26 = sld [smem:[#allocation14_spill]]  ;;  %vm7202_vm0 = vmmov 0   ;;  %vm5791_vm1 = vcmask 523264  }
  0x3e   :  { %v6115_v4 = vcombine.high %v185_v1, %v189_v2  ;;  %v6114_v6 = vcombine.low %v185_v1, %v189_v2  ;;  %v177_v7 = vld [vmem:[#allocation2 + $0x180] sm:$0xff]  ;;  %v6117_v9 = vcombine.high %v186_v3, %v190_v5  ;;  %v6116_v10 = vcombine.low %v186_v3, %v190_v5  ;;  %v178_v12 = vld [vmem:[#allocation2 + $0x188] sm:$0xff]  ;;  %v191_v1 = vld [vmem:[#allocation2 + $0x1f0] sm:$0xff]  ;;  %s7729_s3 = sld [smem:[#allocation15_spill]] }
  0x3f   :  { %v181_v8 = vld [vmem:[#allocation2 + $0x1a0] sm:$0xff]  ;;  %v182_v13 = vld [vmem:[#allocation2 + $0x1a8] sm:$0xff]  ;;  %v188_v3 = vld [vmem:[#allocation2 + $0x1d8] sm:$0xff]  ;;  %s7730_s28 = sld [smem:[#allocation17_spill]]  ;;  %vm5861_vm2 = vcmask 130048   ;;  %vm6049_vm3 = vcmask 64512  }
  0x40   :  { %v6107_v11 = vcombine.high %v177_v7, %v181_v8  ;;  %v169_v14 = vld [vmem:[#allocation2 + $0x140] sm:$0xff]  ;;  %513 = vmatprep.subr.bf16.mxu0 %v6115_v4  ;;  %v6109_v15 = vcombine.high %v178_v12, %v182_v13  ;;  %v170_v17 = vld [vmem:[#allocation2 + $0x148] sm:$0xff]  ;;  %554 = vmatprep.subr.bf16.mxu1 %v6117_v9  ;;  %v6106_v19 = vcombine.low %v177_v7, %v181_v8  ;;  %v192_v4 = vld [vmem:[#allocation2 + $0x1f8] sm:$0xff]  ;;  %s7731_s30 = sld [smem:[#allocation18_spill]] }
  0x41   :  { %v173_v16 = vld [vmem:[#allocation2 + $0x160] sm:$0xff]  ;;  %v174_v18 = vld [vmem:[#allocation2 + $0x168] sm:$0xff]  ;;  %514 = vmatpush1.bf16.msra.mxu0 %v6114_v6  ;;  %555 = vmatpush1.bf16.msra.mxu1 %v6116_v10  ;;  %v6108_v20 = vcombine.low %v178_v12, %v182_v13  ;;  %v179_v6 = vld [vmem:[#allocation2 + $0x190] sm:$0xff]  ;;  %v6119_v9 = vcombine.high %v187_v63, %v191_v1  ;;  %v6121_v12 = vcombine.high %v188_v3, %v192_v4 }
  0x42   :  { %515 = vmatprep.subr.bf16.mxu0 %v6107_v11  ;;  %v6099_v21 = vcombine.high %v169_v14, %v173_v16  ;;  %556 = vmatprep.subr.bf16.mxu1 %v6109_v15  ;;  %v6101_v22 = vcombine.high %v170_v17, %v174_v18  ;;  %v161_v23 = vld [vmem:[#allocation2 + $0x100] sm:$0xff]  ;;  %v162_v25 = vld [vmem:[#allocation2 + $0x108] sm:$0xff]  ;;  %v6098_v27 = vcombine.low %v169_v14, %v173_v16  ;;  %v183_v7 = vld [vmem:[#allocation2 + $0x1b0] sm:$0xff] }
  0x43   :  { %v165_v24 = vld [vmem:[#allocation2 + $0x120] sm:$0xff]  ;;  %v166_v26 = vld [vmem:[#allocation2 + $0x128] sm:$0xff]  ;;  %v6100_v28 = vcombine.low %v170_v17, %v174_v18  ;;  %v180_v10 = vld [vmem:[#allocation2 + $0x198] sm:$0xff]  ;;  %v6118_v14 = vcombine.low %v187_v63, %v191_v1  ;;  %v6120_v17 = vcombine.low %v188_v3, %v192_v4  ;;  %v6111_v18 = vcombine.high %v179_v6, %v183_v7 }
  0x44   :  { %v6091_v29 = vcombine.high %v161_v23, %v165_v24  ;;  %v6093_v30 = vcombine.high %v162_v25, %v166_v26  ;;  %v153_v31 = vld [vmem:[#allocation2 + $0xc0] sm:$0xff]  ;;  %v154_v33 = vld [vmem:[#allocation2 + $0xc8] sm:$0xff]  ;;  %v6090_v35 = vcombine.low %v161_v23, %v165_v24  ;;  %v6092_v36 = vcombine.low %v162_v25, %v166_v26  ;;  %v184_v11 = vld [vmem:[#allocation2 + $0x1b8] sm:$0xff] }
  0x45   :  { %516 = vmatpush1.bf16.msra.mxu0 %v6106_v19  ;;  %557 = vmatpush1.bf16.msra.mxu1 %v6108_v20  ;;  %v157_v32 = vld [vmem:[#allocation2 + $0xe0] sm:$0xff]  ;;  %v158_v34 = vld [vmem:[#allocation2 + $0xe8] sm:$0xff]  ;;  %v171_v15 = vld [vmem:[#allocation2 + $0x150] sm:$0xff]  ;;  %v6112_v25 = vcombine.low %v180_v10, %v184_v11 }
  0x46   :  { %517 = vmatprep.subr.bf16.mxu0 %v6099_v21  ;;  %558 = vmatprep.subr.bf16.mxu1 %v6101_v22  ;;  %v6083_v37 = vcombine.high %v153_v31, %v157_v32  ;;  %v6085_v38 = vcombine.high %v154_v33, %v158_v34  ;;  %v145_v39 = vld [vmem:[#allocation2 + $0x80] sm:$0xff]  ;;  %v146_v41 = vld [vmem:[#allocation2 + $0x88] sm:$0xff]  ;;  %v6082_v43 = vcombine.low %v153_v31, %v157_v32  ;;  %v175_v16 = vld [vmem:[#allocation2 + $0x170] sm:$0xff] }
  0x47   :  { %v149_v40 = vld [vmem:[#allocation2 + $0xa0] sm:$0xff]  ;;  %v150_v42 = vld [vmem:[#allocation2 + $0xa8] sm:$0xff]  ;;  %v6084_v44 = vcombine.low %v154_v33, %v158_v34  ;;  %v172_v19 = vld [vmem:[#allocation2 + $0x158] sm:$0xff]  ;;  %v6113_v21 = vcombine.high %v180_v10, %v184_v11  ;;  %v6110_v22 = vcombine.low %v179_v6, %v183_v7  ;;  %v6103_v26 = vcombine.high %v171_v15, %v175_v16 }
  0x48   :  { %v6075_v45 = vcombine.high %v145_v39, %v149_v40  ;;  %v6077_v46 = vcombine.high %v146_v41, %v150_v42  ;;  %v137_v47 = vld [vmem:[#allocation2 + $0x40] sm:$0xff]  ;;  %v138_v49 = vld [vmem:[#allocation2 + $0x48] sm:$0xff]  ;;  %v6074_v51 = vcombine.low %v145_v39, %v149_v40  ;;  %v6076_v52 = vcombine.low %v146_v41, %v150_v42  ;;  %v176_v20 = vld [vmem:[#allocation2 + $0x178] sm:$0xff] }
  0x49   :  { %518 = vmatpush1.bf16.msra.mxu0 %v6098_v27  ;;  %559 = vmatpush1.bf16.msra.mxu1 %v6100_v28  ;;  %v141_v48 = vld [vmem:[#allocation2 + $0x60] sm:$0xff]  ;;  %v142_v50 = vld [vmem:[#allocation2 + $0x68] sm:$0xff]  ;;  %v163_v23 = vld [vmem:[#allocation2 + $0x110] sm:$0xff]  ;;  %v6104_v33 = vcombine.low %v172_v19, %v176_v20 }
  0x4a   :  { %519 = vmatprep.subr.bf16.mxu0 %v6091_v29  ;;  %560 = vmatprep.subr.bf16.mxu1 %v6093_v30  ;;  %v6067_v53 = vcombine.high %v137_v47, %v141_v48  ;;  %v6069_v54 = vcombine.high %v138_v49, %v142_v50  ;;  %v129_v55 = vld [vmem:[#allocation2] sm:$0xff]  ;;  %v130_v57 = vld [vmem:[#allocation2 + $0x8] sm:$0xff]  ;;  %v6066_v59 = vcombine.low %v137_v47, %v141_v48  ;;  %v167_v24 = vld [vmem:[#allocation2 + $0x130] sm:$0xff] }
  0x4b   :  { %v133_v56 = vld [vmem:[#allocation2 + $0x20] sm:$0xff]  ;;  %v134_v58 = vld [vmem:[#allocation2 + $0x28] sm:$0xff]  ;;  %v6068_v60 = vcombine.low %v138_v49, %v142_v50  ;;  %v164_v27 = vld [vmem:[#allocation2 + $0x118] sm:$0xff]  ;;  %v6105_v29 = vcombine.high %v172_v19, %v176_v20  ;;  %v6102_v30 = vcombine.low %v171_v15, %v175_v16  ;;  %v6095_v34 = vcombine.high %v163_v23, %v167_v24 }
  0x4c   :  { %v6059_v61 = vcombine.high %v129_v55, %v133_v56  ;;  %v6061_v62 = vcombine.high %v130_v57, %v134_v58  ;;  %v127_v2 = vld [vmem:[%s7727_s22] sm:$0xff]  ;;  %v6058_v5 = vcombine.low %v129_v55, %v133_v56  ;;  %v6060_v8 = vcombine.low %v130_v57, %v134_v58  ;;  %v168_v28 = vld [vmem:[#allocation2 + $0x138] sm:$0xff]  ;;  %v155_v31 = vld [vmem:[#allocation2 + $0xd0] sm:$0xff] }
  0x4d   :  { %520 = vmatpush1.bf16.msra.mxu0 %v6090_v35  ;;  %561 = vmatpush1.bf16.msra.mxu1 %v6092_v36  ;;  %v7335_v13 = vpack.c.bf16 %v127_v2, %v127_v2  ;;  %v159_v32 = vld [vmem:[#allocation2 + $0xf0] sm:$0xff]  ;;  %v156_v35 = vld [vmem:[#allocation2 + $0xd8] sm:$0xff]  ;;  %v6096_v41 = vcombine.low %v164_v27, %v168_v28  ;;  %v813_v63 = vld [vmem:[#allocation4 + $0x1e0] sm:$0xff] }
  0x4e   :  { %521 = vmatprep.subr.bf16.mxu0 %v6083_v37  ;;  %562 = vmatprep.subr.bf16.mxu1 %v6085_v38  ;;  %v160_v36 = vld [vmem:[#allocation2 + $0xf8] sm:$0xff]  ;;  %v6097_v37 = vcombine.high %v164_v27, %v168_v28  ;;  %v6094_v38 = vcombine.low %v163_v23, %v167_v24  ;;  %v147_v39 = vld [vmem:[#allocation2 + $0x90] sm:$0xff]  ;;  %v937_v3 = vld [vmem:[#allocation4 + $0x5c0] sm:$0xff] }
  0x4f   :  { %v151_v40 = vld [vmem:[#allocation2 + $0xb0] sm:$0xff]  ;;  %v148_v42 = vld [vmem:[#allocation2 + $0x98] sm:$0xff]  ;;  %v6088_v48 = vcombine.low %v156_v35, %v160_v36  ;;  %v941_v4 = vld [vmem:[#allocation4 + $0x5e0] sm:$0xff] }
  0x50   :  { %v143_v47 = vld [vmem:[#allocation2 + $0x70] sm:$0xff]  ;;  %v6079_v49 = vcombine.high %v147_v39, %v151_v40  ;;  %v140_v50 = vld [vmem:[#allocation2 + $0x58] sm:$0xff]  ;;  %v801_v7 = vld [vmem:[#allocation4 + $0x180] sm:$0xff] }
  0x51   :  { %522 = vmatpush1.bf16.msra.mxu0 %v6082_v43  ;;  %563 = vmatpush1.bf16.msra.mxu1 %v6084_v44  ;;  %v152_v43 = vld [vmem:[#allocation2 + $0xb8] sm:$0xff]  ;;  %v6089_v44 = vcombine.high %v156_v35, %v160_v36  ;;  %v135_v55 = vld [vmem:[#allocation2 + $0x30] sm:$0xff]  ;;  %v929_v11 = vld [vmem:[#allocation4 + $0x580] sm:$0xff] }
  0x52   :  { %523 = vmatprep.subr.bf16.mxu0 %v6075_v45  ;;  %564 = vmatprep.subr.bf16.mxu1 %v6077_v46  ;;  %v6086_v45 = vcombine.low %v155_v31, %v159_v32  ;;  %v139_v46 = vld [vmem:[#allocation2 + $0x50] sm:$0xff]  ;;  %v6080_v56 = vcombine.low %v148_v42, %v152_v43  ;;  %v132_v58 = vld [vmem:[#allocation2 + $0x18] sm:$0xff]  ;;  %v793_v16 = vld [vmem:[#allocation4 + $0x140] sm:$0xff] }
  0x53   :  { %v6071_v57 = vcombine.high %v139_v46, %v143_v47  ;;  %v921_v20 = vld [vmem:[#allocation4 + $0x540] sm:$0xff] }
  0x54   :  { %v785_v24 = vld [vmem:[#allocation4 + $0x100] sm:$0xff] }
  0x55   :  { %524 = vmatpush1.bf16.msra.mxu0 %v6074_v51  ;;  %565 = vmatpush1.bf16.msra.mxu1 %v6076_v52  ;;  %v144_v51 = vld [vmem:[#allocation2 + $0x78] sm:$0xff]  ;;  %v6081_v52 = vcombine.high %v148_v42, %v152_v43  ;;  %v913_v28 = vld [vmem:[#allocation4 + $0x500] sm:$0xff] }
  0x56   :  { %525 = vmatprep.subr.bf16.mxu0 %v6067_v53  ;;  %566 = vmatprep.subr.bf16.mxu1 %v6069_v54  ;;  %v6078_v53 = vcombine.low %v147_v39, %v151_v40  ;;  %v131_v54 = vld [vmem:[#allocation2 + $0x10] sm:$0xff]  ;;  %v6072_v1 = vcombine.low %v140_v50, %v144_v51  ;;  %v905_v36 = vld [vmem:[#allocation4 + $0x4c0] sm:$0xff] }
  0x57   :  { %v6063_v2 = vcombine.high %v131_v54, %v135_v55  ;;  %v6062_v6 = vcombine.low %v131_v54, %v135_v55  ;;  %v889_v54 = vld [vmem:[#allocation4 + $0x440] sm:$0xff] }
  0x59   :  { %526 = vmatpush1.bf16.msra.mxu0 %v6066_v59  ;;  %567 = vmatpush1.bf16.msra.mxu1 %v6068_v60  ;;  %v136_v59 = vld [vmem:[#allocation2 + $0x38] sm:$0xff]  ;;  %v6073_v60 = vcombine.high %v140_v50, %v144_v51 }
  0x5a   :  { %527 = vmatprep.subr.bf16.mxu0 %v6059_v61  ;;  %568 = vmatprep.subr.bf16.mxu1 %v6061_v62  ;;  %v6070_v61 = vcombine.low %v139_v46, %v143_v47  ;;  %v809_v62 = vld [vmem:[#allocation4 + $0x1c0] sm:$0xff] }
  0x5b   :  { %v6179_v10 = vcombine.high %v809_v62, %v813_v63  ;;  %v6178_v15 = vcombine.low %v809_v62, %v813_v63  ;;  %v897_v46 = vld [vmem:[#allocation4 + $0x480] sm:$0xff] }
  0x5c   :  { %v881_v62 = vld [vmem:[#allocation4 + $0x400] sm:$0xff] }
  0x5d   :  { %528 = vmatpush1.bf16.msra.mxu0 %v6058_v5  ;;  %569 = vmatpush1.bf16.msra.mxu1 %v6060_v8  ;;  %v6065_v5 = vcombine.high %v132_v58, %v136_v59  ;;  %v805_v8 = vld [vmem:[#allocation4 + $0x1a0] sm:$0xff] }
  0x5e   :  { %595 = vmatprep.subr.bf16.mxu0 %v6119_v9  ;;  %636 = vmatprep.subr.bf16.mxu1 %v6121_v12  ;;  %v6064_v9 = vcombine.low %v132_v58, %v136_v59  ;;  %v933_v12 = vld [vmem:[#allocation4 + $0x5a0] sm:$0xff]  ;;  %v6171_v19 = vcombine.high %v801_v7, %v805_v8  ;;  %v6170_v23 = vcombine.low %v801_v7, %v805_v8 }
  0x5f   :  { %v1001_v8 = vld [vmem:[#allocation4 + $0x7c0] sm:$0xff] }
  0x60   :  { %546 = vmatmul.mubr.bf16.vlgmr.msra.gmra.mxu0 %v7335_v13  ;;  %587 = vmatmul.mubr.bf16.vlgmr.msra.gmra.mxu1 %v7335_v13 }
  0x61   :  { %596 = vmatpush1.bf16.msra.mxu0 %v6118_v14  ;;  %637 = vmatpush1.bf16.msra.mxu1 %v6120_v17  ;;  %v6307_v14 = vcombine.high %v937_v3, %v941_v4  ;;  %v797_v17 = vld [vmem:[#allocation4 + $0x160] sm:$0xff] }
  0x62   :  { %597 = vmatprep.subr.bf16.mxu0 %v6111_v18  ;;  %638 = vmatprep.subr.bf16.mxu1 %v6113_v21  ;;  %v6306_v18 = vcombine.low %v937_v3, %v941_v4  ;;  %v925_v21 = vld [vmem:[#allocation4 + $0x560] sm:$0xff]  ;;  %v6163_v27 = vcombine.high %v793_v16, %v797_v17 }
  0x63   :  { %627 = vmatprep.mubr.bf16.mxu0 %v7200_v0  ;;  %668 = vmatprep.mubr.bf16.mxu1 %v7200_v0  ;;  %v6087_v0 = vcombine.high %v155_v31, %v159_v32  ;;  %v6162_v31 = vcombine.low %v793_v16, %v797_v17  ;;  %v777_v32 = vld [vmem:[#allocation4 + $0xc0] sm:$0xff] }
  0x64   :  { %v873_v3 = vld [vmem:[#allocation4 + $0x3c0] sm:$0xff] }
  0x65   :  { %598 = vmatpush1.bf16.msra.mxu0 %v6110_v22  ;;  %639 = vmatpush1.bf16.msra.mxu1 %v6112_v25  ;;  %v6299_v22 = vcombine.high %v929_v11, %v933_v12  ;;  %v789_v25 = vld [vmem:[#allocation4 + $0x120] sm:$0xff] }
  0x66   :  { %599 = vmatprep.subr.bf16.mxu0 %v6103_v26  ;;  %640 = vmatprep.subr.bf16.mxu1 %v6105_v29  ;;  %v6298_v26 = vcombine.low %v929_v11, %v933_v12  ;;  %v917_v29 = vld [vmem:[#allocation4 + $0x520] sm:$0xff]  ;;  %v6155_v35 = vcombine.high %v785_v24, %v789_v25  ;;  %v6154_v39 = vcombine.low %v785_v24, %v789_v25 }
  0x67   :  { %v6282_v40 = vcombine.low %v913_v28, %v917_v29  ;;  %v877_v4 = vld [vmem:[#allocation4 + $0x3e0] sm:$0xff] }
  0x68   :  { %v6243_v7 = vcombine.high %v873_v3, %v877_v4  ;;  %v869_v12 = vld [vmem:[#allocation4 + $0x3a0] sm:$0xff] }
  0x69   :  { %600 = vmatpush1.bf16.msra.mxu0 %v6102_v30  ;;  %641 = vmatpush1.bf16.msra.mxu1 %v6104_v33  ;;  %v6291_v30 = vcombine.high %v921_v20, %v925_v21  ;;  %v781_v33 = vld [vmem:[#allocation4 + $0xe0] sm:$0xff] }
  0x6a   :  { %601 = vmatprep.subr.bf16.mxu0 %v6095_v34  ;;  %642 = vmatprep.subr.bf16.mxu1 %v6097_v37  ;;  %v6290_v34 = vcombine.low %v921_v20, %v925_v21  ;;  %v909_v37 = vld [vmem:[#allocation4 + $0x4e0] sm:$0xff]  ;;  %v6146_v42 = vcombine.low %v777_v32, %v781_v33 }
  0x6b   :  { %v6274_v43 = vcombine.low %v905_v36, %v909_v37  ;;  %v997_v16 = vld [vmem:[#allocation4 + $0x7a0] sm:$0xff] }
  0x6c   :  { %v861_v20 = vld [vmem:[#allocation4 + $0x360] sm:$0xff] }
  0x6d   :  { %602 = vmatpush1.bf16.msra.mxu0 %v6094_v38  ;;  %643 = vmatpush1.bf16.msra.mxu1 %v6096_v41  ;;  %v6283_v38 = vcombine.high %v913_v28, %v917_v29  ;;  %v6147_v41 = vcombine.high %v777_v32, %v781_v33  ;;  %v989_v24 = vld [vmem:[#allocation4 + $0x760] sm:$0xff] }
  0x6e   :  { %603 = vmatprep.subr.bf16.mxu0 %v6087_v0  ;;  %644 = vmatprep.subr.bf16.mxu1 %v6089_v44  ;;  %v6275_v0 = vcombine.high %v905_v36, %v909_v37  ;;  %v769_v44 = vld [vmem:[#allocation4 + $0x80] sm:$0xff] }
  0x6f   :  { %v853_v28 = vld [vmem:[#allocation4 + $0x320] sm:$0xff] }
  0x70   :  { %v981_v32 = vld [vmem:[#allocation4 + $0x720] sm:$0xff] }
  0x71   :  { %604 = vmatpush1.bf16.msra.mxu0 %v6086_v45  ;;  %645 = vmatpush1.bf16.msra.mxu1 %v6088_v48  ;;  %v773_v45 = vld [vmem:[#allocation4 + $0xa0] sm:$0xff] }
  0x72   :  { %605 = vmatprep.subr.bf16.mxu0 %v6079_v49  ;;  %646 = vmatprep.subr.bf16.mxu1 %v6081_v52  ;;  %v6139_v47 = vcombine.high %v769_v44, %v773_v45  ;;  %v901_v48 = vld [vmem:[#allocation4 + $0x4a0] sm:$0xff]  ;;  %v6138_v49 = vcombine.low %v769_v44, %v773_v45 }
  0x73   :  { %v6266_v50 = vcombine.low %v897_v46, %v901_v48  ;;  %v6267_v51 = vcombine.high %v897_v46, %v901_v48  ;;  %v761_v52 = vld [vmem:[#allocation4 + $0x40] sm:$0xff] }
  0x74   :  { %v845_v36 = vld [vmem:[#allocation4 + $0x2e0] sm:$0xff] }
  0x75   :  { %606 = vmatpush1.bf16.msra.mxu0 %v6078_v53  ;;  %647 = vmatpush1.bf16.msra.mxu1 %v6080_v56  ;;  %v765_v53 = vld [vmem:[#allocation4 + $0x60] sm:$0xff] }
  0x76   :  { %607 = vmatprep.subr.bf16.mxu0 %v6071_v57  ;;  %648 = vmatprep.subr.bf16.mxu1 %v6073_v60  ;;  %v6131_v55 = vcombine.high %v761_v52, %v765_v53  ;;  %v893_v56 = vld [vmem:[#allocation4 + $0x460] sm:$0xff]  ;;  %v6130_v57 = vcombine.low %v761_v52, %v765_v53 }
  0x77   :  { %v6258_v58 = vcombine.low %v889_v54, %v893_v56  ;;  %v6259_v59 = vcombine.high %v889_v54, %v893_v56  ;;  %v753_v60 = vld [vmem:[#allocation4] sm:$0xff] }
  0x78   :  { %v833_v45 = vld [vmem:[#allocation4 + $0x280] sm:$0xff] }
  0x79   :  { %608 = vmatpush1.bf16.msra.mxu0 %v6070_v61  ;;  %649 = vmatpush1.bf16.msra.mxu1 %v6072_v1  ;;  %v757_v61 = vld [vmem:[#allocation4 + $0x20] sm:$0xff] }
  0x7a   :  { %609 = vmatprep.subr.bf16.mxu0 %v6063_v2  ;;  %650 = vmatprep.subr.bf16.mxu1 %v6065_v5  ;;  %v6122_v63 = vcombine.low %v753_v60, %v757_v61  ;;  %v6123_v1 = vcombine.high %v753_v60, %v757_v61  ;;  %v885_v2 = vld [vmem:[#allocation4 + $0x420] sm:$0xff] }
  0x7b   :  { %v6250_v5 = vcombine.low %v881_v62, %v885_v2  ;;  %v837_v46 = vld [vmem:[#allocation4 + $0x2a0] sm:$0xff] }
  0x7c   :  { %v6203_v48 = vcombine.high %v833_v45, %v837_v46  ;;  %v825_v53 = vld [vmem:[#allocation4 + $0x240] sm:$0xff] }
  0x7d   :  { %610 = vmatpush1.bf16.msra.mxu0 %v6062_v6  ;;  %651 = vmatpush1.bf16.msra.mxu1 %v6064_v9  ;;  %v6251_v6 = vcombine.high %v881_v62, %v885_v2  ;;  %v1005_v9 = vld [vmem:[#allocation4 + $0x7e0] sm:$0xff] }
  0x7e   :  { %2289 = vmatprep.subr.bf16.mxu0 %v6179_v10  ;;  %2330 = vmatprep.subr.bf16.mxu1 %v6307_v14  ;;  %v865_v10 = vld [vmem:[#allocation4 + $0x380] sm:$0xff]  ;;  %v6371_v11 = vcombine.high %v1001_v8, %v1005_v9  ;;  %v6242_v14 = vcombine.low %v873_v3, %v877_v4 }
  0x7f   :  { %v6235_v17 = vcombine.high %v865_v10, %v869_v12  ;;  %v829_v54 = vld [vmem:[#allocation4 + $0x260] sm:$0xff] }
  0x80   :  { %628 = vmatmul.mubr.bf16.vlgmr.msra.gmra.mxu0 %v7335_v13  ;;  %669 = vmatmul.mubr.bf16.vlgmr.msra.gmra.mxu1 %v7335_v13  ;;  %v6195_v56 = vcombine.high %v825_v53, %v829_v54  ;;  %v817_v61 = vld [vmem:[#allocation4 + $0x200] sm:$0xff] }
  0x81   :  { %2290 = vmatpush1.bf16.msra.mxu0 %v6178_v15  ;;  %2331 = vmatpush1.bf16.msra.mxu1 %v6306_v18  ;;  %v993_v15 = vld [vmem:[#allocation4 + $0x780] sm:$0xff]  ;;  %v6370_v18 = vcombine.low %v1001_v8, %v1005_v9  ;;  %v7347_v8 = vld [vmem:[#allocation4 + $0x5c8] sm:$0xff] }
  0x82   :  { %2291 = vmatprep.subr.bf16.mxu0 %v6171_v19  ;;  %2332 = vmatprep.subr.bf16.mxu1 %v6299_v22  ;;  %v857_v19 = vld [vmem:[#allocation4 + $0x340] sm:$0xff]  ;;  %v6363_v21 = vcombine.high %v993_v15, %v997_v16  ;;  %v6234_v22 = vcombine.low %v865_v10, %v869_v12  ;;  %v7351_v10 = vld [vmem:[#allocation4 + $0x5e8] sm:$0xff] }
  0x83   :  { %v6227_v25 = vcombine.high %v857_v19, %v861_v20  ;;  %v821_v62 = vld [vmem:[#allocation4 + $0x220] sm:$0xff]  ;;  %v6308_v12 = vcombine.low %v7347_v8, %v7351_v10 }
  0x84   :  { %v949_v2 = vld [vmem:[#allocation4 + $0x620] sm:$0xff]  ;;  %v6186_v3 = vcombine.low %v817_v61, %v821_v62 }
  0x85   :  { %2292 = vmatpush1.bf16.msra.mxu0 %v6170_v23  ;;  %2333 = vmatpush1.bf16.msra.mxu1 %v6298_v26  ;;  %v985_v23 = vld [vmem:[#allocation4 + $0x740] sm:$0xff]  ;;  %v6362_v26 = vcombine.low %v993_v15, %v997_v16 }
  0x86   :  { %2293 = vmatprep.subr.bf16.mxu0 %v6163_v27  ;;  %2334 = vmatprep.subr.bf16.mxu1 %v6291_v30  ;;  %v849_v27 = vld [vmem:[#allocation4 + $0x300] sm:$0xff]  ;;  %v6355_v29 = vcombine.high %v985_v23, %v989_v24  ;;  %v6226_v30 = vcombine.low %v857_v19, %v861_v20 }
  0x87   :  { %v6219_v33 = vcombine.high %v849_v27, %v853_v28 }
  0x89   :  { %2294 = vmatpush1.bf16.msra.mxu0 %v6162_v31  ;;  %2335 = vmatpush1.bf16.msra.mxu1 %v6290_v34  ;;  %v977_v31 = vld [vmem:[#allocation4 + $0x700] sm:$0xff]  ;;  %v6354_v34 = vcombine.low %v985_v23, %v989_v24  ;;  %v680_v23 = vlaneseq }
  0x8a   :  { %2295 = vmatprep.subr.bf16.mxu0 %v6155_v35  ;;  %2336 = vmatprep.subr.bf16.mxu1 %v6283_v38  ;;  %v841_v35 = vld [vmem:[#allocation4 + $0x2c0] sm:$0xff]  ;;  %v6347_v37 = vcombine.high %v977_v31, %v981_v32  ;;  %v6218_v38 = vcombine.low %v849_v27, %v853_v28 }
  0x8b   :  { %v681_v24 = vshrl.u32 %v680_v23, 7 }
  0x8d   :  { %2296 = vmatpush1.bf16.msra.mxu0 %v6154_v39  ;;  %2337 = vmatpush1.bf16.msra.mxu1 %v6282_v40  ;;  %v969_v39 = vld [vmem:[#allocation4 + $0x6c0] sm:$0xff]  ;;  %v7364_v27 = vsub.s32 2, %v681_v24  ;;  %v7366_v28 = vsub.s32 1, %v681_v24 }
  0x8e   :  { %2297 = vmatprep.subr.bf16.mxu0 %v6147_v41  ;;  %2338 = vmatprep.subr.bf16.mxu1 %v6275_v0  ;;  %v973_v40 = vld [vmem:[#allocation4 + $0x6e0] sm:$0xff]  ;;  %v6211_v41 = vcombine.high %v841_v35, %v845_v36  ;;  %v6346_v0 = vcombine.low %v977_v31, %v981_v32 }
  0x8f   :  { %v6338_v44 = vcombine.low %v969_v39, %v973_v40  ;;  %v678_v31 = vld [vmem:[%s7729_s3] sm:$0xf] }
  0x91   :  { %2298 = vmatpush1.bf16.msra.mxu0 %v6146_v42  ;;  %2339 = vmatpush1.bf16.msra.mxu1 %v6274_v43  ;;  %v6339_v42 = vcombine.high %v969_v39, %v973_v40  ;;  %v6210_v43 = vcombine.low %v841_v35, %v845_v36  ;;  %v712_v40 = vrot.slane %v678_v31, %v7366_v28 }
  0x92   :  { %2299 = vmatprep.subr.bf16.mxu0 %v6139_v47  ;;  %2340 = vmatprep.subr.bf16.mxu1 %v6267_v51  ;;  %v961_v47 = vld [vmem:[#allocation4 + $0x680] sm:$0xff] }
  0x95   :  { %2300 = vmatpush1.bf16.msra.mxu0 %v6138_v49  ;;  %2341 = vmatpush1.bf16.msra.mxu1 %v6266_v50  ;;  %v965_v49 = vld [vmem:[#allocation4 + $0x6a0] sm:$0xff]  ;;  %v6202_v50 = vcombine.low %v833_v45, %v837_v46 }
  0x96   :  { %2301 = vmatprep.subr.bf16.mxu0 %v6131_v55  ;;  %2342 = vmatprep.subr.bf16.mxu1 %v6259_v59  ;;  %v6330_v51 = vcombine.low %v961_v47, %v965_v49  ;;  %v6331_v52 = vcombine.high %v961_v47, %v965_v49  ;;  %v953_v55 = vld [vmem:[#allocation4 + $0x640] sm:$0xff] }
  0x99   :  { %2302 = vmatpush1.bf16.msra.mxu0 %v6130_v57  ;;  %2343 = vmatpush1.bf16.msra.mxu1 %v6258_v58  ;;  %v957_v57 = vld [vmem:[#allocation4 + $0x660] sm:$0xff]  ;;  %v6194_v58 = vcombine.low %v825_v53, %v829_v54 }
  0x9a   :  { %2303 = vmatprep.subr.bf16.mxu0 %v6123_v1  ;;  %2344 = vmatprep.subr.bf16.mxu1 %v6251_v6  ;;  %v6322_v59 = vcombine.low %v953_v55, %v957_v57  ;;  %v6323_v60 = vcombine.high %v953_v55, %v957_v57  ;;  %v6187_v1 = vcombine.high %v817_v61, %v821_v62  ;;  %v7343_v6 = vld [vmem:[#allocation4 + $0x1c8] sm:$0xff] }
  0x9d   :  { %2304 = vmatpush1.bf16.msra.mxu0 %v6122_v63  ;;  %2345 = vmatpush1.bf16.msra.mxu1 %v6250_v5  ;;  %v945_v63 = vld [vmem:[#allocation4 + $0x600] sm:$0xff] }
  0x9e   :  { %2305 = vmatprep.subr.bf16.mxu0 %v6243_v7  ;;  %2346 = vmatprep.subr.bf16.mxu1 %v6371_v11  ;;  %v6314_v4 = vcombine.low %v945_v63, %v949_v2  ;;  %v6315_v5 = vcombine.high %v945_v63, %v949_v2  ;;  %v7345_v7 = vld [vmem:[#allocation4 + $0x1e8] sm:$0xff] }
  0x9f   :  { %v6181_v9 = vcombine.high %v7343_v6, %v7345_v7  ;;  %v6180_v11 = vcombine.low %v7343_v6, %v7345_v7 }
  0xa1   :  { %2306 = vmatpush2.bf16.msra.mxu0 %v6242_v14  ;;  %2347 = vmatpush2.bf16.msra.mxu1 %v6370_v18  ;;  %v6309_v14 = vcombine.high %v7347_v8, %v7351_v10 }
  0xa2   :  { %2307 = vmatprep.subr.bf16.mxu0 %v6235_v17  ;;  %2348 = vmatprep.subr.bf16.mxu1 %v6363_v21 }
  0xa5   :  { %2308 = vmatpush2.bf16.msra.mxu0 %v6234_v22  ;;  %2349 = vmatpush2.bf16.msra.mxu1 %v6362_v26  ;;  %v677_v26 = vld [vmem:[%s7728_s26] sm:$0xf] }
  0xa6   :  { %2309 = vmatprep.subr.bf16.mxu0 %v6227_v25  ;;  %2350 = vmatprep.subr.bf16.mxu1 %v6355_v29  ;;  %v7359_v25 = vsub.s32 0, %v681_v24  ;;  %v7368_v29 = vsub.s32 3, %v681_v24  ;;  %v691_v32 = vrot.slane %v677_v26, %v7364_v27 }
  0xa8   :  { %v708_v36 = vrot.slane %v678_v31, %v7359_v25 }
  0xa9   :  { %2310 = vmatpush2.bf16.msra.mxu0 %v6226_v30  ;;  %2351 = vmatpush2.bf16.msra.mxu1 %v6354_v34  ;;  %v683_v30 = vrot.slane %v677_v26, %v7359_v25  ;;  %v695_v34 = vrot.slane %v677_v26, %v7368_v29 }
  0xaa   :  { %2311 = vmatprep.subr.bf16.mxu0 %v6219_v33  ;;  %2352 = vmatprep.subr.bf16.mxu1 %v6347_v37  ;;  %v687_v33 = vrot.slane %v677_v26, %v7366_v28 }
  0xad   :  { %2312 = vmatpush2.bf16.msra.mxu0 %v6218_v38  ;;  %2353 = vmatpush2.bf16.msra.mxu1 %v6346_v0  ;;  %v716_v38 = vrot.slane %v678_v31, %v7364_v27  ;;  %v720_v0 = vrot.slane %v678_v31, %v7368_v29  ;;  %v794_v31 = vld [vmem:[#allocation4 + $0x148] sm:$0xff] }
  0xae   :  { %2313 = vmatprep.subr.bf16.mxu0 %v6211_v41  ;;  %2354 = vmatprep.subr.bf16.mxu1 %v6339_v42 }
  0xb1   :  { %2314 = vmatpush2.bf16.msra.mxu0 %v6210_v43  ;;  %2355 = vmatpush2.bf16.msra.mxu1 %v6338_v44 }
  0xb2   :  { %2315 = vmatprep.subr.bf16.mxu0 %v6203_v48  ;;  %2356 = vmatprep.subr.bf16.mxu1 %v6331_v52 }
  0xb5   :  { %2316 = vmatpush2.bf16.msra.mxu0 %v6202_v50  ;;  %2357 = vmatpush2.bf16.msra.mxu1 %v6330_v51 }
  0xb6   :  { %2317 = vmatprep.subr.bf16.mxu0 %v6195_v56  ;;  %2358 = vmatprep.subr.bf16.mxu1 %v6323_v60 }
  0xb9   :  { %2318 = vmatpush2.bf16.msra.mxu0 %v6194_v58  ;;  %2359 = vmatpush2.bf16.msra.mxu1 %v6322_v59 }
  0xba   :  { %2319 = vmatprep.subr.bf16.mxu0 %v6187_v1  ;;  %2360 = vmatprep.subr.bf16.mxu1 %v6315_v5 }
  0xbd   :  { %2320 = vmatpush2.bf16.msra.mxu0 %v6186_v3  ;;  %2361 = vmatpush2.bf16.msra.mxu1 %v6314_v4 }
  0xbe   :  { %2371 = vmatprep.subr.bf16.mxu0 %v6181_v9  ;;  %2412 = vmatprep.subr.bf16.mxu1 %v6309_v14 }
 0x120   :  { %v547_v15 = vpop.f32.mrf.mxu0  ;;  %v588_v16 = vpop.f32.mrf.mxu1 }
 0x121   :  { %v700_v35 = vmul.f32 %v683_v30, %v547_v15  ;;  %v702_v37 = vmul.f32 %v691_v32, %v588_v16 }
 0x122   :  { %v549_v17 = vpop.f32.mrf.mxu0  ;;  %v590_v18 = vpop.f32.mrf.mxu1 }
 0x123   :  { %v701_v39 = vmul.f32 %v687_v33, %v549_v17  ;;  %v703_v41 = vmul.f32 %v695_v34, %v590_v18  ;;  %v725_v45 = vadd.f32 %v708_v36, %v700_v35  ;;  %v727_v48 = vadd.f32 %v716_v38, %v702_v37  ;;  %v802_v18 = vld [vmem:[#allocation4 + $0x188] sm:$0xff] }
 0x124   :  { %v551_v19 = vpop.f32.mrf.mxu0  ;;  %v592_v20 = vpop.f32.mrf.mxu1  ;;  %v926_v35 = vld [vmem:[#allocation4 + $0x568] sm:$0xff] }
 0x125   :  { %v726_v49 = vadd.f32 %v712_v40, %v701_v39  ;;  %v728_v53 = vadd.f32 %v720_v0, %v703_v41  ;;  %v729_v60 = vmax.f32 %v725_v45, 0.0  ;;  %v731_v1 = vmax.f32 %v727_v48, 0.0  ;;  %v806_v19 = vld [vmem:[#allocation4 + $0x1a8] sm:$0xff] }
 0x126   :  { %v552_v21 = vpop.f32.mrf.mxu0  ;;  %v593_v22 = vpop.f32.mrf.mxu1  ;;  %v790_v41 = vld [vmem:[#allocation4 + $0x128] sm:$0xff] }
 0x127   :  { %v730_v2 = vmax.f32 %v726_v49, 0.0  ;;  %v732_v5 = vmax.f32 %v728_v53, 0.0  ;;  %v930_v21 = vld [vmem:[#allocation4 + $0x588] sm:$0xff] }
 0x128   :  { %v934_v22 = vld [vmem:[#allocation4 + $0x5a8] sm:$0xff] }
 0x129   :  { %v6300_v37 = vcombine.low %v930_v21, %v934_v22  ;;  %v770_v49 = vld [vmem:[#allocation4 + $0x88] sm:$0xff] }
 0x140   :  { %v629_v42 = vpop.f32.mrf.mxu0  ;;  %v670_v44 = vpop.f32.mrf.mxu1 }
 0x141   :  { %v733_v43 = vmul.f32 %v683_v30, %v629_v42  ;;  %v735_v46 = vmul.f32 %v691_v32, %v670_v44  ;;  %v6173_v30 = vcombine.high %v802_v18, %v806_v19  ;;  %v798_v32 = vld [vmem:[#allocation4 + $0x168] sm:$0xff] }
 0x142   :  { %v631_v47 = vpop.f32.mrf.mxu0  ;;  %v672_v52 = vpop.f32.mrf.mxu1  ;;  %v918_v42 = vld [vmem:[#allocation4 + $0x528] sm:$0xff]  ;;  %v6164_v6 = vcombine.low %v794_v31, %v798_v32 }
 0x143   :  { %v737_v50 = vadd.f32 %v733_v43, %v708_v36  ;;  %v734_v51 = vmul.f32 %v687_v33, %v631_v47  ;;  %v739_v54 = vadd.f32 %v735_v46, %v716_v38  ;;  %v736_v55 = vmul.f32 %v695_v34, %v672_v52  ;;  %v922_v34 = vld [vmem:[#allocation4 + $0x548] sm:$0xff] }
 0x144   :  { %v633_v56 = vpop.f32.mrf.mxu0  ;;  %v674_v59 = vpop.f32.mrf.mxu1  ;;  %v6301_v33 = vcombine.high %v930_v21, %v934_v22  ;;  %v6172_v36 = vcombine.low %v802_v18, %v806_v19  ;;  %v6165_v38 = vcombine.high %v794_v31, %v798_v32  ;;  %v6293_v39 = vcombine.high %v922_v34, %v926_v35  ;;  %v906_v43 = vld [vmem:[#allocation4 + $0x4c8] sm:$0xff] }
 0x145   :  { %v741_v57 = vmax.f32 %v737_v50, 0.0  ;;  %v738_v58 = vadd.f32 %v734_v51, %v712_v40  ;;  %v743_v61 = vmax.f32 %v739_v54, 0.0  ;;  %v740_v62 = vadd.f32 %v736_v55, %v720_v0  ;;  %v786_v40 = vld [vmem:[#allocation4 + $0x108] sm:$0xff] }
 0x146   :  { %v634_v63 = vpop.f32.mrf.mxu0  ;;  %v675_v4 = vpop.f32.mrf.mxu1  ;;  %v914_v0 = vld [vmem:[#allocation4 + $0x508] sm:$0xff]  ;;  %v6292_v7 = vcombine.low %v922_v34, %v926_v35  ;;  %v6157_v8 = vcombine.high %v786_v40, %v790_v41  ;;  %v6156_v45 = vcombine.low %v786_v40, %v790_v41 }
 0x147   :  { %v742_v3 = vmax.f32 %v738_v58, 0.0  ;;  %v745_v9 = vmax.f32 %v729_v60, %v741_v57  ;;  %v744_v14 = vmax.f32 %v740_v62, 0.0  ;;  %v747_v15 = vmax.f32 %v731_v1, %v743_v61  ;;  %v910_v44 = vld [vmem:[#allocation4 + $0x4e8] sm:$0xff] }
 0x148   :  { %v6285_v10 = vcombine.high %v914_v0, %v918_v42  ;;  %v6284_v46 = vcombine.low %v914_v0, %v918_v42  ;;  %v6277_v48 = vcombine.high %v906_v43, %v910_v44  ;;  %v774_v50 = vld [vmem:[#allocation4 + $0xa8] sm:$0xff]  ;;  %v6276_v54 = vcombine.low %v906_v43, %v910_v44 }
 0x149   :  { %v746_v16 = vmax.f32 %v730_v2, %v742_v3  ;;  %v748_v17 = vmax.f32 %v732_v5, %v744_v14  ;;  %v7383_v23 = vpack.c.bf16 %v745_v9, %v745_v9  ;;  %v7387_v26 = vpack.c.bf16 %v747_v15, %v747_v15  ;;  %v898_v51 = vld [vmem:[#allocation4 + $0x488] sm:$0xff] }
 0x14a   :  { %v902_v52 = vld [vmem:[#allocation4 + $0x4a8] sm:$0xff]  ;;  %v6141_v55 = vcombine.high %v770_v49, %v774_v50  ;;  %v6140_v61 = vcombine.low %v770_v49, %v774_v50 }
 0x14b   :  { %v7381_v20 = vpack.c.bf16 %v746_v16, %v746_v16  ;;  %v7385_v24 = vpack.c.bf16 %v748_v17, %v748_v17  ;;  %v6269_v56 = vcombine.high %v898_v51, %v902_v52  ;;  %v762_v57 = vld [vmem:[#allocation4 + $0x48] sm:$0xff]  ;;  %v6268_v62 = vcombine.low %v898_v51, %v902_v52 }
 0x14c   :  { %v766_v58 = vld [vmem:[#allocation4 + $0x68] sm:$0xff] }
 0x14d   :  { %2321 = vmatprep.mubr.bf16.mxu0 %v7381_v20  ;;  %2362 = vmatprep.mubr.bf16.mxu1 %v7385_v24  ;;  %v890_v59 = vld [vmem:[#allocation4 + $0x448] sm:$0xff]  ;;  %v6133_v63 = vcombine.high %v762_v57, %v766_v58  ;;  %v6132_v9 = vcombine.low %v762_v57, %v766_v58 }
 0x14e   :  { %2322 = vmatmul.mubr.bf16.vlgmr.msra.gmra.mxu0 %v7383_v23  ;;  %2363 = vmatmul.mubr.bf16.vlgmr.msra.gmra.mxu1 %v7387_v26  ;;  %v894_v60 = vld [vmem:[#allocation4 + $0x468] sm:$0xff] }
 0x14f   :  { %2372 = vmatpush1.bf16.msra.mxu0 %v6180_v11  ;;  %2413 = vmatpush1.bf16.msra.mxu1 %v6308_v12  ;;  %v778_v11 = vld [vmem:[#allocation4 + $0xc8] sm:$0xff]  ;;  %v6261_v1 = vcombine.high %v890_v59, %v894_v60  ;;  %v6260_v14 = vcombine.low %v890_v59, %v894_v60 }
 0x150   :  { %2403 = vmatprep.mubr.bf16.mxu0 %v7381_v20  ;;  %2444 = vmatprep.mubr.bf16.mxu1 %v7385_v24  ;;  %v782_v12 = vld [vmem:[#allocation4 + $0xe8] sm:$0xff] }
 0x151   :  { %2373 = vmatprep.subr.bf16.mxu0 %v6173_v30  ;;  %2414 = vmatprep.subr.bf16.mxu1 %v6301_v33  ;;  %v6149_v47 = vcombine.high %v778_v11, %v782_v12  ;;  %v6148_v53 = vcombine.low %v778_v11, %v782_v12  ;;  %v754_v2 = vld [vmem:[#allocation4 + $0x8] sm:$0xff] }
 0x152   :  { %v758_v3 = vld [vmem:[#allocation4 + $0x28] sm:$0xff] }
 0x153   :  { %2374 = vmatpush1.bf16.msra.mxu0 %v6172_v36  ;;  %2415 = vmatpush1.bf16.msra.mxu1 %v6300_v37  ;;  %v882_v4 = vld [vmem:[#allocation4 + $0x408] sm:$0xff]  ;;  %v6125_v15 = vcombine.high %v754_v2, %v758_v3  ;;  %v6124_v22 = vcombine.low %v754_v2, %v758_v3 }
 0x154   :  { %2375 = vmatprep.subr.bf16.mxu0 %v6165_v38  ;;  %2416 = vmatprep.subr.bf16.mxu1 %v6293_v39  ;;  %v886_v5 = vld [vmem:[#allocation4 + $0x428] sm:$0xff] }
 0x155   :  { %v6253_v16 = vcombine.high %v882_v4, %v886_v5  ;;  %v874_v17 = vld [vmem:[#allocation4 + $0x3c8] sm:$0xff]  ;;  %v6252_v30 = vcombine.low %v882_v4, %v886_v5 }
 0x156   :  { %v878_v18 = vld [vmem:[#allocation4 + $0x3e8] sm:$0xff] }
 0x157   :  { %2376 = vmatpush1.bf16.msra.mxu0 %v6164_v6  ;;  %2417 = vmatpush1.bf16.msra.mxu1 %v6292_v7  ;;  %v1002_v19 = vld [vmem:[#allocation4 + $0x7c8] sm:$0xff]  ;;  %v6245_v31 = vcombine.high %v874_v17, %v878_v18  ;;  %v6244_v37 = vcombine.low %v874_v17, %v878_v18 }
 0x158   :  { %2377 = vmatprep.subr.bf16.mxu0 %v6157_v8  ;;  %2418 = vmatprep.subr.bf16.mxu1 %v6285_v10  ;;  %v1006_v21 = vld [vmem:[#allocation4 + $0x7e8] sm:$0xff] }
 0x159   :  { %v6373_v32 = vcombine.high %v1002_v19, %v1006_v21  ;;  %v866_v33 = vld [vmem:[#allocation4 + $0x388] sm:$0xff]  ;;  %v6372_v38 = vcombine.low %v1002_v19, %v1006_v21 }
 0x15a   :  { %v870_v34 = vld [vmem:[#allocation4 + $0x3a8] sm:$0xff] }
 0x15b   :  { %2378 = vmatpush1.bf16.msra.mxu0 %v6156_v45  ;;  %2419 = vmatpush1.bf16.msra.mxu1 %v6284_v46  ;;  %v994_v35 = vld [vmem:[#allocation4 + $0x788] sm:$0xff]  ;;  %v6237_v39 = vcombine.high %v866_v33, %v870_v34  ;;  %v6236_v7 = vcombine.low %v866_v33, %v870_v34  ;;  %v811_v34 = vld [vmem:[#allocation4 + $0x1d0] sm:$0xff] }
 0x15c   :  { %2379 = vmatprep.subr.bf16.mxu0 %v6149_v47  ;;  %2420 = vmatprep.subr.bf16.mxu1 %v6277_v48  ;;  %v998_v36 = vld [vmem:[#allocation4 + $0x7a8] sm:$0xff] }
 0x15d   :  { %v6365_v40 = vcombine.high %v994_v35, %v998_v36  ;;  %v858_v41 = vld [vmem:[#allocation4 + $0x348] sm:$0xff]  ;;  %v6364_v8 = vcombine.low %v994_v35, %v998_v36  ;;  %v815_v35 = vld [vmem:[#allocation4 + $0x1f0] sm:$0xff] }
 0x15e   :  { %v862_v0 = vld [vmem:[#allocation4 + $0x368] sm:$0xff]  ;;  %v939_v36 = vld [vmem:[#allocation4 + $0x5d0] sm:$0xff] }
 0x15f   :  { %2380 = vmatpush1.bf16.msra.mxu0 %v6148_v53  ;;  %2421 = vmatpush1.bf16.msra.mxu1 %v6276_v54  ;;  %v986_v42 = vld [vmem:[#allocation4 + $0x748] sm:$0xff]  ;;  %v6229_v10 = vcombine.high %v858_v41, %v862_v0  ;;  %v6228_v46 = vcombine.low %v858_v41, %v862_v0  ;;  %v803_v0 = vld [vmem:[#allocation4 + $0x190] sm:$0xff] }
 0x160   :  { %2381 = vmatprep.subr.bf16.mxu0 %v6141_v55  ;;  %2422 = vmatprep.subr.bf16.mxu1 %v6269_v56  ;;  %v990_v6 = vld [vmem:[#allocation4 + $0x768] sm:$0xff] }
 0x161   :  { %v6357_v11 = vcombine.high %v986_v42, %v990_v6  ;;  %v850_v12 = vld [vmem:[#allocation4 + $0x308] sm:$0xff]  ;;  %v6356_v47 = vcombine.low %v986_v42, %v990_v6  ;;  %v807_v42 = vld [vmem:[#allocation4 + $0x1b0] sm:$0xff]  ;;  %v6182_v6 = vcombine.low %v811_v34, %v815_v35 }
 0x162   :  { %v854_v43 = vld [vmem:[#allocation4 + $0x328] sm:$0xff] }
 0x163   :  { %2382 = vmatpush1.bf16.msra.mxu0 %v6140_v61  ;;  %2423 = vmatpush1.bf16.msra.mxu1 %v6268_v62  ;;  %v978_v44 = vld [vmem:[#allocation4 + $0x708] sm:$0xff]  ;;  %v6221_v48 = vcombine.high %v850_v12, %v854_v43  ;;  %v6220_v54 = vcombine.low %v850_v12, %v854_v43  ;;  %v795_v12 = vld [vmem:[#allocation4 + $0x150] sm:$0xff] }
 0x164   :  { %2383 = vmatprep.subr.bf16.mxu0 %v6133_v63  ;;  %2424 = vmatprep.subr.bf16.mxu1 %v6261_v1  ;;  %v982_v45 = vld [vmem:[#allocation4 + $0x728] sm:$0xff]  ;;  %v799_v43 = vld [vmem:[#allocation4 + $0x170] sm:$0xff] }
 0x165   :  { %v6349_v49 = vcombine.high %v978_v44, %v982_v45  ;;  %v842_v50 = vld [vmem:[#allocation4 + $0x2c8] sm:$0xff]  ;;  %v6348_v55 = vcombine.low %v978_v44, %v982_v45  ;;  %v923_v45 = vld [vmem:[#allocation4 + $0x550] sm:$0xff] }
 0x166   :  { %v846_v51 = vld [vmem:[#allocation4 + $0x2e8] sm:$0xff] }
 0x167   :  { %2384 = vmatpush1.bf16.msra.mxu0 %v6132_v9  ;;  %2425 = vmatpush1.bf16.msra.mxu1 %v6260_v14  ;;  %v970_v52 = vld [vmem:[#allocation4 + $0x6c8] sm:$0xff]  ;;  %v6213_v56 = vcombine.high %v842_v50, %v846_v51  ;;  %v6212_v62 = vcombine.low %v842_v50, %v846_v51  ;;  %v787_v51 = vld [vmem:[#allocation4 + $0x110] sm:$0xff] }
 0x168   :  { %2385 = vmatprep.subr.bf16.mxu0 %v6125_v15  ;;  %2426 = vmatprep.subr.bf16.mxu1 %v6253_v16  ;;  %v974_v53 = vld [vmem:[#allocation4 + $0x6e8] sm:$0xff] }
 0x169   :  { %v6341_v57 = vcombine.high %v970_v52, %v974_v53  ;;  %v834_v58 = vld [vmem:[#allocation4 + $0x288] sm:$0xff]  ;;  %v6340_v63 = vcombine.low %v970_v52, %v974_v53  ;;  %v791_v52 = vld [vmem:[#allocation4 + $0x130] sm:$0xff] }
 0x16a   :  { %v838_v59 = vld [vmem:[#allocation4 + $0x2a8] sm:$0xff]  ;;  %v915_v53 = vld [vmem:[#allocation4 + $0x510] sm:$0xff] }
 0x16b   :  { %2386 = vmatpush1.bf16.msra.mxu0 %v6124_v22  ;;  %2427 = vmatpush1.bf16.msra.mxu1 %v6252_v30  ;;  %v962_v60 = vld [vmem:[#allocation4 + $0x688] sm:$0xff]  ;;  %v6205_v1 = vcombine.high %v834_v58, %v838_v59  ;;  %v6204_v14 = vcombine.low %v834_v58, %v838_v59  ;;  %v779_v59 = vld [vmem:[#allocation4 + $0xd0] sm:$0xff] }
 0x16c   :  { %2387 = vmatprep.subr.bf16.mxu0 %v6245_v31  ;;  %2428 = vmatprep.subr.bf16.mxu1 %v6373_v32  ;;  %v966_v61 = vld [vmem:[#allocation4 + $0x6a8] sm:$0xff] }
 0x16d   :  { %v6333_v2 = vcombine.high %v962_v60, %v966_v61  ;;  %v826_v3 = vld [vmem:[#allocation4 + $0x248] sm:$0xff]  ;;  %v6332_v15 = vcombine.low %v962_v60, %v966_v61  ;;  %v783_v60 = vld [vmem:[#allocation4 + $0xf0] sm:$0xff] }
 0x16e   :  { %v830_v4 = vld [vmem:[#allocation4 + $0x268] sm:$0xff]  ;;  %v907_v61 = vld [vmem:[#allocation4 + $0x4d0] sm:$0xff] }
 0x16f   :  { %2388 = vmatpush2.bf16.msra.mxu0 %v6244_v37  ;;  %2429 = vmatpush2.bf16.msra.mxu1 %v6372_v38  ;;  %v954_v5 = vld [vmem:[#allocation4 + $0x648] sm:$0xff]  ;;  %v6197_v16 = vcombine.high %v826_v3, %v830_v4  ;;  %v6196_v30 = vcombine.low %v826_v3, %v830_v4  ;;  %v943_v37 = vld [vmem:[#allocation4 + $0x5f0] sm:$0xff] }
 0x170   :  { %2389 = vmatprep.subr.bf16.mxu0 %v6237_v39  ;;  %2430 = vmatprep.subr.bf16.mxu1 %v6365_v40  ;;  %v958_v9 = vld [vmem:[#allocation4 + $0x668] sm:$0xff]  ;;  %v6183_v40 = vcombine.high %v811_v34, %v815_v35  ;;  %v6311_v41 = vcombine.high %v939_v36, %v943_v37  ;;  %v771_v4 = vld [vmem:[#allocation4 + $0x90] sm:$0xff] }
 0x171   :  { %v6325_v17 = vcombine.high %v954_v5, %v958_v9  ;;  %v818_v18 = vld [vmem:[#allocation4 + $0x208] sm:$0xff]  ;;  %v6324_v31 = vcombine.low %v954_v5, %v958_v9  ;;  %v775_v5 = vld [vmem:[#allocation4 + $0xb0] sm:$0xff] }
 0x172   :  { %v822_v19 = vld [vmem:[#allocation4 + $0x228] sm:$0xff]  ;;  %v899_v9 = vld [vmem:[#allocation4 + $0x490] sm:$0xff] }
 0x173   :  { %2390 = vmatpush2.bf16.msra.mxu0 %v6236_v7  ;;  %2431 = vmatpush2.bf16.msra.mxu1 %v6364_v8  ;;  %v946_v21 = vld [vmem:[#allocation4 + $0x608] sm:$0xff]  ;;  %v6189_v32 = vcombine.high %v818_v18, %v822_v19  ;;  %v6188_v38 = vcombine.low %v818_v18, %v822_v19  ;;  %v931_v7 = vld [vmem:[#allocation4 + $0x590] sm:$0xff] }
 0x174   :  { %2391 = vmatprep.subr.bf16.mxu0 %v6229_v10  ;;  %2432 = vmatprep.subr.bf16.mxu1 %v6357_v11  ;;  %v950_v22 = vld [vmem:[#allocation4 + $0x628] sm:$0xff]  ;;  %v935_v8 = vld [vmem:[#allocation4 + $0x5b0] sm:$0xff]  ;;  %v6310_v10 = vcombine.low %v939_v36, %v943_v37  ;;  %v6175_v11 = vcombine.high %v803_v0, %v807_v42 }
 0x175   :  { %v6317_v33 = vcombine.high %v946_v21, %v950_v22  ;;  %v6316_v39 = vcombine.low %v946_v21, %v950_v22  ;;  %v6303_v44 = vcombine.high %v931_v7, %v935_v8  ;;  %v763_v19 = vld [vmem:[#allocation4 + $0x50] sm:$0xff] }
 0x176   :  { %v767_v21 = vld [vmem:[#allocation4 + $0x70] sm:$0xff] }
 0x177   :  { %2392 = vmatpush2.bf16.msra.mxu0 %v6228_v46  ;;  %2433 = vmatpush2.bf16.msra.mxu1 %v6356_v47  ;;  %v927_v46 = vld [vmem:[#allocation4 + $0x570] sm:$0xff]  ;;  %v6174_v47 = vcombine.low %v803_v0, %v807_v42 }
 0x178   :  { %2393 = vmatprep.subr.bf16.mxu0 %v6221_v48  ;;  %2434 = vmatprep.subr.bf16.mxu1 %v6349_v49  ;;  %v6302_v48 = vcombine.low %v931_v7, %v935_v8  ;;  %v6167_v49 = vcombine.high %v795_v12, %v799_v43  ;;  %v6295_v50 = vcombine.high %v923_v45, %v927_v46  ;;  %v891_v22 = vld [vmem:[#allocation4 + $0x450] sm:$0xff] }
 0x179   :  { %v755_v35 = vld [vmem:[#allocation4 + $0x10] sm:$0xff] }
 0x17a   :  { %v759_v36 = vld [vmem:[#allocation4 + $0x30] sm:$0xff] }
 0x17b   :  { %2394 = vmatpush2.bf16.msra.mxu0 %v6220_v54  ;;  %2435 = vmatpush2.bf16.msra.mxu1 %v6348_v55  ;;  %v919_v54 = vld [vmem:[#allocation4 + $0x530] sm:$0xff]  ;;  %v6166_v55 = vcombine.low %v795_v12, %v799_v43 }
 0x17c   :  { %2395 = vmatprep.subr.bf16.mxu0 %v6213_v56  ;;  %2436 = vmatprep.subr.bf16.mxu1 %v6341_v57  ;;  %v6294_v56 = vcombine.low %v923_v45, %v927_v46  ;;  %v6159_v57 = vcombine.high %v787_v51, %v791_v52  ;;  %v6287_v58 = vcombine.high %v915_v53, %v919_v54  ;;  %v883_v37 = vld [vmem:[#allocation4 + $0x410] sm:$0xff] }
 0x17d   :  { %v875_v42 = vld [vmem:[#allocation4 + $0x3d0] sm:$0xff] }
 0x17e   :  { %v1003_v7 = vld [vmem:[#allocation4 + $0x7d0] sm:$0xff] }
 0x17f   :  { %2396 = vmatpush2.bf16.msra.mxu0 %v6212_v62  ;;  %2437 = vmatpush2.bf16.msra.mxu1 %v6340_v63  ;;  %v911_v62 = vld [vmem:[#allocation4 + $0x4f0] sm:$0xff]  ;;  %v6158_v63 = vcombine.low %v787_v51, %v791_v52 }
 0x180   :  { %2397 = vmatprep.subr.bf16.mxu0 %v6205_v1  ;;  %2438 = vmatprep.subr.bf16.mxu1 %v6333_v2  ;;  %v6286_v1 = vcombine.low %v915_v53, %v919_v54  ;;  %v6151_v2 = vcombine.high %v779_v59, %v783_v60  ;;  %v6279_v3 = vcombine.high %v907_v61, %v911_v62  ;;  %v1007_v8 = vld [vmem:[#allocation4 + $0x7f0] sm:$0xff] }
 0x181   :  { %v6375_v43 = vcombine.high %v1003_v7, %v1007_v8  ;;  %v871_v45 = vld [vmem:[#allocation4 + $0x3b0] sm:$0xff] }
 0x182   :  { %v995_v46 = vld [vmem:[#allocation4 + $0x790] sm:$0xff] }
 0x183   :  { %2398 = vmatpush2.bf16.msra.mxu0 %v6204_v14  ;;  %2439 = vmatpush2.bf16.msra.mxu1 %v6332_v15  ;;  %v903_v14 = vld [vmem:[#allocation4 + $0x4b0] sm:$0xff]  ;;  %v6150_v15 = vcombine.low %v779_v59, %v783_v60 }
 0x184   :  { %2399 = vmatprep.subr.bf16.mxu0 %v6197_v16  ;;  %2440 = vmatprep.subr.bf16.mxu1 %v6325_v17  ;;  %v6278_v16 = vcombine.low %v907_v61, %v911_v62  ;;  %v6143_v17 = vcombine.high %v771_v4, %v775_v5  ;;  %v6271_v18 = vcombine.high %v899_v9, %v903_v14  ;;  %v859_v52 = vld [vmem:[#allocation4 + $0x350] sm:$0xff] }
 0x185   :  { %v863_v53 = vld [vmem:[#allocation4 + $0x370] sm:$0xff] }
 0x186   :  { %v987_v54 = vld [vmem:[#allocation4 + $0x750] sm:$0xff] }
 0x187   :  { %2400 = vmatpush2.bf16.msra.mxu0 %v6196_v30  ;;  %2441 = vmatpush2.bf16.msra.mxu1 %v6324_v31  ;;  %v895_v30 = vld [vmem:[#allocation4 + $0x470] sm:$0xff]  ;;  %v6142_v31 = vcombine.low %v771_v4, %v775_v5 }
 0x188   :  { %2401 = vmatprep.subr.bf16.mxu0 %v6189_v32  ;;  %2442 = vmatprep.subr.bf16.mxu1 %v6317_v33  ;;  %v6270_v32 = vcombine.low %v899_v9, %v903_v14  ;;  %v6135_v33 = vcombine.high %v763_v19, %v767_v21  ;;  %v6263_v34 = vcombine.high %v891_v22, %v895_v30  ;;  %v851_v60 = vld [vmem:[#allocation4 + $0x310] sm:$0xff] }
 0x189   :  { %v855_v61 = vld [vmem:[#allocation4 + $0x330] sm:$0xff] }
 0x18a   :  { %v979_v62 = vld [vmem:[#allocation4 + $0x710] sm:$0xff] }
 0x18b   :  { %2402 = vmatpush2.bf16.msra.mxu0 %v6188_v38  ;;  %2443 = vmatpush2.bf16.msra.mxu1 %v6316_v39  ;;  %v887_v38 = vld [vmem:[#allocation4 + $0x430] sm:$0xff]  ;;  %v6134_v39 = vcombine.low %v763_v19, %v767_v21 }
 0x18c   :  { %2453 = vmatprep.subr.bf16.mxu0 %v6183_v40  ;;  %2494 = vmatprep.subr.bf16.mxu1 %v6311_v41  ;;  %v6262_v40 = vcombine.low %v891_v22, %v895_v30  ;;  %v6127_v41 = vcombine.high %v755_v35, %v759_v36  ;;  %v6255_v0 = vcombine.high %v883_v37, %v887_v38  ;;  %v843_v5 = vld [vmem:[#allocation4 + $0x2d0] sm:$0xff] }
 0x18d   :  { %v847_v9 = vld [vmem:[#allocation4 + $0x2f0] sm:$0xff] }
 0x18e   :  { %2404 = vmatmul.mubr.bf16.vlgmr.msra.gmra.mxu0 %v7383_v23  ;;  %2445 = vmatmul.mubr.bf16.vlgmr.msra.gmra.mxu1 %v7387_v26  ;;  %v971_v14 = vld [vmem:[#allocation4 + $0x6d0] sm:$0xff] }
 0x18f   :  { %2454 = vmatpush1.bf16.msra.mxu0 %v6182_v6  ;;  %2485 = vmatprep.mubr.bf16.mxu0 %v7381_v20  ;;  %v879_v6 = vld [vmem:[#allocation4 + $0x3f0] sm:$0xff] }
 0x190   :  { %2495 = vmatpush1.bf16.msra.mxu1 %v6310_v10  ;;  %2526 = vmatprep.mubr.bf16.mxu1 %v7385_v24  ;;  %v6126_v10 = vcombine.low %v755_v35, %v759_v36  ;;  %v6247_v12 = vcombine.high %v875_v42, %v879_v6  ;;  %v835_v21 = vld [vmem:[#allocation4 + $0x290] sm:$0xff] }
 0x191   :  { %2455 = vmatprep.subr.bf16.mxu0 %v6175_v11  ;;  %2496 = vmatprep.subr.bf16.mxu1 %v6303_v44  ;;  %v6254_v11 = vcombine.low %v883_v37, %v887_v38  ;;  %v867_v44 = vld [vmem:[#allocation4 + $0x390] sm:$0xff] }
 0x192   :  { %v839_v22 = vld [vmem:[#allocation4 + $0x2b0] sm:$0xff] }
 0x193   :  { %2456 = vmatpush1.bf16.msra.mxu0 %v6174_v47  ;;  %v999_v47 = vld [vmem:[#allocation4 + $0x7b0] sm:$0xff] }
 0x194   :  { %2497 = vmatpush1.bf16.msra.mxu1 %v6302_v48  ;;  %2457 = vmatprep.subr.bf16.mxu0 %v6167_v49  ;;  %v6246_v48 = vcombine.low %v875_v42, %v879_v6  ;;  %v6374_v49 = vcombine.low %v1003_v7, %v1007_v8  ;;  %v6367_v51 = vcombine.high %v995_v46, %v999_v47  ;;  %v963_v30 = vld [vmem:[#allocation4 + $0x690] sm:$0xff] }
 0x195   :  { %2498 = vmatprep.subr.bf16.mxu1 %v6295_v50  ;;  %v6239_v50 = vcombine.high %v867_v44, %v871_v45  ;;  %v827_v36 = vld [vmem:[#allocation4 + $0x250] sm:$0xff] }
 0x196   :  { %v831_v37 = vld [vmem:[#allocation4 + $0x270] sm:$0xff] }
 0x197   :  { %2458 = vmatpush1.bf16.msra.mxu0 %v6166_v55  ;;  %v991_v55 = vld [vmem:[#allocation4 + $0x770] sm:$0xff] }
 0x198   :  { %2499 = vmatpush1.bf16.msra.mxu1 %v6294_v56  ;;  %2459 = vmatprep.subr.bf16.mxu0 %v6159_v57  ;;  %v6238_v56 = vcombine.low %v867_v44, %v871_v45  ;;  %v6366_v57 = vcombine.low %v995_v46, %v999_v47  ;;  %v6359_v59 = vcombine.high %v987_v54, %v991_v55  ;;  %v955_v38 = vld [vmem:[#allocation4 + $0x650] sm:$0xff]  ;;  %v812_v45 = vld [vmem:[#allocation4 + $0x1d8] sm:$0xff] }
 0x199   :  { %2500 = vmatprep.subr.bf16.mxu1 %v6287_v58  ;;  %v6231_v58 = vcombine.high %v859_v52, %v863_v53  ;;  %v819_v6 = vld [vmem:[#allocation4 + $0x210] sm:$0xff]  ;;  %v816_v46 = vld [vmem:[#allocation4 + $0x1f8] sm:$0xff] }
 0x19a   :  { %v823_v7 = vld [vmem:[#allocation4 + $0x230] sm:$0xff]  ;;  %v940_v47 = vld [vmem:[#allocation4 + $0x5d8] sm:$0xff] }
 0x19b   :  { %2460 = vmatpush1.bf16.msra.mxu0 %v6158_v63  ;;  %v983_v63 = vld [vmem:[#allocation4 + $0x730] sm:$0xff] }
 0x19c   :  { %2501 = vmatpush1.bf16.msra.mxu1 %v6286_v1  ;;  %2461 = vmatprep.subr.bf16.mxu0 %v6151_v2  ;;  %v6230_v1 = vcombine.low %v859_v52, %v863_v53  ;;  %v6358_v2 = vcombine.low %v987_v54, %v991_v55  ;;  %v6351_v4 = vcombine.high %v979_v62, %v983_v63  ;;  %v947_v8 = vld [vmem:[#allocation4 + $0x610] sm:$0xff]  ;;  %v804_v53 = vld [vmem:[#allocation4 + $0x198] sm:$0xff] }
 0x19d   :  { %2502 = vmatprep.subr.bf16.mxu1 %v6279_v3  ;;  %v6223_v3 = vcombine.high %v851_v60, %v855_v61  ;;  %v808_v54 = vld [vmem:[#allocation4 + $0x1b8] sm:$0xff]  ;;  %v6184_v55 = vcombine.low %v812_v45, %v816_v46 }
 0x19f   :  { %2462 = vmatpush1.bf16.msra.mxu0 %v6150_v15  ;;  %v975_v15 = vld [vmem:[#allocation4 + $0x6f0] sm:$0xff] }
 0x1a0   :  { %2503 = vmatpush1.bf16.msra.mxu1 %v6278_v16  ;;  %2463 = vmatprep.subr.bf16.mxu0 %v6143_v17  ;;  %v6222_v16 = vcombine.low %v851_v60, %v855_v61  ;;  %v6350_v17 = vcombine.low %v979_v62, %v983_v63  ;;  %v6343_v19 = vcombine.high %v971_v14, %v975_v15  ;;  %v796_v60 = vld [vmem:[#allocation4 + $0x158] sm:$0xff] }
 0x1a1   :  { %2504 = vmatprep.subr.bf16.mxu1 %v6271_v18  ;;  %v6215_v18 = vcombine.high %v843_v5, %v847_v9  ;;  %v800_v61 = vld [vmem:[#allocation4 + $0x178] sm:$0xff] }
 0x1a2   :  { %v924_v63 = vld [vmem:[#allocation4 + $0x558] sm:$0xff] }
 0x1a3   :  { %2464 = vmatpush1.bf16.msra.mxu0 %v6142_v31  ;;  %v967_v31 = vld [vmem:[#allocation4 + $0x6b0] sm:$0xff] }
 0x1a4   :  { %2505 = vmatpush1.bf16.msra.mxu1 %v6270_v32  ;;  %2465 = vmatprep.subr.bf16.mxu0 %v6135_v33  ;;  %v6214_v32 = vcombine.low %v843_v5, %v847_v9  ;;  %v6342_v33 = vcombine.low %v971_v14, %v975_v15  ;;  %v6335_v35 = vcombine.high %v963_v30, %v967_v31  ;;  %v788_v9 = vld [vmem:[#allocation4 + $0x118] sm:$0xff] }
 0x1a5   :  { %2506 = vmatprep.subr.bf16.mxu1 %v6263_v34  ;;  %v6207_v34 = vcombine.high %v835_v21, %v839_v22  ;;  %v792_v14 = vld [vmem:[#allocation4 + $0x138] sm:$0xff] }
 0x1a6   :  { %v916_v15 = vld [vmem:[#allocation4 + $0x518] sm:$0xff] }
 0x1a7   :  { %2466 = vmatpush1.bf16.msra.mxu0 %v6134_v39  ;;  %v959_v39 = vld [vmem:[#allocation4 + $0x670] sm:$0xff] }
 0x1a8   :  { %2507 = vmatpush1.bf16.msra.mxu1 %v6262_v40  ;;  %2467 = vmatprep.subr.bf16.mxu0 %v6127_v41  ;;  %v6206_v40 = vcombine.low %v835_v21, %v839_v22  ;;  %v6334_v41 = vcombine.low %v963_v30, %v967_v31  ;;  %v6327_v42 = vcombine.high %v955_v38, %v959_v39  ;;  %v780_v21 = vld [vmem:[#allocation4 + $0xd8] sm:$0xff] }
 0x1a9   :  { %2508 = vmatprep.subr.bf16.mxu1 %v6255_v0  ;;  %v6199_v0 = vcombine.high %v827_v36, %v831_v37  ;;  %v784_v22 = vld [vmem:[#allocation4 + $0xf8] sm:$0xff] }
 0x1aa   :  { %v908_v30 = vld [vmem:[#allocation4 + $0x4d8] sm:$0xff] }
 0x1ab   :  { %2468 = vmatpush1.bf16.msra.mxu0 %v6126_v10  ;;  %v951_v10 = vld [vmem:[#allocation4 + $0x630] sm:$0xff]  ;;  %v912_v31 = vld [vmem:[#allocation4 + $0x4f8] sm:$0xff] }
 0x1ac   :  { %2509 = vmatpush1.bf16.msra.mxu1 %v6254_v11  ;;  %2469 = vmatprep.subr.bf16.mxu0 %v6247_v12  ;;  %v6198_v11 = vcombine.low %v827_v36, %v831_v37  ;;  %v6326_v12 = vcombine.low %v955_v38, %v959_v39  ;;  %v6319_v44 = vcombine.high %v947_v8, %v951_v10  ;;  %v776_v36 = vld [vmem:[#allocation4 + $0xb8] sm:$0xff] }
 0x1ad   :  { %2510 = vmatprep.subr.bf16.mxu1 %v6375_v43  ;;  %v6191_v43 = vcombine.high %v819_v6, %v823_v7  ;;  %v900_v37 = vld [vmem:[#allocation4 + $0x498] sm:$0xff]  ;;  %v6152_v39 = vcombine.low %v780_v21, %v784_v22 }
 0x1ae   :  { %v904_v38 = vld [vmem:[#allocation4 + $0x4b8] sm:$0xff] }
 0x1af   :  { %2470 = vmatpush2.bf16.msra.mxu0 %v6246_v48  ;;  %v944_v48 = vld [vmem:[#allocation4 + $0x5f8] sm:$0xff] }
 0x1b0   :  { %2511 = vmatpush2.bf16.msra.mxu1 %v6374_v49  ;;  %2471 = vmatprep.subr.bf16.mxu0 %v6239_v50  ;;  %v6190_v49 = vcombine.low %v819_v6, %v823_v7  ;;  %v6318_v50 = vcombine.low %v947_v8, %v951_v10  ;;  %v6313_v52 = vcombine.high %v940_v47, %v944_v48  ;;  %v768_v6 = vld [vmem:[#allocation4 + $0x78] sm:$0xff] }
 0x1b1   :  { %2512 = vmatprep.subr.bf16.mxu1 %v6367_v51  ;;  %v6185_v51 = vcombine.high %v812_v45, %v816_v46  ;;  %v892_v7 = vld [vmem:[#allocation4 + $0x458] sm:$0xff] }
 0x1b2   :  { %v896_v8 = vld [vmem:[#allocation4 + $0x478] sm:$0xff] }
 0x1b3   :  { %2472 = vmatpush2.bf16.msra.mxu0 %v6238_v56  ;;  %v932_v56 = vld [vmem:[#allocation4 + $0x598] sm:$0xff] }
 0x1b4   :  { %2513 = vmatpush2.bf16.msra.mxu1 %v6366_v57  ;;  %2473 = vmatprep.subr.bf16.mxu0 %v6231_v58  ;;  %v936_v57 = vld [vmem:[#allocation4 + $0x5b8] sm:$0xff]  ;;  %v6312_v58 = vcombine.low %v940_v47, %v944_v48 }
 0x1b5   :  { %2514 = vmatprep.subr.bf16.mxu1 %v6359_v59  ;;  %v6177_v59 = vcombine.high %v804_v53, %v808_v54  ;;  %v6305_v62 = vcombine.high %v932_v56, %v936_v57  ;;  %v760_v45 = vld [vmem:[#allocation4 + $0x38] sm:$0xff] }
 0x1b6   :  { %v884_v46 = vld [vmem:[#allocation4 + $0x418] sm:$0xff] }
 0x1b7   :  { %2474 = vmatpush2.bf16.msra.mxu0 %v6230_v1  ;;  %v928_v1 = vld [vmem:[#allocation4 + $0x578] sm:$0xff] }
 0x1b8   :  { %2515 = vmatpush2.bf16.msra.mxu1 %v6358_v2  ;;  %2475 = vmatprep.subr.bf16.mxu0 %v6223_v3  ;;  %v6176_v2 = vcombine.low %v804_v53, %v808_v54  ;;  %v6304_v3 = vcombine.low %v932_v56, %v936_v57  ;;  %v6297_v5 = vcombine.high %v924_v63, %v928_v1  ;;  %v888_v47 = vld [vmem:[#allocation4 + $0x438] sm:$0xff] }
 0x1b9   :  { %2516 = vmatprep.subr.bf16.mxu1 %v6351_v4  ;;  %v6169_v4 = vcombine.high %v796_v60, %v800_v61  ;;  %v880_v53 = vld [vmem:[#allocation4 + $0x3f8] sm:$0xff]  ;;  %v6256_v57 = vcombine.low %v884_v46, %v888_v47 }
 0x1ba   :  { %v1004_v54 = vld [vmem:[#allocation4 + $0x7d8] sm:$0xff] }
 0x1bb   :  { %2476 = vmatpush2.bf16.msra.mxu0 %v6222_v16  ;;  %v920_v16 = vld [vmem:[#allocation4 + $0x538] sm:$0xff] }
 0x1bc   :  { %2517 = vmatpush2.bf16.msra.mxu1 %v6350_v17  ;;  %2477 = vmatprep.subr.bf16.mxu0 %v6215_v18  ;;  %v6168_v17 = vcombine.low %v796_v60, %v800_v61  ;;  %v6296_v18 = vcombine.low %v924_v63, %v928_v1  ;;  %v868_v60 = vld [vmem:[#allocation4 + $0x398] sm:$0xff] }
 0x1bd   :  { %2518 = vmatprep.subr.bf16.mxu1 %v6343_v19  ;;  %v6161_v19 = vcombine.high %v788_v9, %v792_v14  ;;  %v872_v61 = vld [vmem:[#allocation4 + $0x3b8] sm:$0xff] }
 0x1be   :  { %v1000_v63 = vld [vmem:[#allocation4 + $0x7b8] sm:$0xff] }
 0x1bf   :  { %2478 = vmatpush2.bf16.msra.mxu0 %v6214_v32  ;;  %v6288_v32 = vcombine.low %v916_v15, %v920_v16 }
 0x1c0   :  { %2519 = vmatpush2.bf16.msra.mxu1 %v6342_v33  ;;  %2479 = vmatprep.subr.bf16.mxu0 %v6207_v34  ;;  %v6153_v33 = vcombine.high %v780_v21, %v784_v22  ;;  %v6281_v34 = vcombine.high %v908_v30, %v912_v31  ;;  %v856_v21 = vld [vmem:[#allocation4 + $0x338] sm:$0xff] }
 0x1c1   :  { %2520 = vmatprep.subr.bf16.mxu1 %v6335_v35  ;;  %v772_v35 = vld [vmem:[#allocation4 + $0x98] sm:$0xff] }
 0x1c2   :  { %v6144_v10 = vcombine.low %v772_v35, %v776_v36  ;;  %v980_v22 = vld [vmem:[#allocation4 + $0x718] sm:$0xff] }
 0x1c3   :  { %2480 = vmatpush2.bf16.msra.mxu0 %v6206_v40  ;;  %v6280_v40 = vcombine.low %v908_v30, %v912_v31  ;;  %v984_v30 = vld [vmem:[#allocation4 + $0x738] sm:$0xff] }
 0x1c4   :  { %2521 = vmatpush2.bf16.msra.mxu1 %v6334_v41  ;;  %2481 = vmatprep.subr.bf16.mxu0 %v6199_v0  ;;  %v6145_v41 = vcombine.high %v772_v35, %v776_v36  ;;  %v6273_v0 = vcombine.high %v900_v37, %v904_v38  ;;  %v848_v35 = vld [vmem:[#allocation4 + $0x2f8] sm:$0xff] }
 0x1c5   :  { %2522 = vmatprep.subr.bf16.mxu1 %v6327_v42  ;;  %v764_v42 = vld [vmem:[#allocation4 + $0x58] sm:$0xff] }
 0x1c6   :  { %v6136_v48 = vcombine.low %v764_v42, %v768_v6  ;;  %v972_v36 = vld [vmem:[#allocation4 + $0x6d8] sm:$0xff] }
 0x1c7   :  { %2482 = vmatpush2.bf16.msra.mxu0 %v6198_v11  ;;  %v6272_v11 = vcombine.low %v900_v37, %v904_v38  ;;  %v976_v37 = vld [vmem:[#allocation4 + $0x6f8] sm:$0xff] }
 0x1c8   :  { %2523 = vmatpush2.bf16.msra.mxu1 %v6326_v12  ;;  %2483 = vmatprep.subr.bf16.mxu0 %v6191_v43  ;;  %v6137_v12 = vcombine.high %v764_v42, %v768_v6  ;;  %v6265_v43 = vcombine.high %v892_v7, %v896_v8  ;;  %v840_v42 = vld [vmem:[#allocation4 + $0x2b8] sm:$0xff] }
 0x1c9   :  { %2524 = vmatprep.subr.bf16.mxu1 %v6319_v44  ;;  %v756_v44 = vld [vmem:[#allocation4 + $0x18] sm:$0xff] }
 0x1ca   :  { %v6128_v56 = vcombine.low %v756_v44, %v760_v45  ;;  %v964_v6 = vld [vmem:[#allocation4 + $0x698] sm:$0xff] }
 0x1cb   :  { %2484 = vmatpush2.bf16.msra.mxu0 %v6190_v49  ;;  %v6264_v49 = vcombine.low %v892_v7, %v896_v8  ;;  %v968_v7 = vld [vmem:[#allocation4 + $0x6b8] sm:$0xff] }
 0x1cc   :  { %2525 = vmatpush2.bf16.msra.mxu1 %v6318_v50  ;;  %2535 = vmatprep.subr.bf16.mxu0 %v6185_v51  ;;  %v6129_v50 = vcombine.high %v756_v44, %v760_v45  ;;  %v6257_v51 = vcombine.high %v884_v46, %v888_v47  ;;  %v832_v44 = vld [vmem:[#allocation4 + $0x278] sm:$0xff] }
 0x1cd   :  { %2576 = vmatprep.subr.bf16.mxu1 %v6313_v52  ;;  %v876_v52 = vld [vmem:[#allocation4 + $0x3d8] sm:$0xff] }
 0x1ce   :  { %2486 = vmatmul.mubr.bf16.vlgmr.msra.gmra.mxu0 %v7383_v23  ;;  %v6248_v1 = vcombine.low %v876_v52, %v880_v53  ;;  %v956_v45 = vld [vmem:[#allocation4 + $0x658] sm:$0xff] }
 0x1cf   :  { %2527 = vmatmul.mubr.bf16.vlgmr.msra.gmra.mxu1 %v7387_v26  ;;  %2536 = vmatpush1.bf16.msra.mxu0 %v6184_v55  ;;  %v1008_v55 = vld [vmem:[#allocation4 + $0x7f8] sm:$0xff] }
 0x1d0   :  { %2567 = vmatprep.mubr.bf16.mxu0 %v7381_v20  ;;  %2577 = vmatpush1.bf16.msra.mxu1 %v6312_v58  ;;  %v6289_v20 = vcombine.high %v916_v15, %v920_v16  ;;  %v6249_v58 = vcombine.high %v876_v52, %v880_v53  ;;  %v992_v15 = vld [vmem:[#allocation4 + $0x778] sm:$0xff]  ;;  %v6240_v16 = vcombine.low %v868_v60, %v872_v61 }
 0x1d1   :  { %2608 = vmatprep.mubr.bf16.mxu1 %v7385_v24  ;;  %2537 = vmatprep.subr.bf16.mxu0 %v6177_v59  ;;  %v6160_v24 = vcombine.low %v788_v9, %v792_v14  ;;  %v6377_v59 = vcombine.high %v1004_v54, %v1008_v55  ;;  %v864_v9 = vld [vmem:[#allocation4 + $0x378] sm:$0xff] }
 0x1d2   :  { %2578 = vmatprep.subr.bf16.mxu1 %v6305_v62  ;;  %v996_v62 = vld [vmem:[#allocation4 + $0x798] sm:$0xff] }
 0x1d3   :  { %2538 = vmatpush1.bf16.msra.mxu0 %v6176_v2  ;;  %v6376_v2 = vcombine.low %v1004_v54, %v1008_v55  ;;  %v988_v14 = vld [vmem:[#allocation4 + $0x758] sm:$0xff] }
 0x1d4   :  { %2579 = vmatpush1.bf16.msra.mxu1 %v6304_v3  ;;  %2539 = vmatprep.subr.bf16.mxu0 %v6169_v4  ;;  %v6241_v3 = vcombine.high %v868_v60, %v872_v61  ;;  %v6369_v4 = vcombine.high %v996_v62, %v1000_v63  ;;  %v960_v46 = vld [vmem:[#allocation4 + $0x678] sm:$0xff]  ;;  %v2753_v60 = vld [vmem:[#allocation6 + $0x1e0] sm:$0xff] }
 0x1d5   :  { %2580 = vmatprep.subr.bf16.mxu1 %v6297_v5  ;;  %v860_v5 = vld [vmem:[#allocation4 + $0x358] sm:$0xff] }
 0x1d6   :  { %v6232_v31 = vcombine.low %v860_v5, %v864_v9  ;;  %v824_v52 = vld [vmem:[#allocation4 + $0x238] sm:$0xff] }
 0x1d7   :  { %2540 = vmatpush1.bf16.msra.mxu0 %v6168_v17  ;;  %v6368_v17 = vcombine.low %v996_v62, %v1000_v63  ;;  %v948_v53 = vld [vmem:[#allocation4 + $0x618] sm:$0xff] }
 0x1d8   :  { %2581 = vmatpush1.bf16.msra.mxu1 %v6296_v18  ;;  %2541 = vmatprep.subr.bf16.mxu0 %v6161_v19  ;;  %v6233_v18 = vcombine.high %v860_v5, %v864_v9  ;;  %v6361_v19 = vcombine.high %v988_v14, %v992_v15  ;;  %v952_v54 = vld [vmem:[#allocation4 + $0x638] sm:$0xff]  ;;  %v2733_v5 = vld [vmem:[#allocation6 + $0x140] sm:$0xff] }
 0x1d9   :  { %2582 = vmatprep.subr.bf16.mxu1 %v6289_v20  ;;  %v852_v20 = vld [vmem:[#allocation4 + $0x318] sm:$0xff]  ;;  %v6320_v62 = vcombine.low %v948_v53, %v952_v54  ;;  %v2737_v9 = vld [vmem:[#allocation6 + $0x160] sm:$0xff] }
 0x1da   :  { %v6224_v38 = vcombine.low %v852_v20, %v856_v21 }
 0x1db   :  { %2542 = vmatpush1.bf16.msra.mxu0 %v6160_v24  ;;  %v6360_v24 = vcombine.low %v988_v14, %v992_v15 }
 0x1dc   :  { %2583 = vmatpush1.bf16.msra.mxu1 %v6288_v32  ;;  %2543 = vmatprep.subr.bf16.mxu0 %v6153_v33  ;;  %v6225_v32 = vcombine.high %v852_v20, %v856_v21  ;;  %v6353_v33 = vcombine.high %v980_v22, %v984_v30  ;;  %v2725_v21 = vld [vmem:[#allocation6 + $0x100] sm:$0xff] }
 0x1dd   :  { %2584 = vmatprep.subr.bf16.mxu1 %v6281_v34  ;;  %v844_v34 = vld [vmem:[#allocation4 + $0x2d8] sm:$0xff] }
 0x1de   :  { %v6216_v8 = vcombine.low %v844_v34, %v848_v35 }
 0x1df   :  { %2544 = vmatpush1.bf16.msra.mxu0 %v6152_v39  ;;  %v6352_v39 = vcombine.low %v980_v22, %v984_v30  ;;  %v2729_v22 = vld [vmem:[#allocation6 + $0x120] sm:$0xff] }
 0x1e0   :  { %2585 = vmatpush1.bf16.msra.mxu1 %v6280_v40  ;;  %2545 = vmatprep.subr.bf16.mxu0 %v6145_v41  ;;  %v6217_v40 = vcombine.high %v844_v34, %v848_v35  ;;  %v6345_v41 = vcombine.high %v972_v36, %v976_v37  ;;  %v2717_v34 = vld [vmem:[#allocation6 + $0xc0] sm:$0xff] }
 0x1e1   :  { %2586 = vmatprep.subr.bf16.mxu1 %v6273_v0  ;;  %v836_v0 = vld [vmem:[#allocation4 + $0x298] sm:$0xff]  ;;  %v2721_v35 = vld [vmem:[#allocation6 + $0xe0] sm:$0xff] }
 0x1e2   :  { %v6208_v47 = vcombine.low %v836_v0, %v840_v42 }
 0x1e3   :  { %2546 = vmatpush1.bf16.msra.mxu0 %v6144_v10  ;;  %v6344_v10 = vcombine.low %v972_v36, %v976_v37  ;;  %v6410_v36 = vcombine.low %v2725_v21, %v2729_v22  ;;  %v6403_v37 = vcombine.high %v2717_v34, %v2721_v35 }
 0x1e4   :  { %2587 = vmatpush1.bf16.msra.mxu1 %v6272_v11  ;;  %2547 = vmatprep.subr.bf16.mxu0 %v6137_v12  ;;  %v6209_v11 = vcombine.high %v836_v0, %v840_v42  ;;  %v6337_v12 = vcombine.high %v964_v6, %v968_v7  ;;  %v2877_v0 = vld [vmem:[#allocation6 + $0x5c0] sm:$0xff] }
 0x1e5   :  { %2588 = vmatprep.subr.bf16.mxu1 %v6265_v43  ;;  %v828_v43 = vld [vmem:[#allocation4 + $0x258] sm:$0xff]  ;;  %v2881_v42 = vld [vmem:[#allocation6 + $0x5e0] sm:$0xff] }
 0x1e6   :  { %v6200_v55 = vcombine.low %v828_v43, %v832_v44 }
 0x1e7   :  { %2548 = vmatpush1.bf16.msra.mxu0 %v6136_v48  ;;  %v6336_v48 = vcombine.low %v964_v6, %v968_v7  ;;  %v7415_v6 = vld [vmem:[#allocation6 + $0x1c8] sm:$0xff]  ;;  %v2701_v7 = vld [vmem:[#allocation6 + $0x40] sm:$0xff] }
 0x1e8   :  { %2589 = vmatpush1.bf16.msra.mxu1 %v6264_v49  ;;  %2549 = vmatprep.subr.bf16.mxu0 %v6129_v50  ;;  %v6201_v49 = vcombine.high %v828_v43, %v832_v44  ;;  %v6329_v50 = vcombine.high %v956_v45, %v960_v46 }
 0x1e9   :  { %2590 = vmatprep.subr.bf16.mxu1 %v6257_v51  ;;  %v820_v51 = vld [vmem:[#allocation4 + $0x218] sm:$0xff] }
 0x1ea   :  { %v6192_v61 = vcombine.low %v820_v51, %v824_v52 }
 0x1eb   :  { %2550 = vmatpush1.bf16.msra.mxu0 %v6128_v56  ;;  %v6328_v56 = vcombine.low %v956_v45, %v960_v46  ;;  %v2869_v46 = vld [vmem:[#allocation6 + $0x580] sm:$0xff] }
 0x1ec   :  { %2591 = vmatpush1.bf16.msra.mxu1 %v6256_v57  ;;  %2551 = vmatprep.subr.bf16.mxu0 %v6249_v58  ;;  %v6193_v57 = vcombine.high %v820_v51, %v824_v52  ;;  %v6321_v58 = vcombine.high %v948_v53, %v952_v54  ;;  %v2861_v54 = vld [vmem:[#allocation6 + $0x540] sm:$0xff] }
 0x1ed   :  { %2592 = vmatprep.subr.bf16.mxu1 %v6377_v59  ;;  %v2749_v59 = vld [vmem:[#allocation6 + $0x1c0] sm:$0xff] }
 0x1ee   :  { %v6435_v63 = vcombine.high %v2749_v59, %v2753_v60 }
 0x1ef   :  { %2552 = vmatpush2.bf16.msra.mxu0 %v6248_v1  ;;  %v2741_v1 = vld [vmem:[#allocation6 + $0x180] sm:$0xff] }
 0x1f0   :  { %2593 = vmatpush2.bf16.msra.mxu1 %v6376_v2  ;;  %2553 = vmatprep.subr.bf16.mxu0 %v6241_v3  ;;  %v2745_v2 = vld [vmem:[#allocation6 + $0x1a0] sm:$0xff]  ;;  %v6434_v3 = vcombine.low %v2749_v59, %v2753_v60 }
 0x1f1   :  { %2594 = vmatprep.subr.bf16.mxu1 %v6369_v4  ;;  %v6427_v4 = vcombine.high %v2741_v1, %v2745_v2 }
 0x1f3   :  { %2554 = vmatpush2.bf16.msra.mxu0 %v6240_v16  ;;  %v6426_v16 = vcombine.low %v2741_v1, %v2745_v2  ;;  %v2805_v1 = vld [vmem:[#allocation6 + $0x380] sm:$0xff] }
 0x1f4   :  { %2595 = vmatpush2.bf16.msra.mxu1 %v6368_v17  ;;  %2555 = vmatprep.subr.bf16.mxu0 %v6233_v18  ;;  %v2809_v2 = vld [vmem:[#allocation6 + $0x3a0] sm:$0xff] }
 0x1f5   :  { %2596 = vmatprep.subr.bf16.mxu1 %v6361_v19  ;;  %v6419_v19 = vcombine.high %v2733_v5, %v2737_v9 }
 0x1f7   :  { %2556 = vmatpush2.bf16.msra.mxu0 %v6232_v31 }
 0x1f8   :  { %2597 = vmatpush2.bf16.msra.mxu1 %v6360_v24  ;;  %2557 = vmatprep.subr.bf16.mxu0 %v6225_v32 }
 0x1f9   :  { %2598 = vmatprep.subr.bf16.mxu1 %v6353_v33 }
 0x1fb   :  { %2558 = vmatpush2.bf16.msra.mxu0 %v6224_v38  ;;  %v2709_v38 = vld [vmem:[#allocation6 + $0x80] sm:$0xff] }
 0x1fc   :  { %2599 = vmatpush2.bf16.msra.mxu1 %v6352_v39  ;;  %2559 = vmatprep.subr.bf16.mxu0 %v6217_v40  ;;  %v2713_v39 = vld [vmem:[#allocation6 + $0xa0] sm:$0xff]  ;;  %v6402_v40 = vcombine.low %v2717_v34, %v2721_v35 }
 0x1fd   :  { %2600 = vmatprep.subr.bf16.mxu1 %v6345_v41  ;;  %v6395_v41 = vcombine.high %v2709_v38, %v2713_v39  ;;  %v6394_v44 = vcombine.low %v2709_v38, %v2713_v39  ;;  %v2781_v38 = vld [vmem:[#allocation6 + $0x2c0] sm:$0xff] }
 0x1fe   :  { %v2785_v39 = vld [vmem:[#allocation6 + $0x2e0] sm:$0xff] }
 0x1ff   :  { %2560 = vmatpush2.bf16.msra.mxu0 %v6216_v8  ;;  %v2705_v8 = vld [vmem:[#allocation6 + $0x60] sm:$0xff] }
 0x200   :  { %2601 = vmatpush2.bf16.msra.mxu1 %v6344_v10  ;;  %2561 = vmatprep.subr.bf16.mxu0 %v6209_v11  ;;  %v6563_v10 = vcombine.high %v2877_v0, %v2881_v42  ;;  %v7417_v11 = vld [vmem:[#allocation6 + $0x1e8] sm:$0xff]  ;;  %v6387_v45 = vcombine.high %v2701_v7, %v2705_v8  ;;  %v6386_v52 = vcombine.low %v2701_v7, %v2705_v8  ;;  %v2821_v7 = vld [vmem:[#allocation6 + $0x400] sm:$0xff] }
 0x201   :  { %2602 = vmatprep.subr.bf16.mxu1 %v6337_v12  ;;  %v6562_v12 = vcombine.low %v2877_v0, %v2881_v42  ;;  %v6436_v43 = vcombine.low %v7415_v6, %v7417_v11  ;;  %v6467_v42 = vcombine.high %v2781_v38, %v2785_v39  ;;  %v2825_v8 = vld [vmem:[#allocation6 + $0x420] sm:$0xff] }
 0x203   :  { %2562 = vmatpush2.bf16.msra.mxu0 %v6208_v47  ;;  %v2873_v47 = vld [vmem:[#allocation6 + $0x5a0] sm:$0xff] }
 0x204   :  { %2603 = vmatpush2.bf16.msra.mxu1 %v6336_v48  ;;  %2563 = vmatprep.subr.bf16.mxu0 %v6201_v49  ;;  %v2693_v48 = vld [vmem:[#allocation6] sm:$0xff]  ;;  %v6555_v51 = vcombine.high %v2869_v46, %v2873_v47 }
 0x205   :  { %2604 = vmatprep.subr.bf16.mxu1 %v6329_v50  ;;  %v2697_v49 = vld [vmem:[#allocation6 + $0x20] sm:$0xff]  ;;  %v6554_v50 = vcombine.low %v2869_v46, %v2873_v47  ;;  %v6466_v46 = vcombine.low %v2781_v38, %v2785_v39 }
 0x206   :  { %v6379_v53 = vcombine.high %v2693_v48, %v2697_v49  ;;  %v6378_v60 = vcombine.low %v2693_v48, %v2697_v49  ;;  %v2941_v48 = vld [vmem:[#allocation6 + $0x7c0] sm:$0xff] }
 0x207   :  { %2564 = vmatpush2.bf16.msra.mxu0 %v6200_v55  ;;  %v2865_v55 = vld [vmem:[#allocation6 + $0x560] sm:$0xff] }
 0x208   :  { %2605 = vmatpush2.bf16.msra.mxu1 %v6328_v56  ;;  %2565 = vmatprep.subr.bf16.mxu0 %v6193_v57  ;;  %v2813_v56 = vld [vmem:[#allocation6 + $0x3c0] sm:$0xff]  ;;  %v6547_v59 = vcombine.high %v2861_v54, %v2865_v55 }
 0x209   :  { %2606 = vmatprep.subr.bf16.mxu1 %v6321_v58  ;;  %v2817_v57 = vld [vmem:[#allocation6 + $0x3e0] sm:$0xff]  ;;  %v6546_v58 = vcombine.low %v2861_v54, %v2865_v55 }
 0x20a   :  { %v2945_v49 = vld [vmem:[#allocation6 + $0x7e0] sm:$0xff] }
 0x20b   :  { %2566 = vmatpush2.bf16.msra.mxu0 %v6192_v61  ;;  %v6499_v61 = vcombine.high %v2813_v56, %v2817_v57 }
 0x20c   :  { %2607 = vmatpush2.bf16.msra.mxu1 %v6320_v62  ;;  %4229 = vmatprep.subr.bf16.mxu0 %v6435_v63  ;;  %v2853_v62 = vld [vmem:[#allocation6 + $0x500] sm:$0xff] }
 0x20d   :  { %4270 = vmatprep.subr.bf16.mxu1 %v6563_v10  ;;  %v2857_v63 = vld [vmem:[#allocation6 + $0x520] sm:$0xff] }
 0x20e   :  { %2568 = vmatmul.mubr.bf16.vlgmr.msra.gmra.mxu0 %v7383_v23  ;;  %v2323_v14 = vpop.f32.mrf.mxu0  ;;  %v2364_v15 = vpop.f32.mrf.mxu1  ;;  %v6418_v23 = vcombine.low %v2733_v5, %v2737_v9  ;;  %v6498_v5 = vcombine.low %v2813_v56, %v2817_v57  ;;  %v6491_v9 = vcombine.high %v2805_v1, %v2809_v2  ;;  %v2773_v10 = vld [vmem:[#allocation6 + $0x280] sm:$0xff] }
 0x20f   :  { %2609 = vmatmul.mubr.bf16.vlgmr.msra.gmra.mxu1 %v7387_v26  ;;  %4230 = vmatpush1.bf16.msra.mxu0 %v6434_v3  ;;  %v7411_v17 = vadd.f32 %v2364_v15, %v2323_v14  ;;  %v6411_v26 = vcombine.high %v2725_v21, %v2729_v22  ;;  %v6538_v3 = vcombine.low %v2853_v62, %v2857_v63  ;;  %v2845_v14 = vld [vmem:[#allocation6 + $0x4c0] sm:$0xff] }
 0x210   :  { %v2325_v18 = vpop.f32.mrf.mxu0  ;;  %4231 = vmatprep.subr.bf16.mxu0 %v6427_v4  ;;  %v2366_v20 = vpop.f32.mrf.mxu1  ;;  %4271 = vmatpush1.bf16.msra.mxu1 %v6562_v12  ;;  %v6539_v4 = vcombine.high %v2853_v62, %v2857_v63  ;;  %v2849_v15 = vld [vmem:[#allocation6 + $0x4e0] sm:$0xff]  ;;  %v6490_v21 = vcombine.low %v2805_v1, %v2809_v2 }
 0x211   :  { %v7413_v30 = vadd.f32 %v2366_v20, %v2325_v18  ;;  %4272 = vmatprep.subr.bf16.mxu1 %v6555_v51  ;;  %v2801_v18 = vld [vmem:[#allocation6 + $0x360] sm:$0xff]  ;;  %v6531_v20 = vcombine.high %v2845_v14, %v2849_v15 }
 0x212   :  { %v2327_v31 = vpop.f32.mrf.mxu0  ;;  %v2368_v24 = vpop.f32.mrf.mxu1  ;;  %v2777_v12 = vld [vmem:[#allocation6 + $0x2a0] sm:$0xff] }
 0x213   :  { %4232 = vmatpush1.bf16.msra.mxu0 %v6426_v16  ;;  %v2797_v16 = vld [vmem:[#allocation6 + $0x340] sm:$0xff]  ;;  %v6459_v47 = vcombine.high %v2773_v10, %v2777_v12  ;;  %v6458_v54 = vcombine.low %v2773_v10, %v2777_v12 }
 0x214   :  { %v2328_v32 = vpop.f32.mrf.mxu0  ;;  %4233 = vmatprep.subr.bf16.mxu0 %v6419_v19  ;;  %v2369_v33 = vpop.f32.mrf.mxu1  ;;  %4273 = vmatpush1.bf16.msra.mxu1 %v6554_v50  ;;  %v6530_v19 = vcombine.low %v2845_v14, %v2849_v15  ;;  %v6483_v22 = vcombine.high %v2797_v16, %v2801_v18  ;;  %v2837_v31 = vld [vmem:[#allocation6 + $0x480] sm:$0xff]  ;;  %v6482_v34 = vcombine.low %v2797_v16, %v2801_v18 }
 0x215   :  { %4274 = vmatprep.subr.bf16.mxu1 %v6547_v59  ;;  %v2841_v24 = vld [vmem:[#allocation6 + $0x4a0] sm:$0xff] }
 0x216   :  { %v2793_v32 = vld [vmem:[#allocation6 + $0x320] sm:$0xff]  ;;  %v6523_v33 = vcombine.high %v2837_v31, %v2841_v24 }
 0x217   :  { %4234 = vmatpush1.bf16.msra.mxu0 %v6418_v23  ;;  %v2789_v23 = vld [vmem:[#allocation6 + $0x300] sm:$0xff] }
 0x218   :  { %4235 = vmatprep.subr.bf16.mxu0 %v6411_v26  ;;  %4275 = vmatpush1.bf16.msra.mxu1 %v6546_v58  ;;  %v6522_v26 = vcombine.low %v2837_v31, %v2841_v24  ;;  %v6475_v35 = vcombine.high %v2789_v23, %v2793_v32  ;;  %v6474_v0 = vcombine.low %v2789_v23, %v2793_v32  ;;  %v2765_v50 = vld [vmem:[#allocation6 + $0x240] sm:$0xff] }
 0x219   :  { %4276 = vmatprep.subr.bf16.mxu1 %v6539_v4  ;;  %v2769_v51 = vld [vmem:[#allocation6 + $0x260] sm:$0xff] }
 0x21a   :  { %v6451_v55 = vcombine.high %v2765_v50, %v2769_v51  ;;  %v2933_v56 = vld [vmem:[#allocation6 + $0x780] sm:$0xff]  ;;  %v6450_v62 = vcombine.low %v2765_v50, %v2769_v51 }
 0x21b   :  { %4236 = vmatpush1.bf16.msra.mxu0 %v6410_v36  ;;  %v2829_v36 = vld [vmem:[#allocation6 + $0x440] sm:$0xff] }
 0x21c   :  { %4237 = vmatprep.subr.bf16.mxu0 %v6403_v37  ;;  %4277 = vmatpush1.bf16.msra.mxu1 %v6538_v3  ;;  %v2833_v37 = vld [vmem:[#allocation6 + $0x460] sm:$0xff] }
 0x21d   :  { %4278 = vmatprep.subr.bf16.mxu1 %v6531_v20  ;;  %v2937_v57 = vld [vmem:[#allocation6 + $0x7a0] sm:$0xff] }
 0x21e   :  { %v2757_v58 = vld [vmem:[#allocation6 + $0x200] sm:$0xff] }
 0x21f   :  { %4238 = vmatpush1.bf16.msra.mxu0 %v6402_v40  ;;  %v6514_v40 = vcombine.low %v2829_v36, %v2833_v37  ;;  %v2761_v59 = vld [vmem:[#allocation6 + $0x220] sm:$0xff] }
 0x220   :  { %4239 = vmatprep.subr.bf16.mxu0 %v6395_v41  ;;  %4279 = vmatpush1.bf16.msra.mxu1 %v6530_v19  ;;  %v6515_v41 = vcombine.high %v2829_v36, %v2833_v37  ;;  %v6443_v63 = vcombine.high %v2757_v58, %v2761_v59  ;;  %v2925_v1 = vld [vmem:[#allocation6 + $0x740] sm:$0xff] }
 0x221   :  { %4280 = vmatprep.subr.bf16.mxu1 %v6523_v33  ;;  %v2929_v2 = vld [vmem:[#allocation6 + $0x760] sm:$0xff] }
 0x222   :  { %v6610_v3 = vcombine.low %v2925_v1, %v2929_v2  ;;  %v6611_v4 = vcombine.high %v2925_v1, %v2929_v2  ;;  %v2917_v14 = vld [vmem:[#allocation6 + $0x700] sm:$0xff] }
 0x223   :  { %4240 = vmatpush1.bf16.msra.mxu0 %v6394_v44  ;;  %v6506_v44 = vcombine.low %v2821_v7, %v2825_v8  ;;  %v2921_v15 = vld [vmem:[#allocation6 + $0x720] sm:$0xff] }
 0x224   :  { %4241 = vmatprep.subr.bf16.mxu0 %v6387_v45  ;;  %4281 = vmatpush1.bf16.msra.mxu1 %v6522_v26  ;;  %v6507_v45 = vcombine.high %v2821_v7, %v2825_v8  ;;  %v6602_v16 = vcombine.low %v2917_v14, %v2921_v15  ;;  %v6603_v18 = vcombine.high %v2917_v14, %v2921_v15  ;;  %v2909_v19 = vld [vmem:[#allocation6 + $0x6c0] sm:$0xff] }
 0x225   :  { %4282 = vmatprep.subr.bf16.mxu1 %v6515_v41  ;;  %v2913_v20 = vld [vmem:[#allocation6 + $0x6e0] sm:$0xff] }
 0x226   :  { %v2901_v26 = vld [vmem:[#allocation6 + $0x680] sm:$0xff] }
 0x227   :  { %4242 = vmatpush1.bf16.msra.mxu0 %v6386_v52  ;;  %v6626_v52 = vcombine.low %v2941_v48, %v2945_v49  ;;  %v2905_v33 = vld [vmem:[#allocation6 + $0x6a0] sm:$0xff] }
 0x228   :  { %4243 = vmatprep.subr.bf16.mxu0 %v6379_v53  ;;  %4283 = vmatpush1.bf16.msra.mxu1 %v6514_v40  ;;  %v6627_v53 = vcombine.high %v2941_v48, %v2945_v49  ;;  %v6586_v38 = vcombine.low %v2901_v26, %v2905_v33  ;;  %v2893_v41 = vld [vmem:[#allocation6 + $0x640] sm:$0xff] }
 0x229   :  { %4284 = vmatprep.subr.bf16.mxu1 %v6507_v45  ;;  %v2885_v10 = vld [vmem:[#allocation6 + $0x600] sm:$0xff] }
 0x22a   :  { %v2889_v12 = vld [vmem:[#allocation6 + $0x620] sm:$0xff] }
 0x22b   :  { %4244 = vmatpush1.bf16.msra.mxu0 %v6378_v60  ;;  %v6618_v60 = vcombine.low %v2933_v56, %v2937_v57  ;;  %v6570_v45 = vcombine.low %v2885_v10, %v2889_v12  ;;  %v7438_v50 = vld [vmem:[%s7730_s28] sm:$0xf] }
 0x22c   :  { %4245 = vmatprep.subr.bf16.mxu0 %v6499_v61  ;;  %4285 = vmatpush1.bf16.msra.mxu1 %v6506_v44  ;;  %v6619_v61 = vcombine.high %v2933_v56, %v2937_v57  ;;  %v6571_v44 = vcombine.high %v2885_v10, %v2889_v12  ;;  %v2623_v51 = vrot.slane %v7438_v50, %v7359_v25  ;;  %v2710_v12 = vld [vmem:[#allocation6 + $0x88] sm:$0xff] }
 0x22d   :  { %4286 = vmatprep.subr.bf16.mxu1 %v6627_v53  ;;  %v2627_v53 = vrot.slane %v7438_v50, %v7366_v28 }
 0x22f   :  { %4246 = vmatpush2.bf16.msra.mxu0 %v6498_v5  ;;  %v6442_v5 = vcombine.low %v2757_v58, %v2761_v59  ;;  %v2641_v58 = vmul.f32 %v2627_v53, %v7413_v30 }
 0x230   :  { %4247 = vmatprep.subr.bf16.mxu0 %v6491_v9  ;;  %4287 = vmatpush2.bf16.msra.mxu1 %v6626_v52  ;;  %v6437_v9 = vcombine.high %v7415_v6, %v7417_v11  ;;  %v7445_v52 = vld [vmem:[%s7731_s30] sm:$0xf]  ;;  %v2714_v6 = vld [vmem:[#allocation6 + $0xa8] sm:$0xff] }
 0x231   :  { %4288 = vmatprep.subr.bf16.mxu1 %v6619_v61  ;;  %v2648_v56 = vrot.slane %v7445_v52, %v7359_v25  ;;  %v2652_v59 = vrot.slane %v7445_v52, %v7366_v28 }
 0x233   :  { %4248 = vmatpush2.bf16.msra.mxu0 %v6490_v21  ;;  %v6594_v21 = vcombine.low %v2909_v19, %v2913_v20 }
 0x234   :  { %4249 = vmatprep.subr.bf16.mxu0 %v6483_v22  ;;  %4289 = vmatpush2.bf16.msra.mxu1 %v6618_v60  ;;  %v6595_v22 = vcombine.high %v2909_v19, %v2913_v20 }
 0x235   :  { %4290 = vmatprep.subr.bf16.mxu1 %v6611_v4 }
 0x237   :  { %4250 = vmatpush2.bf16.msra.mxu0 %v6482_v34 }
 0x238   :  { %4251 = vmatprep.subr.bf16.mxu0 %v6475_v35  ;;  %4291 = vmatpush2.bf16.msra.mxu1 %v6610_v3  ;;  %v6587_v35 = vcombine.high %v2901_v26, %v2905_v33 }
 0x239   :  { %4292 = vmatprep.subr.bf16.mxu1 %v6603_v18 }
 0x23b   :  { %4252 = vmatpush2.bf16.msra.mxu0 %v6474_v0  ;;  %v2897_v0 = vld [vmem:[#allocation6 + $0x660] sm:$0xff] }
 0x23c   :  { %4253 = vmatprep.subr.bf16.mxu0 %v6467_v42  ;;  %4293 = vmatpush2.bf16.msra.mxu1 %v6602_v16  ;;  %v6579_v7 = vcombine.high %v2893_v41, %v2897_v0  ;;  %v6578_v8 = vcombine.low %v2893_v41, %v2897_v0 }
 0x23d   :  { %4294 = vmatprep.subr.bf16.mxu1 %v6595_v22 }
 0x23f   :  { %4254 = vmatpush2.bf16.msra.mxu0 %v6466_v46  ;;  %v7427_v46 = vld [vmem:[#allocation6 + $0x5c8] sm:$0xff] }
 0x240   :  { %4255 = vmatprep.subr.bf16.mxu0 %v6459_v47  ;;  %4295 = vmatpush2.bf16.msra.mxu1 %v6594_v21  ;;  %v7429_v47 = vld [vmem:[#allocation6 + $0x5e8] sm:$0xff] }
 0x241   :  { %4296 = vmatprep.subr.bf16.mxu1 %v6587_v35  ;;  %v6565_v48 = vcombine.high %v7427_v46, %v7429_v47  ;;  %v6564_v49 = vcombine.low %v7427_v46, %v7429_v47  ;;  %v2738_v35 = vld [vmem:[#allocation6 + $0x168] sm:$0xff] }
 0x243   :  { %4256 = vmatpush2.bf16.msra.mxu0 %v6458_v54 }
 0x244   :  { %4257 = vmatprep.subr.bf16.mxu0 %v6451_v55  ;;  %4297 = vmatpush2.bf16.msra.mxu1 %v6586_v38  ;;  %v2640_v55 = vmul.f32 %v2623_v51, %v7411_v17 }
 0x245   :  { %4298 = vmatprep.subr.bf16.mxu1 %v6579_v7  ;;  %v2722_v7 = vld [vmem:[#allocation6 + $0xe8] sm:$0xff] }
 0x246   :  { %v2665_v3 = vadd.f32 %v2648_v56, %v2640_v55 }
 0x247   :  { %4258 = vmatpush2.bf16.msra.mxu0 %v6450_v62 }
 0x248   :  { %4259 = vmatprep.subr.bf16.mxu0 %v6443_v63  ;;  %4299 = vmatpush2.bf16.msra.mxu1 %v6578_v8  ;;  %v2669_v19 = vmax.f32 %v2665_v3, 0.0  ;;  %v2802_v3 = vld [vmem:[#allocation6 + $0x368] sm:$0xff] }
 0x249   :  { %4300 = vmatprep.subr.bf16.mxu1 %v6571_v44  ;;  %v2702_v44 = vld [vmem:[#allocation6 + $0x48] sm:$0xff] }
 0x24b   :  { %4260 = vmatpush2.bf16.msra.mxu0 %v6442_v5  ;;  %v2666_v5 = vadd.f32 %v2652_v59, %v2641_v58  ;;  %v2818_v58 = vld [vmem:[#allocation6 + $0x3e8] sm:$0xff] }
 0x24c   :  { %4311 = vmatprep.subr.bf16.mxu0 %v6437_v9  ;;  %4301 = vmatpush2.bf16.msra.mxu1 %v6570_v45  ;;  %v2706_v45 = vld [vmem:[#allocation6 + $0x68] sm:$0xff] }
 0x24d   :  { %4352 = vmatprep.subr.bf16.mxu1 %v6565_v48  ;;  %v2670_v30 = vmax.f32 %v2666_v5, 0.0  ;;  %v6396_v48 = vcombine.low %v2710_v12, %v2714_v6  ;;  %v6388_v55 = vcombine.low %v2702_v44, %v2706_v45 }
 0x24e   :  { %v2405_v31 = vpop.f32.mrf.mxu0  ;;  %v2446_v24 = vpop.f32.mrf.mxu1 }
 0x24f   :  { %v7423_v23 = vadd.f32 %v2446_v24, %v2405_v31  ;;  %v2742_v31 = vld [vmem:[#allocation6 + $0x188] sm:$0xff] }
 0x250   :  { %v2407_v32 = vpop.f32.mrf.mxu0  ;;  %v2448_v34 = vpop.f32.mrf.mxu1  ;;  %v2746_v24 = vld [vmem:[#allocation6 + $0x1a8] sm:$0xff] }
 0x251   :  { %v7425_v36 = vadd.f32 %v2448_v34, %v2407_v32  ;;  %v6429_v33 = vcombine.high %v2742_v31, %v2746_v24  ;;  %v2734_v34 = vld [vmem:[#allocation6 + $0x148] sm:$0xff] }
 0x252   :  { %v2409_v37 = vpop.f32.mrf.mxu0  ;;  %v2450_v39 = vpop.f32.mrf.mxu1  ;;  %v6421_v38 = vcombine.high %v2734_v34, %v2738_v35  ;;  %v6420_v41 = vcombine.low %v2734_v34, %v2738_v35  ;;  %v2766_v35 = vld [vmem:[#allocation6 + $0x248] sm:$0xff] }
 0x253   :  { %v6428_v37 = vcombine.low %v2742_v31, %v2746_v24  ;;  %v2726_v39 = vld [vmem:[#allocation6 + $0x108] sm:$0xff]  ;;  %v2635_v31 = vrot.slane %v7438_v50, %v7368_v29 }
 0x254   :  { %v2410_v40 = vpop.f32.mrf.mxu0  ;;  %v2451_v42 = vpop.f32.mrf.mxu1 }
 0x255   :  { %v2730_v40 = vld [vmem:[#allocation6 + $0x128] sm:$0xff] }
 0x256   :  { %v6413_v0 = vcombine.high %v2726_v39, %v2730_v40  ;;  %v2718_v42 = vld [vmem:[#allocation6 + $0xc8] sm:$0xff]  ;;  %v6412_v8 = vcombine.low %v2726_v39, %v2730_v40  ;;  %v2656_v39 = vrot.slane %v7445_v52, %v7364_v27 }
 0x257   :  { %v6405_v10 = vcombine.high %v2718_v42, %v2722_v7  ;;  %v6404_v11 = vcombine.low %v2718_v42, %v2722_v7 }
 0x28e   :  { %v2487_v54 = vpop.f32.mrf.mxu0 }
 0x28f   :  { %v2528_v57 = vpop.f32.mrf.mxu1 }
 0x290   :  { %v2529_v60 = vadd.f32 %v2528_v57, %v2487_v54  ;;  %v2489_v61 = vpop.f32.mrf.mxu0  ;;  %v2698_v54 = vld [vmem:[#allocation6 + $0x28] sm:$0xff] }
 0x291   :  { %v2530_v62 = vpop.f32.mrf.mxu1  ;;  %v2814_v57 = vld [vmem:[#allocation6 + $0x3c8] sm:$0xff] }
 0x292   :  { %v2673_v63 = vmul.f32 %v2623_v51, %v2529_v60  ;;  %v2531_v1 = vadd.f32 %v2530_v62, %v2489_v61  ;;  %v2491_v2 = vpop.f32.mrf.mxu0  ;;  %v6389_v51 = vcombine.high %v2702_v44, %v2706_v45  ;;  %v6501_v60 = vcombine.high %v2814_v57, %v2818_v58  ;;  %v2806_v61 = vld [vmem:[#allocation6 + $0x388] sm:$0xff] }
 0x293   :  { %v2532_v4 = vpop.f32.mrf.mxu1  ;;  %v2810_v62 = vld [vmem:[#allocation6 + $0x3a8] sm:$0xff] }
 0x294   :  { %v2677_v9 = vadd.f32 %v2673_v63, %v2648_v56  ;;  %v2674_v17 = vmul.f32 %v2627_v53, %v2531_v1  ;;  %v2492_v14 = vpop.f32.mrf.mxu0  ;;  %v2694_v53 = vld [vmem:[#allocation6 + $0x8] sm:$0xff]  ;;  %v6500_v63 = vcombine.low %v2814_v57, %v2818_v58  ;;  %v6493_v1 = vcombine.high %v2806_v61, %v2810_v62  ;;  %v2751_v58 = vld [vmem:[#allocation6 + $0x1d0] sm:$0xff] }
 0x295   :  { %v2533_v15 = vpop.f32.mrf.mxu1  ;;  %v6381_v56 = vcombine.high %v2694_v53, %v2698_v54  ;;  %v2798_v2 = vld [vmem:[#allocation6 + $0x348] sm:$0xff]  ;;  %v6492_v4 = vcombine.low %v2806_v61, %v2810_v62 }
 0x296   :  { %v2681_v16 = vmax.f32 %v2677_v9, 0.0  ;;  %v2678_v18 = vadd.f32 %v2674_v17, %v2652_v59  ;;  %v6380_v59 = vcombine.low %v2694_v53, %v2698_v54  ;;  %v6485_v5 = vcombine.high %v2798_v2, %v2802_v3  ;;  %v2790_v9 = vld [vmem:[#allocation6 + $0x308] sm:$0xff] }
 0x297   :  { %v2794_v17 = vld [vmem:[#allocation6 + $0x328] sm:$0xff]  ;;  %v6484_v14 = vcombine.low %v2798_v2, %v2802_v3 }
 0x298   :  { %v2682_v20 = vmax.f32 %v2678_v18, 0.0  ;;  %v2685_v21 = vmax.f32 %v2669_v19, %v2681_v16  ;;  %v6477_v15 = vcombine.high %v2790_v9, %v2794_v17  ;;  %v2782_v16 = vld [vmem:[#allocation6 + $0x2c8] sm:$0xff]  ;;  %v6476_v19 = vcombine.low %v2790_v9, %v2794_v17  ;;  %v2743_v9 = vld [vmem:[#allocation6 + $0x190] sm:$0xff] }
 0x299   :  { %v2786_v18 = vld [vmem:[#allocation6 + $0x2e8] sm:$0xff]  ;;  %v2747_v17 = vld [vmem:[#allocation6 + $0x1b0] sm:$0xff] }
 0x29a   :  { %v2686_v22 = vmax.f32 %v2670_v30, %v2682_v20  ;;  %v7457_v26 = vpack.c.bf16 %v2685_v21, %v2685_v21  ;;  %v6469_v30 = vcombine.high %v2782_v16, %v2786_v18  ;;  %v2774_v20 = vld [vmem:[#allocation6 + $0x288] sm:$0xff]  ;;  %v6468_v24 = vcombine.low %v2782_v16, %v2786_v18 }
 0x29b   :  { %v2778_v21 = vld [vmem:[#allocation6 + $0x2a8] sm:$0xff] }
 0x29c   :  { %v7455_v32 = vpack.c.bf16 %v2686_v22, %v2686_v22  ;;  %v2631_v22 = vrot.slane %v7438_v50, %v7364_v27  ;;  %v6460_v7 = vcombine.low %v2774_v20, %v2778_v21  ;;  %v2862_v18 = vld [vmem:[#allocation6 + $0x548] sm:$0xff] }
 0x29e   :  { %4261 = vmatprep.mubr.bf16.mxu0 %v7455_v32 }
 0x29f   :  { %4262 = vmatmul.mubr.bf16.vlgmr.msra.gmra.mxu0 %v7457_v26 }
 0x2a0   :  { %4312 = vmatpush1.bf16.msra.mxu0 %v6436_v43  ;;  %4343 = vmatprep.mubr.bf16.mxu0 %v7455_v32  ;;  %v6397_v43 = vcombine.high %v2710_v12, %v2714_v6 }
 0x2a1   :  { %4313 = vmatprep.subr.bf16.mxu0 %v6429_v33  ;;  %v6461_v33 = vcombine.high %v2774_v20, %v2778_v21  ;;  %v2866_v20 = vld [vmem:[#allocation6 + $0x568] sm:$0xff]  ;;  %v2735_v21 = vld [vmem:[#allocation6 + $0x150] sm:$0xff] }
 0x2a4   :  { %4314 = vmatpush1.bf16.msra.mxu0 %v6428_v37  ;;  %v2770_v37 = vld [vmem:[#allocation6 + $0x268] sm:$0xff] }
 0x2a5   :  { %4315 = vmatprep.subr.bf16.mxu0 %v6421_v38  ;;  %v2642_v38 = vmul.f32 %v2631_v22, %v7423_v23  ;;  %v2758_v23 = vld [vmem:[#allocation6 + $0x208] sm:$0xff] }
 0x2a7   :  { %v2667_v44 = vadd.f32 %v2656_v39, %v2642_v38  ;;  %v2727_v38 = vld [vmem:[#allocation6 + $0x110] sm:$0xff] }
 0x2a8   :  { %4316 = vmatpush1.bf16.msra.mxu0 %v6420_v41  ;;  %v2643_v41 = vmul.f32 %v2635_v31, %v7425_v36 }
 0x2a9   :  { %4317 = vmatprep.subr.bf16.mxu0 %v6413_v0  ;;  %v2660_v0 = vrot.slane %v7445_v52, %v7368_v29  ;;  %v6452_v52 = vcombine.low %v2766_v35, %v2770_v37 }
 0x2ac   :  { %4318 = vmatpush1.bf16.msra.mxu0 %v6412_v8 }
 0x2ad   :  { %4319 = vmatprep.subr.bf16.mxu0 %v6405_v10  ;;  %v6453_v10 = vcombine.high %v2766_v35, %v2770_v37  ;;  %v2854_v35 = vld [vmem:[#allocation6 + $0x508] sm:$0xff] }
 0x2ae   :  { %v2858_v37 = vld [vmem:[#allocation6 + $0x528] sm:$0xff] }
 0x2af   :  { %v6541_v47 = vcombine.high %v2854_v35, %v2858_v37 }
 0x2b0   :  { %4320 = vmatpush1.bf16.msra.mxu0 %v6404_v11 }
 0x2b1   :  { %4321 = vmatprep.subr.bf16.mxu0 %v6397_v43  ;;  %v2762_v43 = vld [vmem:[#allocation6 + $0x228] sm:$0xff] }
 0x2b4   :  { %4322 = vmatpush1.bf16.msra.mxu0 %v6396_v48  ;;  %v2668_v48 = vadd.f32 %v2660_v0, %v2643_v41  ;;  %v2846_v41 = vld [vmem:[#allocation6 + $0x4c8] sm:$0xff] }
 0x2b5   :  { %4323 = vmatprep.subr.bf16.mxu0 %v6389_v51 }
 0x2b6   :  { %v2672_v61 = vmax.f32 %v2668_v48, 0.0 }
 0x2b8   :  { %4324 = vmatpush1.bf16.msra.mxu0 %v6388_v55  ;;  %v6445_v55 = vcombine.high %v2758_v23, %v2762_v43 }
 0x2b9   :  { %4325 = vmatprep.subr.bf16.mxu0 %v6381_v56 }
 0x2bc   :  { %4326 = vmatpush1.bf16.msra.mxu0 %v6380_v59  ;;  %v2755_v59 = vld [vmem:[#allocation6 + $0x1f0] sm:$0xff] }
 0x2bd   :  { %4327 = vmatprep.subr.bf16.mxu0 %v6501_v60  ;;  %v2671_v60 = vmax.f32 %v2667_v44, 0.0  ;;  %v6439_v2 = vcombine.high %v2751_v58, %v2755_v59 }
 0x2c0   :  { %4328 = vmatpush2.bf16.msra.mxu0 %v6500_v63  ;;  %v6444_v63 = vcombine.low %v2758_v23, %v2762_v43  ;;  %v2711_v23 = vld [vmem:[#allocation6 + $0x90] sm:$0xff] }
 0x2c1   :  { %4329 = vmatprep.subr.bf16.mxu0 %v6493_v1  ;;  %v2715_v43 = vld [vmem:[#allocation6 + $0xb0] sm:$0xff] }
 0x2c4   :  { %4330 = vmatpush2.bf16.msra.mxu0 %v6492_v4  ;;  %v2870_v4 = vld [vmem:[#allocation6 + $0x588] sm:$0xff] }
 0x2c5   :  { %4331 = vmatprep.subr.bf16.mxu0 %v6485_v5  ;;  %v2874_v5 = vld [vmem:[#allocation6 + $0x5a8] sm:$0xff] }
 0x2c8   :  { %4332 = vmatpush2.bf16.msra.mxu0 %v6484_v14 }
 0x2c9   :  { %4333 = vmatprep.subr.bf16.mxu0 %v6477_v15  ;;  %v6438_v15 = vcombine.low %v2751_v58, %v2755_v59  ;;  %v2822_v59 = vld [vmem:[#allocation6 + $0x408] sm:$0xff] }
 0x2cc   :  { %4334 = vmatpush2.bf16.msra.mxu0 %v6476_v19  ;;  %v6557_v19 = vcombine.high %v2870_v4, %v2874_v5 }
 0x2cd   :  { %4335 = vmatprep.subr.bf16.mxu0 %v6469_v30  ;;  %v6431_v30 = vcombine.high %v2743_v9, %v2747_v17 }
 0x2ce   :  { %v2569_v34 = vpop.f32.mrf.mxu0 }
 0x2cf   :  { %v2610_v40 = vpop.f32.mrf.mxu1 }
 0x2d0   :  { %v2611_v42 = vadd.f32 %v2610_v40, %v2569_v34  ;;  %4336 = vmatpush2.bf16.msra.mxu0 %v6468_v24  ;;  %v2571_v50 = vpop.f32.mrf.mxu0  ;;  %v6430_v24 = vcombine.low %v2743_v9, %v2747_v17  ;;  %v6548_v40 = vcombine.low %v2862_v18, %v2866_v20  ;;  %v2815_v9 = vld [vmem:[#allocation6 + $0x3d0] sm:$0xff] }
 0x2d1   :  { %v2612_v8 = vpop.f32.mrf.mxu1  ;;  %4337 = vmatprep.subr.bf16.mxu0 %v6461_v33  ;;  %v6549_v33 = vcombine.high %v2862_v18, %v2866_v20  ;;  %v2819_v17 = vld [vmem:[#allocation6 + $0x3f0] sm:$0xff]  ;;  %v2934_v20 = vld [vmem:[#allocation6 + $0x788] sm:$0xff] }
 0x2d2   :  { %v2675_v12 = vmul.f32 %v2631_v22, %v2611_v42  ;;  %v2613_v6 = vadd.f32 %v2612_v8, %v2571_v50  ;;  %v2573_v11 = vpop.f32.mrf.mxu0  ;;  %v2739_v22 = vld [vmem:[#allocation6 + $0x170] sm:$0xff] }
 0x2d3   :  { %v2614_v45 = vpop.f32.mrf.mxu1  ;;  %v6423_v34 = vcombine.high %v2735_v21, %v2739_v22  ;;  %v6422_v46 = vcombine.low %v2735_v21, %v2739_v22  ;;  %v2719_v42 = vld [vmem:[#allocation6 + $0xd0] sm:$0xff]  ;;  %v2842_v11 = vld [vmem:[#allocation6 + $0x4a8] sm:$0xff] }
 0x2d4   :  { %v2679_v51 = vadd.f32 %v2675_v12, %v2656_v39  ;;  %v2676_v36 = vmul.f32 %v2635_v31, %v2613_v6  ;;  %4338 = vmatpush2.bf16.msra.mxu0 %v6460_v7  ;;  %v2574_v53 = vpop.f32.mrf.mxu0  ;;  %v6556_v31 = vcombine.low %v2870_v4, %v2874_v5  ;;  %v2731_v39 = vld [vmem:[#allocation6 + $0x130] sm:$0xff]  ;;  %v6540_v7 = vcombine.low %v2854_v35, %v2858_v37  ;;  %v2838_v6 = vld [vmem:[#allocation6 + $0x488] sm:$0xff] }
 0x2d5   :  { %v2615_v54 = vpop.f32.mrf.mxu1  ;;  %4339 = vmatprep.subr.bf16.mxu0 %v6453_v10  ;;  %v2723_v50 = vld [vmem:[#allocation6 + $0xf0] sm:$0xff]  ;;  %v6414_v8 = vcombine.low %v2727_v38, %v2731_v39  ;;  %v6525_v48 = vcombine.high %v2838_v6, %v2842_v11  ;;  %v2834_v53 = vld [vmem:[#allocation6 + $0x468] sm:$0xff] }
 0x2d6   :  { %v2683_v56 = vmax.f32 %v2679_v51, 0.0  ;;  %v2680_v57 = vadd.f32 %v2676_v36, %v2660_v0  ;;  %v2850_v0 = vld [vmem:[#allocation6 + $0x4e8] sm:$0xff]  ;;  %v6407_v12 = vcombine.high %v2719_v42, %v2723_v50  ;;  %v6406_v45 = vcombine.low %v2719_v42, %v2723_v50  ;;  %v2707_v54 = vld [vmem:[#allocation6 + $0x70] sm:$0xff] }
 0x2d7   :  { %v6533_v10 = vcombine.high %v2846_v41, %v2850_v0  ;;  %v6532_v44 = vcombine.low %v2846_v41, %v2850_v0  ;;  %v6399_v51 = vcombine.high %v2711_v23, %v2715_v43  ;;  %v2830_v36 = vld [vmem:[#allocation6 + $0x448] sm:$0xff]  ;;  %v2807_v22 = vld [vmem:[#allocation6 + $0x390] sm:$0xff] }
 0x2d8   :  { %v2684_v62 = vmax.f32 %v2680_v57, 0.0  ;;  %4340 = vmatpush2.bf16.msra.mxu0 %v6452_v52  ;;  %v2687_v1 = vmax.f32 %v2671_v60, %v2683_v56  ;;  %v2703_v52 = vld [vmem:[#allocation6 + $0x50] sm:$0xff]  ;;  %v6398_v56 = vcombine.low %v2711_v23, %v2715_v43  ;;  %v6517_v57 = vcombine.high %v2830_v36, %v2834_v53  ;;  %v2826_v60 = vld [vmem:[#allocation6 + $0x428] sm:$0xff] }
 0x2d9   :  { %4341 = vmatprep.subr.bf16.mxu0 %v6445_v55  ;;  %v6524_v55 = vcombine.low %v2838_v6, %v2842_v11  ;;  %v6391_v58 = vcombine.high %v2703_v52, %v2707_v54  ;;  %v2942_v4 = vld [vmem:[#allocation6 + $0x7c8] sm:$0xff]  ;;  %v2791_v50 = vld [vmem:[#allocation6 + $0x310] sm:$0xff] }
 0x2da   :  { %v2688_v3 = vmax.f32 %v2672_v61, %v2684_v62  ;;  %v7477_v16 = vpack.c.bf16 %v2687_v1, %v2687_v1  ;;  %v2695_v61 = vld [vmem:[#allocation6 + $0x10] sm:$0xff]  ;;  %v6390_v1 = vcombine.low %v2703_v52, %v2707_v54  ;;  %v2946_v5 = vld [vmem:[#allocation6 + $0x7e8] sm:$0xff] }
 0x2db   :  { %v2699_v62 = vld [vmem:[#allocation6 + $0x30] sm:$0xff]  ;;  %v2938_v21 = vld [vmem:[#allocation6 + $0x7a8] sm:$0xff] }
 0x2dc   :  { %4342 = vmatpush2.bf16.msra.mxu0 %v6444_v63  ;;  %v7475_v14 = vpack.c.bf16 %v2688_v3, %v2688_v3  ;;  %v6516_v63 = vcombine.low %v2830_v36, %v2834_v53  ;;  %v6383_v3 = vcombine.high %v2695_v61, %v2699_v62  ;;  %v6382_v18 = vcombine.low %v2695_v61, %v2699_v62  ;;  %v2926_v37 = vld [vmem:[#allocation6 + $0x748] sm:$0xff]  ;;  %v2783_v43 = vld [vmem:[#allocation6 + $0x2d0] sm:$0xff] }
 0x2dd   :  { %4393 = vmatprep.subr.bf16.mxu0 %v6439_v2  ;;  %v6509_v2 = vcombine.high %v2822_v59, %v2826_v60  ;;  %v2918_v0 = vld [vmem:[#allocation6 + $0x708] sm:$0xff]  ;;  %v2775_v54 = vld [vmem:[#allocation6 + $0x290] sm:$0xff] }
 0x2de   :  { %4302 = vmatprep.mubr.bf16.mxu1 %v7475_v14  ;;  %v2922_v42 = vld [vmem:[#allocation6 + $0x728] sm:$0xff]  ;;  %v2767_v62 = vld [vmem:[#allocation6 + $0x250] sm:$0xff] }
 0x2df   :  { %4344 = vmatmul.mubr.bf16.vlgmr.msra.gmra.mxu0 %v7457_v26  ;;  %4303 = vmatmul.mubr.bf16.vlgmr.msra.gmra.mxu1 %v7477_v16  ;;  %v2910_v11 = vld [vmem:[#allocation6 + $0x6c8] sm:$0xff] }
 0x2e0   :  { %4353 = vmatpush1.bf16.msra.mxu1 %v6564_v49  ;;  %4394 = vmatpush1.bf16.msra.mxu0 %v6438_v15  ;;  %v6415_v49 = vcombine.high %v2727_v38, %v2731_v39  ;;  %v6508_v15 = vcombine.low %v2822_v59, %v2826_v60  ;;  %v2930_v38 = vld [vmem:[#allocation6 + $0x768] sm:$0xff]  ;;  %v2799_v39 = vld [vmem:[#allocation6 + $0x350] sm:$0xff] }
 0x2e1   :  { %4425 = vmatprep.mubr.bf16.mxu0 %v7455_v32  ;;  %4384 = vmatprep.mubr.bf16.mxu1 %v7475_v14  ;;  %v2914_v23 = vld [vmem:[#allocation6 + $0x6e8] sm:$0xff] }
 0x2e2   :  { %4354 = vmatprep.subr.bf16.mxu1 %v6557_v19  ;;  %4395 = vmatprep.subr.bf16.mxu0 %v6431_v30  ;;  %v6629_v19 = vcombine.high %v2942_v4, %v2946_v5  ;;  %v6503_v30 = vcombine.high %v2815_v9, %v2819_v17  ;;  %v2902_v53 = vld [vmem:[#allocation6 + $0x688] sm:$0xff] }
 0x2e3   :  { %v2906_v52 = vld [vmem:[#allocation6 + $0x6a8] sm:$0xff] }
 0x2e4   :  { %4355 = vmatpush1.bf16.msra.mxu1 %v6556_v31  ;;  %4396 = vmatpush1.bf16.msra.mxu0 %v6430_v24  ;;  %v2811_v31 = vld [vmem:[#allocation6 + $0x3b0] sm:$0xff]  ;;  %v6628_v24 = vcombine.low %v2942_v4, %v2946_v5  ;;  %v2894_v60 = vld [vmem:[#allocation6 + $0x648] sm:$0xff] }
 0x2e5   :  { %4356 = vmatprep.subr.bf16.mxu1 %v6549_v33  ;;  %4397 = vmatprep.subr.bf16.mxu0 %v6423_v34  ;;  %v6502_v33 = vcombine.low %v2815_v9, %v2819_v17  ;;  %v6621_v34 = vcombine.high %v2934_v20, %v2938_v21  ;;  %v6495_v35 = vcombine.high %v2807_v22, %v2811_v31  ;;  %v2898_v61 = vld [vmem:[#allocation6 + $0x668] sm:$0xff]  ;;  %v2759_v17 = vld [vmem:[#allocation6 + $0x210] sm:$0xff] }
 0x2e6   :  { %v2886_v5 = vld [vmem:[#allocation6 + $0x608] sm:$0xff] }
 0x2e7   :  { %v2890_v9 = vld [vmem:[#allocation6 + $0x628] sm:$0xff] }
 0x2e8   :  { %4357 = vmatpush1.bf16.msra.mxu1 %v6548_v40  ;;  %4398 = vmatpush1.bf16.msra.mxu0 %v6422_v46  ;;  %v2803_v40 = vld [vmem:[#allocation6 + $0x370] sm:$0xff]  ;;  %v6620_v46 = vcombine.low %v2934_v20, %v2938_v21 }
 0x2e9   :  { %4358 = vmatprep.subr.bf16.mxu1 %v6541_v47  ;;  %4399 = vmatprep.subr.bf16.mxu0 %v6415_v49  ;;  %v6494_v47 = vcombine.low %v2807_v22, %v2811_v31  ;;  %v6613_v49 = vcombine.high %v2926_v37, %v2930_v38  ;;  %v6487_v41 = vcombine.high %v2799_v39, %v2803_v40  ;;  %v2879_v21 = vld [vmem:[#allocation6 + $0x5d0] sm:$0xff]  ;;  %v2752_v31 = vld [vmem:[#allocation6 + $0x1d8] sm:$0xff] }
 0x2ea   :  { %v2883_v22 = vld [vmem:[#allocation6 + $0x5f0] sm:$0xff] }
 0x2ec   :  { %4359 = vmatpush1.bf16.msra.mxu1 %v6540_v7  ;;  %4400 = vmatpush1.bf16.msra.mxu0 %v6414_v8  ;;  %v2795_v7 = vld [vmem:[#allocation6 + $0x330] sm:$0xff]  ;;  %v6612_v8 = vcombine.low %v2926_v37, %v2930_v38 }
 0x2ed   :  { %4360 = vmatprep.subr.bf16.mxu1 %v6533_v10  ;;  %4401 = vmatprep.subr.bf16.mxu0 %v6407_v12  ;;  %v6486_v10 = vcombine.low %v2799_v39, %v2803_v40  ;;  %v6605_v12 = vcombine.high %v2918_v0, %v2922_v42  ;;  %v6479_v6 = vcombine.high %v2791_v50, %v2795_v7  ;;  %v2871_v38 = vld [vmem:[#allocation6 + $0x590] sm:$0xff]  ;;  %v2744_v40 = vld [vmem:[#allocation6 + $0x198] sm:$0xff] }
 0x2ee   :  { %v2875_v39 = vld [vmem:[#allocation6 + $0x5b0] sm:$0xff] }
 0x2f0   :  { %4361 = vmatpush1.bf16.msra.mxu1 %v6532_v44  ;;  %4402 = vmatpush1.bf16.msra.mxu0 %v6406_v45  ;;  %v2787_v44 = vld [vmem:[#allocation6 + $0x2f0] sm:$0xff]  ;;  %v6604_v45 = vcombine.low %v2918_v0, %v2922_v42 }
 0x2f1   :  { %4362 = vmatprep.subr.bf16.mxu1 %v6525_v48  ;;  %4403 = vmatprep.subr.bf16.mxu0 %v6399_v51  ;;  %v6478_v48 = vcombine.low %v2791_v50, %v2795_v7  ;;  %v6597_v51 = vcombine.high %v2910_v11, %v2914_v23  ;;  %v6471_v36 = vcombine.high %v2783_v43, %v2787_v44  ;;  %v2863_v42 = vld [vmem:[#allocation6 + $0x550] sm:$0xff]  ;;  %v2736_v7 = vld [vmem:[#allocation6 + $0x158] sm:$0xff] }
 0x2f2   :  { %v2867_v50 = vld [vmem:[#allocation6 + $0x570] sm:$0xff] }
 0x2f4   :  { %4363 = vmatpush1.bf16.msra.mxu1 %v6524_v55  ;;  %4404 = vmatpush1.bf16.msra.mxu0 %v6398_v56  ;;  %v2779_v55 = vld [vmem:[#allocation6 + $0x2b0] sm:$0xff]  ;;  %v6596_v56 = vcombine.low %v2910_v11, %v2914_v23 }
 0x2f5   :  { %4364 = vmatprep.subr.bf16.mxu1 %v6517_v57  ;;  %4405 = vmatprep.subr.bf16.mxu0 %v6391_v58  ;;  %v6470_v57 = vcombine.low %v2783_v43, %v2787_v44  ;;  %v6589_v58 = vcombine.high %v2902_v53, %v2906_v52  ;;  %v6463_v59 = vcombine.high %v2775_v54, %v2779_v55  ;;  %v2855_v23 = vld [vmem:[#allocation6 + $0x510] sm:$0xff]  ;;  %v2728_v44 = vld [vmem:[#allocation6 + $0x118] sm:$0xff] }
 0x2f6   :  { %v2859_v43 = vld [vmem:[#allocation6 + $0x530] sm:$0xff] }
 0x2f8   :  { %4365 = vmatpush1.bf16.msra.mxu1 %v6516_v63  ;;  %4406 = vmatpush1.bf16.msra.mxu0 %v6390_v1  ;;  %v2771_v63 = vld [vmem:[#allocation6 + $0x270] sm:$0xff]  ;;  %v6588_v1 = vcombine.low %v2902_v53, %v2906_v52 }
 0x2f9   :  { %4366 = vmatprep.subr.bf16.mxu1 %v6509_v2  ;;  %4407 = vmatprep.subr.bf16.mxu0 %v6383_v3  ;;  %v6462_v2 = vcombine.low %v2775_v54, %v2779_v55  ;;  %v6581_v3 = vcombine.high %v2894_v60, %v2898_v61  ;;  %v6455_v4 = vcombine.high %v2767_v62, %v2771_v63  ;;  %v2847_v52 = vld [vmem:[#allocation6 + $0x4d0] sm:$0xff]  ;;  %v2724_v55 = vld [vmem:[#allocation6 + $0xf8] sm:$0xff] }
 0x2fa   :  { %v2851_v54 = vld [vmem:[#allocation6 + $0x4f0] sm:$0xff] }
 0x2fc   :  { %4367 = vmatpush1.bf16.msra.mxu1 %v6508_v15  ;;  %4408 = vmatpush1.bf16.msra.mxu0 %v6382_v18  ;;  %v2763_v15 = vld [vmem:[#allocation6 + $0x230] sm:$0xff]  ;;  %v6580_v18 = vcombine.low %v2894_v60, %v2898_v61 }
 0x2fd   :  { %4368 = vmatprep.subr.bf16.mxu1 %v6629_v19  ;;  %4409 = vmatprep.subr.bf16.mxu0 %v6503_v30  ;;  %v6454_v19 = vcombine.low %v2767_v62, %v2771_v63  ;;  %v6573_v30 = vcombine.high %v2886_v5, %v2890_v9  ;;  %v6447_v20 = vcombine.high %v2759_v17, %v2763_v15  ;;  %v2839_v60 = vld [vmem:[#allocation6 + $0x490] sm:$0xff]  ;;  %v2712_v62 = vld [vmem:[#allocation6 + $0x98] sm:$0xff] }
 0x2fe   :  { %v2843_v61 = vld [vmem:[#allocation6 + $0x4b0] sm:$0xff]  ;;  %v2716_v63 = vld [vmem:[#allocation6 + $0xb8] sm:$0xff] }
 0x300   :  { %4369 = vmatpush2.bf16.msra.mxu1 %v6628_v24  ;;  %4410 = vmatpush2.bf16.msra.mxu0 %v6502_v33  ;;  %v2756_v24 = vld [vmem:[#allocation6 + $0x1f8] sm:$0xff]  ;;  %v6572_v33 = vcombine.low %v2886_v5, %v2890_v9  ;;  %v2831_v5 = vld [vmem:[#allocation6 + $0x450] sm:$0xff] }
 0x301   :  { %4370 = vmatprep.subr.bf16.mxu1 %v6621_v34  ;;  %4411 = vmatprep.subr.bf16.mxu0 %v6495_v35  ;;  %v6446_v34 = vcombine.low %v2759_v17, %v2763_v15  ;;  %v6567_v35 = vcombine.high %v2879_v21, %v2883_v22  ;;  %v6441_v37 = vcombine.high %v2752_v31, %v2756_v24  ;;  %v2835_v9 = vld [vmem:[#allocation6 + $0x470] sm:$0xff]  ;;  %v2704_v17 = vld [vmem:[#allocation6 + $0x58] sm:$0xff] }
 0x302   :  { %v2708_v15 = vld [vmem:[#allocation6 + $0x78] sm:$0xff] }
 0x304   :  { %4371 = vmatpush2.bf16.msra.mxu1 %v6620_v46  ;;  %4412 = vmatpush2.bf16.msra.mxu0 %v6494_v47  ;;  %v2748_v46 = vld [vmem:[#allocation6 + $0x1b8] sm:$0xff]  ;;  %v6566_v47 = vcombine.low %v2879_v21, %v2883_v22  ;;  %v2823_v21 = vld [vmem:[#allocation6 + $0x410] sm:$0xff] }
 0x305   :  { %4372 = vmatprep.subr.bf16.mxu1 %v6613_v49  ;;  %4413 = vmatprep.subr.bf16.mxu0 %v6487_v41  ;;  %v6440_v49 = vcombine.low %v2752_v31, %v2756_v24  ;;  %v6559_v41 = vcombine.high %v2871_v38, %v2875_v39  ;;  %v6433_v0 = vcombine.high %v2744_v40, %v2748_v46  ;;  %v2827_v22 = vld [vmem:[#allocation6 + $0x430] sm:$0xff]  ;;  %v2696_v31 = vld [vmem:[#allocation6 + $0x18] sm:$0xff] }
 0x306   :  { %v2700_v24 = vld [vmem:[#allocation6 + $0x38] sm:$0xff] }
 0x308   :  { %4373 = vmatpush2.bf16.msra.mxu1 %v6612_v8  ;;  %4414 = vmatpush2.bf16.msra.mxu0 %v6486_v10  ;;  %v2740_v8 = vld [vmem:[#allocation6 + $0x178] sm:$0xff]  ;;  %v6558_v10 = vcombine.low %v2871_v38, %v2875_v39  ;;  %v2943_v38 = vld [vmem:[#allocation6 + $0x7d0] sm:$0xff] }
 0x309   :  { %4374 = vmatprep.subr.bf16.mxu1 %v6605_v12  ;;  %4415 = vmatprep.subr.bf16.mxu0 %v6479_v6  ;;  %v6432_v12 = vcombine.low %v2744_v40, %v2748_v46  ;;  %v6551_v6 = vcombine.high %v2863_v42, %v2867_v50  ;;  %v6425_v11 = vcombine.high %v2736_v7, %v2740_v8  ;;  %v2947_v39 = vld [vmem:[#allocation6 + $0x7f0] sm:$0xff]  ;;  %v2816_v40 = vld [vmem:[#allocation6 + $0x3d8] sm:$0xff] }
 0x30a   :  { %v2820_v46 = vld [vmem:[#allocation6 + $0x3f8] sm:$0xff] }
 0x30c   :  { %4375 = vmatpush2.bf16.msra.mxu1 %v6604_v45  ;;  %4416 = vmatpush2.bf16.msra.mxu0 %v6478_v48  ;;  %v2732_v45 = vld [vmem:[#allocation6 + $0x138] sm:$0xff]  ;;  %v6550_v48 = vcombine.low %v2863_v42, %v2867_v50  ;;  %v2935_v42 = vld [vmem:[#allocation6 + $0x790] sm:$0xff] }
 0x30d   :  { %4376 = vmatprep.subr.bf16.mxu1 %v6597_v51  ;;  %4417 = vmatprep.subr.bf16.mxu0 %v6471_v36  ;;  %v6424_v51 = vcombine.low %v2736_v7, %v2740_v8  ;;  %v6543_v36 = vcombine.high %v2855_v23, %v2859_v43  ;;  %v6417_v53 = vcombine.high %v2728_v44, %v2732_v45  ;;  %v2939_v50 = vld [vmem:[#allocation6 + $0x7b0] sm:$0xff]  ;;  %v2808_v7 = vld [vmem:[#allocation6 + $0x398] sm:$0xff] }
 0x30e   :  { %v2812_v8 = vld [vmem:[#allocation6 + $0x3b8] sm:$0xff] }
 0x310   :  { %4377 = vmatpush2.bf16.msra.mxu1 %v6596_v56  ;;  %4418 = vmatpush2.bf16.msra.mxu0 %v6470_v57  ;;  %v6542_v56 = vcombine.low %v2855_v23, %v2859_v43  ;;  %v6416_v57 = vcombine.low %v2728_v44, %v2732_v45  ;;  %v2927_v23 = vld [vmem:[#allocation6 + $0x750] sm:$0xff]  ;;  %v2800_v44 = vld [vmem:[#allocation6 + $0x358] sm:$0xff] }
 0x311   :  { %4378 = vmatprep.subr.bf16.mxu1 %v6589_v58  ;;  %4419 = vmatprep.subr.bf16.mxu0 %v6463_v59  ;;  %v6535_v58 = vcombine.high %v2847_v52, %v2851_v54  ;;  %v2931_v43 = vld [vmem:[#allocation6 + $0x770] sm:$0xff]  ;;  %v2804_v45 = vld [vmem:[#allocation6 + $0x378] sm:$0xff] }
 0x314   :  { %4379 = vmatpush2.bf16.msra.mxu1 %v6588_v1  ;;  %4420 = vmatpush2.bf16.msra.mxu0 %v6462_v2  ;;  %v6534_v1 = vcombine.low %v2847_v52, %v2851_v54  ;;  %v2919_v52 = vld [vmem:[#allocation6 + $0x710] sm:$0xff] }
 0x315   :  { %4380 = vmatprep.subr.bf16.mxu1 %v6581_v3  ;;  %4421 = vmatprep.subr.bf16.mxu0 %v6455_v4  ;;  %v6527_v3 = vcombine.high %v2839_v60, %v2843_v61  ;;  %v6401_v4 = vcombine.high %v2712_v62, %v2716_v63  ;;  %v2923_v54 = vld [vmem:[#allocation6 + $0x730] sm:$0xff] }
 0x318   :  { %4381 = vmatpush2.bf16.msra.mxu1 %v6580_v18  ;;  %4422 = vmatpush2.bf16.msra.mxu0 %v6454_v19  ;;  %v6526_v18 = vcombine.low %v2839_v60, %v2843_v61  ;;  %v6400_v19 = vcombine.low %v2712_v62, %v2716_v63  ;;  %v2911_v60 = vld [vmem:[#allocation6 + $0x6d0] sm:$0xff]  ;;  %v2784_v62 = vld [vmem:[#allocation6 + $0x2d8] sm:$0xff] }
 0x319   :  { %4382 = vmatprep.subr.bf16.mxu1 %v6573_v30  ;;  %4423 = vmatprep.subr.bf16.mxu0 %v6447_v20  ;;  %v6519_v30 = vcombine.high %v2831_v5, %v2835_v9  ;;  %v6393_v20 = vcombine.high %v2704_v17, %v2708_v15  ;;  %v2915_v61 = vld [vmem:[#allocation6 + $0x6f0] sm:$0xff]  ;;  %v2788_v63 = vld [vmem:[#allocation6 + $0x2f8] sm:$0xff] }
 0x31c   :  { %4383 = vmatpush2.bf16.msra.mxu1 %v6572_v33  ;;  %4424 = vmatpush2.bf16.msra.mxu0 %v6446_v34  ;;  %v6518_v33 = vcombine.low %v2831_v5, %v2835_v9  ;;  %v6392_v34 = vcombine.low %v2704_v17, %v2708_v15  ;;  %v2903_v5 = vld [vmem:[#allocation6 + $0x690] sm:$0xff]  ;;  %v2776_v17 = vld [vmem:[#allocation6 + $0x298] sm:$0xff] }
 0x31d   :  { %4434 = vmatprep.subr.bf16.mxu1 %v6567_v35  ;;  %4475 = vmatprep.subr.bf16.mxu0 %v6441_v37  ;;  %v6511_v35 = vcombine.high %v2823_v21, %v2827_v22  ;;  %v6385_v37 = vcombine.high %v2696_v31, %v2700_v24  ;;  %v2907_v9 = vld [vmem:[#allocation6 + $0x6b0] sm:$0xff]  ;;  %v2780_v15 = vld [vmem:[#allocation6 + $0x2b8] sm:$0xff] }
 0x31f   :  { %4385 = vmatmul.mubr.bf16.vlgmr.msra.gmra.mxu1 %v7477_v16  ;;  %4426 = vmatmul.mubr.bf16.vlgmr.msra.gmra.mxu0 %v7457_v26 }
 0x320   :  { %4435 = vmatpush1.bf16.msra.mxu1 %v6566_v47  ;;  %4466 = vmatprep.mubr.bf16.mxu1 %v7475_v14  ;;  %v6510_v47 = vcombine.low %v2823_v21, %v2827_v22  ;;  %v2895_v21 = vld [vmem:[#allocation6 + $0x650] sm:$0xff] }
 0x321   :  { %4476 = vmatpush1.bf16.msra.mxu0 %v6440_v49  ;;  %4507 = vmatprep.mubr.bf16.mxu0 %v7455_v32  ;;  %v2720_v32 = vld [vmem:[#allocation6 + $0xd8] sm:$0xff]  ;;  %v6384_v49 = vcombine.low %v2696_v31, %v2700_v24  ;;  %v2899_v22 = vld [vmem:[#allocation6 + $0x670] sm:$0xff] }
 0x322   :  { %4436 = vmatprep.subr.bf16.mxu1 %v6559_v41  ;;  %4477 = vmatprep.subr.bf16.mxu0 %v6433_v0  ;;  %v6409_v59 = vcombine.high %v2720_v32, %v2724_v55  ;;  %v6408_v2 = vcombine.low %v2720_v32, %v2724_v55  ;;  %v6631_v41 = vcombine.high %v2943_v38, %v2947_v39  ;;  %v2792_v32 = vld [vmem:[#allocation6 + $0x318] sm:$0xff] }
 0x323   :  { %v6505_v0 = vcombine.high %v2816_v40, %v2820_v46  ;;  %v2796_v55 = vld [vmem:[#allocation6 + $0x338] sm:$0xff] }
 0x324   :  { %4437 = vmatpush1.bf16.msra.mxu1 %v6558_v10  ;;  %v6630_v10 = vcombine.low %v2943_v38, %v2947_v39  ;;  %v2768_v31 = vld [vmem:[#allocation6 + $0x258] sm:$0xff]  ;;  %v2887_v38 = vld [vmem:[#allocation6 + $0x610] sm:$0xff] }
 0x325   :  { %4478 = vmatpush1.bf16.msra.mxu0 %v6432_v12  ;;  %4438 = vmatprep.subr.bf16.mxu1 %v6551_v6  ;;  %v6504_v12 = vcombine.low %v2816_v40, %v2820_v46  ;;  %v6623_v6 = vcombine.high %v2935_v42, %v2939_v50  ;;  %v2772_v24 = vld [vmem:[#allocation6 + $0x278] sm:$0xff]  ;;  %v2891_v39 = vld [vmem:[#allocation6 + $0x630] sm:$0xff] }
 0x326   :  { %4479 = vmatprep.subr.bf16.mxu0 %v6425_v11  ;;  %v6497_v11 = vcombine.high %v2808_v7, %v2812_v8  ;;  %v2760_v40 = vld [vmem:[#allocation6 + $0x218] sm:$0xff] }
 0x327   :  { %v2764_v46 = vld [vmem:[#allocation6 + $0x238] sm:$0xff] }
 0x328   :  { %4439 = vmatpush1.bf16.msra.mxu1 %v6550_v48  ;;  %v6622_v48 = vcombine.low %v2935_v42, %v2939_v50  ;;  %v2880_v42 = vld [vmem:[#allocation6 + $0x5d8] sm:$0xff] }
 0x329   :  { %4480 = vmatpush1.bf16.msra.mxu0 %v6424_v51  ;;  %4440 = vmatprep.subr.bf16.mxu1 %v6543_v36  ;;  %v6496_v51 = vcombine.low %v2808_v7, %v2812_v8  ;;  %v6615_v36 = vcombine.high %v2927_v23, %v2931_v43  ;;  %v2884_v50 = vld [vmem:[#allocation6 + $0x5f8] sm:$0xff]  ;;  %v6574_v7 = vcombine.low %v2887_v38, %v2891_v39 }
 0x32a   :  { %4481 = vmatprep.subr.bf16.mxu0 %v6417_v53  ;;  %v6489_v53 = vcombine.high %v2800_v44, %v2804_v45  ;;  %v6448_v8 = vcombine.low %v2760_v40, %v2764_v46 }
 0x32c   :  { %4441 = vmatpush1.bf16.msra.mxu1 %v6542_v56  ;;  %v6614_v56 = vcombine.low %v2927_v23, %v2931_v43  ;;  %v2864_v43 = vld [vmem:[#allocation6 + $0x558] sm:$0xff] }
 0x32d   :  { %4482 = vmatpush1.bf16.msra.mxu0 %v6416_v57  ;;  %4442 = vmatprep.subr.bf16.mxu1 %v6535_v58  ;;  %v6488_v57 = vcombine.low %v2800_v44, %v2804_v45  ;;  %v6607_v58 = vcombine.high %v2919_v52, %v2923_v54  ;;  %v2868_v44 = vld [vmem:[#allocation6 + $0x578] sm:$0xff] }
 0x32e   :  { %4483 = vmatprep.subr.bf16.mxu0 %v6409_v59  ;;  %v6481_v59 = vcombine.high %v2792_v32, %v2796_v55 }
 0x330   :  { %4443 = vmatpush1.bf16.msra.mxu1 %v6534_v1  ;;  %v6606_v1 = vcombine.low %v2919_v52, %v2923_v54  ;;  %v2860_v52 = vld [vmem:[#allocation6 + $0x538] sm:$0xff] }
 0x331   :  { %4484 = vmatpush1.bf16.msra.mxu0 %v6408_v2  ;;  %4444 = vmatprep.subr.bf16.mxu1 %v6527_v3  ;;  %v6480_v2 = vcombine.low %v2792_v32, %v2796_v55  ;;  %v6599_v3 = vcombine.high %v2911_v60, %v2915_v61  ;;  %v6552_v32 = vcombine.low %v2864_v43, %v2868_v44 }
 0x332   :  { %4485 = vmatprep.subr.bf16.mxu0 %v6401_v4  ;;  %v6473_v4 = vcombine.high %v2784_v62, %v2788_v63 }
 0x334   :  { %4445 = vmatpush1.bf16.msra.mxu1 %v6526_v18  ;;  %v6598_v18 = vcombine.low %v2911_v60, %v2915_v61  ;;  %v6887_v60 = vld [vmem:[#allocation7 + $0xe4] ss:$16 sps:$4 sm:$0xff]  }
 0x335   :  { %4486 = vmatpush1.bf16.msra.mxu0 %v6400_v19  ;;  %4446 = vmatprep.subr.bf16.mxu1 %v6519_v30  ;;  %v6472_v19 = vcombine.low %v2784_v62, %v2788_v63  ;;  %v6591_v30 = vcombine.high %v2903_v5, %v2907_v9  ;;  %v6890_v61 = vld [vmem:[#allocation7 + $0xc4] ss:$16 sps:$4 sm:$0xff]   ;;  %v2840_v62 = vld [vmem:[#allocation6 + $0x498] sm:$0xff] }
 0x336   :  { %4487 = vmatprep.subr.bf16.mxu0 %v6393_v20  ;;  %v6465_v20 = vcombine.high %v2776_v17, %v2780_v15  ;;  %v2844_v63 = vld [vmem:[#allocation6 + $0x4b8] sm:$0xff] }
 0x338   :  { %4447 = vmatpush1.bf16.msra.mxu1 %v6518_v33  ;;  %v6590_v33 = vcombine.low %v2903_v5, %v2907_v9  ;;  %v2832_v5 = vld [vmem:[#allocation6 + $0x458] sm:$0xff] }
 0x339   :  { %4488 = vmatpush1.bf16.msra.mxu0 %v6392_v34  ;;  %4448 = vmatprep.subr.bf16.mxu1 %v6511_v35  ;;  %v6464_v34 = vcombine.low %v2776_v17, %v2780_v15  ;;  %v6583_v35 = vcombine.high %v2895_v21, %v2899_v22  ;;  %v2836_v9 = vld [vmem:[#allocation6 + $0x478] sm:$0xff]  ;;  %v6891_v17 = vld [vmem:[#allocation7 + $0xa0] ss:$16 sps:$4 sm:$0xff]   ;;  %v6528_v15 = vcombine.low %v2840_v62, %v2844_v63 }
 0x33a   :  { %4489 = vmatprep.subr.bf16.mxu0 %v6385_v37  ;;  %v6457_v37 = vcombine.high %v2768_v31, %v2772_v24 }
 0x33c   :  { %4449 = vmatpush1.bf16.msra.mxu1 %v6510_v47  ;;  %v6582_v47 = vcombine.low %v2895_v21, %v2899_v22  ;;  %v6894_v21 = vld [vmem:[#allocation7 + $0x80] ss:$16 sps:$4 sm:$0xff]   ;;  %v6520_v22 = vcombine.low %v2832_v5, %v2836_v9 }
 0x33d   :  { %4490 = vmatpush1.bf16.msra.mxu0 %v6384_v49  ;;  %4450 = vmatprep.subr.bf16.mxu1 %v6631_v41  ;;  %v6456_v49 = vcombine.low %v2768_v31, %v2772_v24  ;;  %v6575_v41 = vcombine.high %v2887_v38, %v2891_v39  ;;  %v6899_v31 = vld [vmem:[#allocation7 + $0x64] ss:$16 sps:$4 sm:$0xff]  }
 0x33e   :  { %4491 = vmatprep.subr.bf16.mxu0 %v6505_v0  ;;  %v6449_v0 = vcombine.high %v2760_v40, %v2764_v46  ;;  %v6902_v38 = vld [vmem:[#allocation7 + $0x44] ss:$16 sps:$4 sm:$0xff]   ;;  %v2936_v40 = vld [vmem:[#allocation6 + $0x798] sm:$0xff] }
 0x33f   :  { %v2940_v46 = vld [vmem:[#allocation6 + $0x7b8] sm:$0xff] }
 0x340   :  { %4451 = vmatpush2.bf16.msra.mxu1 %v6630_v10  ;;  %v6569_v10 = vcombine.high %v2880_v42, %v2884_v50 }
 0x341   :  { %4492 = vmatpush2.bf16.msra.mxu0 %v6504_v12  ;;  %4452 = vmatprep.subr.bf16.mxu1 %v6623_v6  ;;  %v2872_v12 = vld [vmem:[#allocation6 + $0x598] sm:$0xff] }
 0x342   :  { %4493 = vmatprep.subr.bf16.mxu0 %v6497_v11  ;;  %v2876_v6 = vld [vmem:[#allocation6 + $0x5b8] sm:$0xff]  ;;  %v6568_v11 = vcombine.low %v2880_v42, %v2884_v50 }
 0x343   :  { %v6561_v23 = vcombine.high %v2872_v12, %v2876_v6  ;;  %v2928_v42 = vld [vmem:[#allocation6 + $0x758] sm:$0xff] }
 0x344   :  { %4453 = vmatpush2.bf16.msra.mxu1 %v6622_v48  ;;  %v6560_v48 = vcombine.low %v2872_v12, %v2876_v6  ;;  %v2932_v50 = vld [vmem:[#allocation6 + $0x778] sm:$0xff] }
 0x345   :  { %4494 = vmatpush2.bf16.msra.mxu0 %v6496_v51  ;;  %4454 = vmatprep.subr.bf16.mxu1 %v6615_v36  ;;  %v6553_v36 = vcombine.high %v2864_v43, %v2868_v44  ;;  %v6617_v12 = vcombine.high %v2928_v42, %v2932_v50  ;;  %v2920_v6 = vld [vmem:[#allocation6 + $0x718] sm:$0xff]  ;;  %v6616_v43 = vcombine.low %v2928_v42, %v2932_v50  ;;  %v6911_v44 = vld [vmem:[#allocation7 + $0x1e4] ss:$16 sps:$4 sm:$0xff]   ;;  %v6945_v42 = vld [vmem:[#allocation7 + $0x2a0] ss:$16 sps:$4 sm:$0xff]  }
 0x346   :  { %4495 = vmatprep.subr.bf16.mxu0 %v6489_v53  ;;  %v2856_v53 = vld [vmem:[#allocation6 + $0x518] sm:$0xff]  ;;  %v6947_v50 = vld [vmem:[#allocation7 + $0x2a4] ss:$16 sps:$4 sm:$0xff]  }
 0x348   :  { %4455 = vmatpush2.bf16.msra.mxu1 %v6614_v56  ;;  %v6545_v56 = vcombine.high %v2856_v53, %v2860_v52 }
 0x349   :  { %4496 = vmatpush2.bf16.msra.mxu0 %v6488_v57  ;;  %4456 = vmatprep.subr.bf16.mxu1 %v6607_v58  ;;  %v2848_v57 = vld [vmem:[#allocation6 + $0x4d8] sm:$0xff] }
 0x34a   :  { %4497 = vmatprep.subr.bf16.mxu0 %v6481_v59  ;;  %v2852_v58 = vld [vmem:[#allocation6 + $0x4f8] sm:$0xff]  ;;  %v6885_v59 = vld [vmem:[#allocation7 + $0xe0] ss:$16 sps:$4 sm:$0xff]  }
 0x34c   :  { %4457 = vmatpush2.bf16.msra.mxu1 %v6606_v1  ;;  %v6888_v1 = vld [vmem:[#allocation7 + $0xc0] ss:$16 sps:$4 sm:$0xff]  }
 0x34d   :  { %4498 = vmatpush2.bf16.msra.mxu0 %v6480_v2  ;;  %4458 = vmatprep.subr.bf16.mxu1 %v6599_v3  ;;  %v6536_v2 = vcombine.low %v2848_v57, %v2852_v58  ;;  %v6893_v3 = vld [vmem:[#allocation7 + $0xa4] ss:$16 sps:$4 sm:$0xff]  }
 0x34e   :  { %4499 = vmatprep.subr.bf16.mxu0 %v6473_v4  ;;  %v6529_v4 = vcombine.high %v2840_v62, %v2844_v63  ;;  %v6915_v62 = vld [vmem:[#allocation7 + $0x1a0] ss:$16 sps:$4 sm:$0xff]  }
 0x350   :  { %4459 = vmatpush2.bf16.msra.mxu1 %v6598_v18  ;;  %v6896_v18 = vld [vmem:[#allocation7 + $0x84] ss:$16 sps:$4 sm:$0xff]  }
 0x351   :  { %4500 = vmatpush2.bf16.msra.mxu0 %v6472_v19  ;;  %4460 = vmatprep.subr.bf16.mxu1 %v6591_v30  ;;  %v6521_v19 = vcombine.high %v2832_v5, %v2836_v9  ;;  %v2824_v30 = vld [vmem:[#allocation6 + $0x418] sm:$0xff]  ;;  %v6918_v5 = vld [vmem:[#allocation7 + $0x180] ss:$16 sps:$4 sm:$0xff]  }
 0x352   :  { %4501 = vmatprep.subr.bf16.mxu0 %v6465_v20  ;;  %v2828_v20 = vld [vmem:[#allocation6 + $0x438] sm:$0xff] }
 0x353   :  { %v6513_v24 = vcombine.high %v2824_v30, %v2828_v20 }
 0x354   :  { %4461 = vmatpush2.bf16.msra.mxu1 %v6590_v33  ;;  %v2944_v33 = vld [vmem:[#allocation6 + $0x7d8] sm:$0xff] }
 0x355   :  { %4502 = vmatpush2.bf16.msra.mxu0 %v6464_v34  ;;  %4462 = vmatprep.subr.bf16.mxu1 %v6583_v35  ;;  %v2948_v34 = vld [vmem:[#allocation6 + $0x7f8] sm:$0xff]  ;;  %v6897_v35 = vld [vmem:[#allocation7 + $0x60] ss:$16 sps:$4 sm:$0xff]  }
 0x356   :  { %4503 = vmatprep.subr.bf16.mxu0 %v6457_v37  ;;  %v6512_v37 = vcombine.low %v2824_v30, %v2828_v20  ;;  %v6633_v39 = vcombine.high %v2944_v33, %v2948_v34 }
 0x358   :  { %4463 = vmatpush2.bf16.msra.mxu1 %v6582_v47  ;;  %v6900_v47 = vld [vmem:[#allocation7 + $0x40] ss:$16 sps:$4 sm:$0xff]  }
 0x359   :  { %4504 = vmatpush2.bf16.msra.mxu0 %v6456_v49  ;;  %4464 = vmatprep.subr.bf16.mxu1 %v6575_v41  ;;  %v6632_v49 = vcombine.low %v2944_v33, %v2948_v34  ;;  %v6905_v41 = vld [vmem:[#allocation7 + $0x24] ss:$16 sps:$4 sm:$0xff]   ;;  %v6924_v34 = vld [vmem:[#allocation7 + $0x140] ss:$16 sps:$4 sm:$0xff]  }
 0x35a   :  { %4505 = vmatprep.subr.bf16.mxu0 %v6449_v0  ;;  %v6625_v0 = vcombine.high %v2936_v40, %v2940_v46 }
 0x35c   :  { %4465 = vmatpush2.bf16.msra.mxu1 %v6574_v7  ;;  %v6903_v7 = vld [vmem:[#allocation7 + $0x20] ss:$16 sps:$4 sm:$0xff]  }
 0x35d   :  { %4506 = vmatpush2.bf16.msra.mxu0 %v6448_v8  ;;  %4516 = vmatprep.subr.bf16.mxu1 %v6569_v10  ;;  %v6624_v8 = vcombine.low %v2936_v40, %v2940_v46  ;;  %v6908_v10 = vld [vmem:[#allocation7 + $0x4] ss:$16 sps:$4 sm:$0xff]  }
 0x35e   :  { %5401 = vmatprep.subr.bf16.mxu0 %v6887_v60  ;;  %v6929_v40 = vld [vmem:[#allocation7 + $0x124] ss:$16 sps:$4 sm:$0xff]  }
 0x35f   :  { %4467 = vmatmul.mubr.bf16.vlgmr.msra.gmra.mxu1 %v7477_v16  ;;  %v7492_v45 = vpop.f32.mrf.mxu0  ;;  %v6932_v46 = vld [vmem:[#allocation7 + $0x104] ss:$16 sps:$4 sm:$0xff]  }
 0x360   :  { %4508 = vmatmul.mubr.bf16.vlgmr.msra.gmra.mxu0 %v7457_v26  ;;  %4517 = vmatpush1.bf16.msra.mxu1 %v6568_v11  ;;  %v6544_v26 = vcombine.low %v2856_v53, %v2860_v52  ;;  %v2924_v11 = vld [vmem:[#allocation6 + $0x738] sm:$0xff]  ;;  %v6909_v52 = vld [vmem:[#allocation7 + $0x1e0] ss:$16 sps:$4 sm:$0xff]  }
 0x361   :  { %4548 = vmatprep.mubr.bf16.mxu1 %v7475_v14  ;;  %v7496_v51 = vpop.f32.mrf.mxu0  ;;  %4518 = vmatprep.subr.bf16.mxu1 %v6561_v23  ;;  %v6537_v14 = vcombine.high %v2848_v57, %v2852_v58  ;;  %v6906_v23 = vld [vmem:[#allocation7] ss:$16 sps:$4 sm:$0xff]   ;;  %v2916_v53 = vld [vmem:[#allocation6 + $0x6f8] sm:$0xff] }
 0x362   :  { %5402 = vmatpush1.bf16.msra.mxu0 %v6885_v59  ;;  %v2908_v57 = vld [vmem:[#allocation6 + $0x6b8] sm:$0xff]  ;;  %v6912_v58 = vld [vmem:[#allocation7 + $0x1c0] ss:$16 sps:$4 sm:$0xff]   ;;  %v6917_v59 = vld [vmem:[#allocation7 + $0x1a4] ss:$16 sps:$4 sm:$0xff]  }
 0x363   :  { %v4267_v54 = vpop.f32.mrf.mxu0  ;;  %5403 = vmatprep.subr.bf16.mxu0 %v6890_v61  ;;  %v2900_v61 = vld [vmem:[#allocation6 + $0x678] sm:$0xff] }
 0x364   :  { %4519 = vmatpush1.bf16.msra.mxu1 %v6560_v48  ;;  %v6609_v48 = vcombine.high %v2920_v6, %v2924_v11  ;;  %v6608_v54 = vcombine.low %v2920_v6, %v2924_v11  ;;  %v6963_v6 = vld [vmem:[#allocation7 + $0x240] ss:$16 sps:$4 sm:$0xff]   ;;  %v6965_v11 = vld [vmem:[#allocation7 + $0x244] ss:$16 sps:$4 sm:$0xff]  }
 0x365   :  { %v4268_v55 = vpop.f32.mrf.mxu0  ;;  %4520 = vmatprep.subr.bf16.mxu1 %v6553_v36  ;;  %v2912_v36 = vld [vmem:[#allocation6 + $0x6d8] sm:$0xff] }
 0x366   :  { %5404 = vmatpush1.bf16.msra.mxu0 %v6888_v1  ;;  %v6601_v55 = vcombine.high %v2912_v36, %v2916_v53  ;;  %v6920_v1 = vld [vmem:[#allocation7 + $0x184] ss:$16 sps:$4 sm:$0xff]  }
 0x367   :  { %5405 = vmatprep.subr.bf16.mxu0 %v6893_v3  ;;  %v2888_v3 = vld [vmem:[#allocation6 + $0x618] sm:$0xff] }
 0x368   :  { %4521 = vmatpush1.bf16.msra.mxu1 %v6552_v32  ;;  %v6914_v32 = vld [vmem:[#allocation7 + $0x1c4] ss:$16 sps:$4 sm:$0xff]  }
 0x369   :  { %4522 = vmatprep.subr.bf16.mxu1 %v6545_v56  ;;  %v2904_v56 = vld [vmem:[#allocation6 + $0x698] sm:$0xff] }
 0x36a   :  { %5406 = vmatpush1.bf16.msra.mxu0 %v6891_v17  ;;  %v6593_v60 = vcombine.high %v2904_v56, %v2908_v57  ;;  %v6592_v63 = vcombine.low %v2904_v56, %v2908_v57  ;;  %v6923_v17 = vld [vmem:[#allocation7 + $0x164] ss:$16 sps:$4 sm:$0xff]   ;;  %v6999_v56 = vld [vmem:[#allocation7 + $0x380] ss:$16 sps:$4 sm:$0xff]  }
 0x36b   :  { %5407 = vmatprep.subr.bf16.mxu0 %v6896_v18  ;;  %v6921_v18 = vld [vmem:[#allocation7 + $0x160] ss:$16 sps:$4 sm:$0xff]   ;;  %v7001_v57 = vld [vmem:[#allocation7 + $0x384] ss:$16 sps:$4 sm:$0xff]  }
 0x36c   :  { %4523 = vmatpush1.bf16.msra.mxu1 %v6544_v26  ;;  %v6600_v26 = vcombine.low %v2912_v36, %v2916_v53  ;;  %v6981_v36 = vld [vmem:[#allocation7 + $0x3e0] ss:$16 sps:$4 sm:$0xff]   ;;  %v6983_v53 = vld [vmem:[#allocation7 + $0x3e4] ss:$16 sps:$4 sm:$0xff]  }
 0x36d   :  { %4524 = vmatprep.subr.bf16.mxu1 %v6537_v14  ;;  %v2896_v14 = vld [vmem:[#allocation6 + $0x658] sm:$0xff] }
 0x36e   :  { %5408 = vmatpush1.bf16.msra.mxu0 %v6894_v21  ;;  %v6584_v9 = vcombine.low %v2896_v14, %v2900_v61 }
 0x36f   :  { %5409 = vmatprep.subr.bf16.mxu0 %v6899_v31 }
 0x370   :  { %4525 = vmatpush1.bf16.msra.mxu1 %v6536_v2  ;;  %v6585_v2 = vcombine.high %v2896_v14, %v2900_v61 }
 0x371   :  { %4526 = vmatprep.subr.bf16.mxu1 %v6529_v4  ;;  %v2892_v4 = vld [vmem:[#allocation6 + $0x638] sm:$0xff] }
 0x372   :  { %5410 = vmatpush1.bf16.msra.mxu0 %v6897_v35 }
 0x373   :  { %5411 = vmatprep.subr.bf16.mxu0 %v6902_v38 }
 0x374   :  { %4527 = vmatpush1.bf16.msra.mxu1 %v6528_v15  ;;  %v6577_v15 = vcombine.high %v2888_v3, %v2892_v4 }
 0x375   :  { %4528 = vmatprep.subr.bf16.mxu1 %v6521_v19  ;;  %v6576_v19 = vcombine.low %v2888_v3, %v2892_v4 }
 0x376   :  { %5412 = vmatpush1.bf16.msra.mxu0 %v6900_v47  ;;  %v6935_v47 = vld [vmem:[#allocation7 + $0x2e4] ss:$16 sps:$4 sm:$0xff]  }
 0x377   :  { %5413 = vmatprep.subr.bf16.mxu0 %v6905_v41  ;;  %v6933_v41 = vld [vmem:[#allocation7 + $0x2e0] ss:$16 sps:$4 sm:$0xff]  }
 0x378   :  { %4529 = vmatpush1.bf16.msra.mxu1 %v6520_v22 }
 0x379   :  { %4530 = vmatprep.subr.bf16.mxu1 %v6513_v24  ;;  %v6926_v24 = vld [vmem:[#allocation7 + $0x144] ss:$16 sps:$4 sm:$0xff]  }
 0x37a   :  { %5414 = vmatpush1.bf16.msra.mxu0 %v6903_v7  ;;  %v6951_v7 = vld [vmem:[#allocation7 + $0x280] ss:$16 sps:$4 sm:$0xff]  }
 0x37b   :  { %5415 = vmatprep.subr.bf16.mxu0 %v6908_v10  ;;  %v6957_v10 = vld [vmem:[#allocation7 + $0x260] ss:$16 sps:$4 sm:$0xff]  }
 0x37c   :  { %4531 = vmatpush1.bf16.msra.mxu1 %v6512_v37 }
 0x37d   :  { %4532 = vmatprep.subr.bf16.mxu1 %v6633_v39 }
 0x37e   :  { %5416 = vmatpush1.bf16.msra.mxu0 %v6906_v23  ;;  %v6969_v23 = vld [vmem:[#allocation7 + $0x220] ss:$16 sps:$4 sm:$0xff]  }
 0x37f   :  { %5417 = vmatprep.subr.bf16.mxu0 %v6911_v44  ;;  %v6975_v44 = vld [vmem:[#allocation7 + $0x200] ss:$16 sps:$4 sm:$0xff]  }
 0x380   :  { %4533 = vmatpush2.bf16.msra.mxu1 %v6632_v49  ;;  %v6938_v49 = vld [vmem:[#allocation7 + $0xec] ss:$16 sps:$4 sm:$0xff]  }
 0x381   :  { %4534 = vmatprep.subr.bf16.mxu1 %v6625_v0  ;;  %v6941_v0 = vld [vmem:[#allocation7 + $0x2c4] ss:$16 sps:$4 sm:$0xff]  }
 0x382   :  { %5418 = vmatpush2.bf16.msra.mxu0 %v6909_v52  ;;  %v6987_v52 = vld [vmem:[#allocation7 + $0x3c0] ss:$16 sps:$4 sm:$0xff]  }
 0x383   :  { %5419 = vmatprep.subr.bf16.mxu0 %v6914_v32  ;;  %v6993_v32 = vld [vmem:[#allocation7 + $0x3a0] ss:$16 sps:$4 sm:$0xff]  }
 0x384   :  { %4535 = vmatpush2.bf16.msra.mxu1 %v6624_v8  ;;  %v6953_v8 = vld [vmem:[#allocation7 + $0x284] ss:$16 sps:$4 sm:$0xff]  }
 0x385   :  { %4536 = vmatprep.subr.bf16.mxu1 %v6617_v12  ;;  %v6959_v12 = vld [vmem:[#allocation7 + $0x264] ss:$16 sps:$4 sm:$0xff]  }
 0x386   :  { %5420 = vmatpush2.bf16.msra.mxu0 %v6912_v58  ;;  %v7005_v58 = vld [vmem:[#allocation7 + $0x360] ss:$16 sps:$4 sm:$0xff]  }
 0x387   :  { %5421 = vmatprep.subr.bf16.mxu0 %v6917_v59 }
 0x388   :  { %4537 = vmatpush2.bf16.msra.mxu1 %v6616_v43  ;;  %v6971_v43 = vld [vmem:[#allocation7 + $0x224] ss:$16 sps:$4 sm:$0xff]  }
 0x389   :  { %4538 = vmatprep.subr.bf16.mxu1 %v6609_v48  ;;  %v6977_v48 = vld [vmem:[#allocation7 + $0x204] ss:$16 sps:$4 sm:$0xff]  }
 0x38a   :  { %5422 = vmatpush2.bf16.msra.mxu0 %v6915_v62 }
 0x38b   :  { %5423 = vmatprep.subr.bf16.mxu0 %v6920_v1 }
 0x38c   :  { %4539 = vmatpush2.bf16.msra.mxu1 %v6608_v54  ;;  %v6989_v54 = vld [vmem:[#allocation7 + $0x3c4] ss:$16 sps:$4 sm:$0xff]  }
 0x38d   :  { %4540 = vmatprep.subr.bf16.mxu1 %v6601_v55  ;;  %v6995_v55 = vld [vmem:[#allocation7 + $0x3a4] ss:$16 sps:$4 sm:$0xff]  }
 0x38e   :  { %5424 = vmatpush2.bf16.msra.mxu0 %v6918_v5 }
 0x38f   :  { %5425 = vmatprep.subr.bf16.mxu0 %v6923_v17  ;;  %v7019_v17 = vld [vmem:[#allocation7 + $0x324] ss:$16 sps:$4 sm:$0xff]  }
 0x390   :  { %4541 = vmatpush2.bf16.msra.mxu1 %v6600_v26  ;;  %v7007_v26 = vld [vmem:[#allocation7 + $0x364] ss:$16 sps:$4 sm:$0xff]  }
 0x391   :  { %4542 = vmatprep.subr.bf16.mxu1 %v6593_v60 }
 0x392   :  { %5426 = vmatpush2.bf16.msra.mxu0 %v6921_v18  ;;  %v7023_v18 = vld [vmem:[#allocation7 + $0x300] ss:$16 sps:$4 sm:$0xff]  }
 0x393   :  { %5427 = vmatprep.subr.bf16.mxu0 %v6926_v24 }
 0x394   :  { %4543 = vmatpush2.bf16.msra.mxu1 %v6592_v63  ;;  %v7013_v63 = vld [vmem:[#allocation7 + $0x344] ss:$16 sps:$4 sm:$0xff]  }
 0x395   :  { %4544 = vmatprep.subr.bf16.mxu1 %v6585_v2  ;;  %v7011_v2 = vld [vmem:[#allocation7 + $0x340] ss:$16 sps:$4 sm:$0xff]  }
 0x396   :  { %5428 = vmatpush2.bf16.msra.mxu0 %v6924_v34 }
 0x397   :  { %5429 = vmatprep.subr.bf16.mxu0 %v6929_v40 }
 0x398   :  { %4545 = vmatpush2.bf16.msra.mxu1 %v6584_v9 }
 0x399   :  { %4546 = vmatprep.subr.bf16.mxu1 %v6577_v15  ;;  %v7017_v15 = vld [vmem:[#allocation7 + $0x320] ss:$16 sps:$4 sm:$0xff]  }
 0x39c   :  { %4547 = vmatpush2.bf16.msra.mxu1 %v6576_v19  ;;  %v7025_v19 = vld [vmem:[#allocation7 + $0x304] ss:$16 sps:$4 sm:$0xff]  }
 0x39d   :  { %5442 = vmatprep.subr.bf16.mxu1 %v6935_v47 }
 0x39f   :  { %v7498_v30 = vpop.f32.mrf.mxu0  ;;  %4549 = vmatmul.mubr.bf16.vlgmr.msra.gmra.mxu1 %v7477_v16  ;;  %v4304_v20 = vpop.f32.mrf.mxu1  ;;  %v6927_v16 = vld [vmem:[#allocation7 + $0x120] ss:$16 sps:$4 sm:$0xff]  }
 0x3a0   :  { %v7502_v21 = vadd.f32 %v4304_v20, %v7492_v45  ;;  %5430 = vmatpush2.bf16.msra.mxu0 %v6927_v16  ;;  %v6930_v45 = vld [vmem:[#allocation7 + $0x100] ss:$16 sps:$4 sm:$0xff]   ;;  %5443 = vmatpush1.bf16.msra.mxu1 %v6933_v41 }
 0x3a1   :  { %v7504_v22 = vpop.f32.mrf.mxu0  ;;  %v4306_v31 = vpop.f32.mrf.mxu1  ;;  %5431 = vmatprep.subr.bf16.mxu0 %v6932_v46  ;;  %5444 = vmatprep.subr.bf16.mxu1 %v6941_v0  ;;  %v7518_v20 = vld [vmem:[%s7702_s8] sm:$0xf] }
 0x3a2   :  { %v7507_v33 = vadd.f32 %v4306_v31, %v7496_v51  ;;  %v6939_v51 = vld [vmem:[#allocation7 + $0x2c0] ss:$16 sps:$4 sm:$0xff]   ;;  %v4567_v24 = vrot.slane %v7518_v20, %v7366_v28 }
 0x3a3   :  { %v4349_v35 = vpop.f32.mrf.mxu0  ;;  %v4308_v37 = vpop.f32.mrf.mxu1  ;;  %v7525_v31 = vld [vmem:[%s7703_s9] sm:$0xf] }
 0x3a4   :  { %5432 = vmatpush2.bf16.msra.mxu0 %v6930_v45  ;;  %5445 = vmatpush1.bf16.msra.mxu1 %v6939_v51  ;;  %v4588_v35 = vrot.slane %v7525_v31, %v7359_v25 }
 0x3a5   :  { %v4350_v38 = vpop.f32.mrf.mxu0  ;;  %v4309_v39 = vpop.f32.mrf.mxu1  ;;  %5483 = vmatprep.subr.bf16.mxu0 %v6938_v49  ;;  %5446 = vmatprep.subr.bf16.mxu1 %v6947_v50 }
 0x3a6   :  { %v4581_v38 = vmul.f32 %v4567_v24, %v7507_v33  ;;  %v4592_v39 = vrot.slane %v7525_v31, %v7366_v28 }
 0x3a8   :  { %5447 = vmatpush1.bf16.msra.mxu1 %v6945_v42 }
 0x3a9   :  { %5448 = vmatprep.subr.bf16.mxu1 %v6953_v8 }
 0x3ac   :  { %5449 = vmatpush1.bf16.msra.mxu1 %v6951_v7 }
 0x3ad   :  { %5450 = vmatprep.subr.bf16.mxu1 %v6959_v12 }
 0x3b0   :  { %5451 = vmatpush1.bf16.msra.mxu1 %v6957_v10 }
 0x3b1   :  { %5452 = vmatprep.subr.bf16.mxu1 %v6965_v11 }
 0x3b4   :  { %5453 = vmatpush1.bf16.msra.mxu1 %v6963_v6 }
 0x3b5   :  { %5454 = vmatprep.subr.bf16.mxu1 %v6971_v43 }
 0x3b8   :  { %5455 = vmatpush1.bf16.msra.mxu1 %v6969_v23 }
 0x3b9   :  { %5456 = vmatprep.subr.bf16.mxu1 %v6977_v48  ;;  %v6936_v48 = vld [vmem:[#allocation7 + $0xe8] ss:$16 sps:$4 sm:$0xff]  }
 0x3bc   :  { %5457 = vmatpush1.bf16.msra.mxu1 %v6975_v44 }
 0x3bd   :  { %5458 = vmatprep.subr.bf16.mxu1 %v6983_v53  ;;  %v6944_v53 = vld [vmem:[#allocation7 + $0xcc] ss:$16 sps:$4 sm:$0xff]  }
 0x3c0   :  { %5459 = vmatpush2.bf16.msra.mxu1 %v6981_v36 }
 0x3c1   :  { %5460 = vmatprep.subr.bf16.mxu1 %v6989_v54  ;;  %v6950_v54 = vld [vmem:[#allocation7 + $0xac] ss:$16 sps:$4 sm:$0xff]  }
 0x3c4   :  { %5461 = vmatpush2.bf16.msra.mxu1 %v6987_v52  ;;  %v6942_v52 = vld [vmem:[#allocation7 + $0xc8] ss:$16 sps:$4 sm:$0xff]  }
 0x3c5   :  { %5462 = vmatprep.subr.bf16.mxu1 %v6995_v55  ;;  %v6956_v55 = vld [vmem:[#allocation7 + $0x8c] ss:$16 sps:$4 sm:$0xff]  }
 0x3c8   :  { %5463 = vmatpush2.bf16.msra.mxu1 %v6993_v32  ;;  %v6948_v32 = vld [vmem:[#allocation7 + $0xa8] ss:$16 sps:$4 sm:$0xff]  }
 0x3c9   :  { %5464 = vmatprep.subr.bf16.mxu1 %v7001_v57  ;;  %v6962_v57 = vld [vmem:[#allocation7 + $0x6c] ss:$16 sps:$4 sm:$0xff]  }
 0x3cc   :  { %5465 = vmatpush2.bf16.msra.mxu1 %v6999_v56  ;;  %v6954_v56 = vld [vmem:[#allocation7 + $0x88] ss:$16 sps:$4 sm:$0xff]  }
 0x3cd   :  { %5466 = vmatprep.subr.bf16.mxu1 %v7007_v26  ;;  %v6968_v26 = vld [vmem:[#allocation7 + $0x4c] ss:$16 sps:$4 sm:$0xff]  }
 0x3d0   :  { %5467 = vmatpush2.bf16.msra.mxu1 %v7005_v58  ;;  %v6960_v58 = vld [vmem:[#allocation7 + $0x68] ss:$16 sps:$4 sm:$0xff]  }
 0x3d1   :  { %5468 = vmatprep.subr.bf16.mxu1 %v7013_v63  ;;  %v6978_v63 = vld [vmem:[#allocation7 + $0x8] ss:$16 sps:$4 sm:$0xff]  }
 0x3d4   :  { %5469 = vmatpush2.bf16.msra.mxu1 %v7011_v2  ;;  %v6986_v2 = vld [vmem:[#allocation7 + $0x1ec] ss:$16 sps:$4 sm:$0xff]  }
 0x3d5   :  { %5470 = vmatprep.subr.bf16.mxu1 %v7019_v17  ;;  %v6996_v17 = vld [vmem:[#allocation7 + $0x1a8] ss:$16 sps:$4 sm:$0xff]  }
 0x3d8   :  { %5471 = vmatpush2.bf16.msra.mxu1 %v7017_v15  ;;  %v7004_v15 = vld [vmem:[#allocation7 + $0x18c] ss:$16 sps:$4 sm:$0xff]  }
 0x3d9   :  { %5472 = vmatprep.subr.bf16.mxu1 %v7025_v19  ;;  %v7010_v19 = vld [vmem:[#allocation7 + $0x16c] ss:$16 sps:$4 sm:$0xff]  }
 0x3dc   :  { %5473 = vmatpush2.bf16.msra.mxu1 %v7023_v18  ;;  %v7002_v18 = vld [vmem:[#allocation7 + $0x188] ss:$16 sps:$4 sm:$0xff]  }
 0x3df   :  { %v4386_v59 = vpop.f32.mrf.mxu1  ;;  %v4427_v60 = vpop.f32.mrf.mxu0 }
 0x3e0   :  { %v7510_v14 = vadd.f32 %v4386_v59, %v7498_v30  ;;  %v7031_v30 = vld [vmem:[#allocation7 + $0x2ec] ss:$16 sps:$4 sm:$0xff]   ;;  %v6966_v59 = vld [vmem:[#allocation7 + $0x48] ss:$16 sps:$4 sm:$0xff]  }
 0x3e1   :  { %v4388_v61 = vpop.f32.mrf.mxu1  ;;  %v4429_v62 = vpop.f32.mrf.mxu0  ;;  %5524 = vmatprep.subr.bf16.mxu1 %v7031_v30  ;;  %v4571_v30 = vrot.slane %v7518_v20, %v7364_v27 }
 0x3e2   :  { %v7513_v1 = vadd.f32 %v4388_v61, %v7504_v22  ;;  %v4563_v22 = vrot.slane %v7518_v20, %v7359_v25  ;;  %v6972_v61 = vld [vmem:[#allocation7 + $0x28] ss:$16 sps:$4 sm:$0xff]  }
 0x3e3   :  { %v4390_v3 = vpop.f32.mrf.mxu1  ;;  %v4431_v4 = vpop.f32.mrf.mxu0 }
 0x3e4   :  { %v4580_v34 = vmul.f32 %v4563_v22, %v7502_v21  ;;  %v4606_v21 = vadd.f32 %v4592_v39, %v4581_v38  ;;  %v6984_v3 = vld [vmem:[#allocation7 + $0x1e8] ss:$16 sps:$4 sm:$0xff]   ;;  %v6992_v4 = vld [vmem:[#allocation7 + $0x1cc] ss:$16 sps:$4 sm:$0xff]  }
 0x3e5   :  { %v4391_v5 = vpop.f32.mrf.mxu1  ;;  %v4432_v9 = vpop.f32.mrf.mxu0 }
 0x3e6   :  { %v4605_v46 = vadd.f32 %v4588_v35, %v4580_v34  ;;  %v4610_v6 = vmax.f32 %v4606_v21, 0.0  ;;  %v6990_v5 = vld [vmem:[#allocation7 + $0x1c8] ss:$16 sps:$4 sm:$0xff]   ;;  %v6998_v9 = vld [vmem:[#allocation7 + $0x1ac] ss:$16 sps:$4 sm:$0xff]  }
 0x3e7   :  { %v7016_v34 = vld [vmem:[#allocation7 + $0x14c] ss:$16 sps:$4 sm:$0xff]  }
 0x3e8   :  { %v4609_v8 = vmax.f32 %v4605_v46, 0.0  ;;  %v7014_v46 = vld [vmem:[#allocation7 + $0x148] ss:$16 sps:$4 sm:$0xff]  }
 0x41f   :  { %v4468_v37 = vpop.f32.mrf.mxu1 }
 0x420   :  { %v4469_v40 = vadd.f32 %v4468_v37, %v4427_v60  ;;  %v7535_v16 = vpop.f32.mrf.mxu0  ;;  %v6974_v60 = vld [vmem:[#allocation7 + $0x2c] ss:$16 sps:$4 sm:$0xff]   ;;  %v4596_v37 = vrot.slane %v7525_v31, %v7364_v27 }
 0x421   :  { %v4470_v45 = vpop.f32.mrf.mxu1 }
 0x422   :  { %v4613_v47 = vmul.f32 %v4563_v22, %v4469_v40  ;;  %v4471_v49 = vadd.f32 %v4470_v45, %v4429_v62  ;;  %v7537_v41 = vpop.f32.mrf.mxu0  ;;  %v6980_v62 = vld [vmem:[#allocation7 + $0xc] ss:$16 sps:$4 sm:$0xff]   ;;  %v4575_v22 = vrot.slane %v7518_v20, %v7368_v29  ;;  %v4600_v40 = vrot.slane %v7525_v31, %v7368_v29 }
 0x423   :  { %v4472_v51 = vpop.f32.mrf.mxu1  ;;  %v7028_v29 = vld [vmem:[#allocation7 + $0x10c] ss:$16 sps:$4 sm:$0xff]  }
 0x424   :  { %v4617_v0 = vadd.f32 %v4613_v47, %v4588_v35  ;;  %v4614_v42 = vmul.f32 %v4567_v24, %v4471_v49  ;;  %v4513_v50 = vpop.f32.mrf.mxu0  ;;  %v7008_v24 = vld [vmem:[#allocation7 + $0x168] ss:$16 sps:$4 sm:$0xff]   ;;  %v4582_v35 = vmul.f32 %v4571_v30, %v7510_v14  ;;  %v7022_v47 = vld [vmem:[#allocation7 + $0x12c] ss:$16 sps:$4 sm:$0xff]  }
 0x425   :  { %v4473_v7 = vpop.f32.mrf.mxu1 }
 0x426   :  { %v4621_v33 = vmax.f32 %v4617_v0, 0.0  ;;  %v4618_v10 = vadd.f32 %v4614_v42, %v4592_v39  ;;  %v4514_v12 = vpop.f32.mrf.mxu0  ;;  %v4583_v39 = vmul.f32 %v4575_v22, %v7513_v1  ;;  %v4607_v49 = vadd.f32 %v4596_v37, %v4582_v35  ;;  %v7020_v1 = vld [vmem:[#allocation7 + $0x128] ss:$16 sps:$4 sm:$0xff]   ;;  %v7075_v35 = vld [vmem:[#allocation7 + $0x36c] ss:$16 sps:$4 sm:$0xff]  }
 0x427   :  { %v7026_v12 = vld [vmem:[#allocation7 + $0x108] ss:$16 sps:$4 sm:$0xff]  }
 0x428   :  { %v4625_v11 = vmax.f32 %v4609_v8, %v4621_v33  ;;  %v4622_v23 = vmax.f32 %v4618_v10, 0.0  ;;  %v4608_v0 = vadd.f32 %v4600_v40, %v4583_v39  ;;  %v4611_v31 = vmax.f32 %v4607_v49, 0.0  ;;  %v7081_v39 = vld [vmem:[#allocation7 + $0x32c] ss:$16 sps:$4 sm:$0xff]  }
 0x429   :  { %v7087_v49 = vld [vmem:[%s7711_s17 + $0x8] sm:$0xff]  }
 0x42a   :  { %v4626_v43 = vmax.f32 %v4610_v6, %v4622_v23  ;;  %v7539_v36 = vpack.c.bf16 %v4625_v11, %v4625_v11  ;;  %v4612_v8 = vmax.f32 %v4608_v0, 0.0  ;;  %v7029_v11 = vld [vmem:[#allocation7 + $0x2e8] ss:$16 sps:$4 sm:$0xff]  }
 0x42b   :  { %v7032_v23 = vld [vmem:[%s7708_s14 + $0x38] sm:$0xff]  }
 0x42c   :  { %v4630_v44 = vpack.c.bf16 %v4626_v43, %v4626_v43  ;;  %v7201_v43 = vmov 0.0  }
 0x42e   :  { %5433 = vmatprep.mubr.bf16.mxu0 %v4630_v44 }
 0x42f   :  { %5434 = vmatmul.mubr.bf16.vlgmr.msra.gmra.mxu0 %v7539_v36 }
 0x430   :  { %5484 = vmatpush1.bf16.msra.mxu0 %v6936_v48  ;;  %5515 = vmatprep.mubr.bf16.mxu0 %v4630_v44  ;;  %v7035_v48 = vld [vmem:[#allocation7 + $0x2cc] ss:$16 sps:$4 sm:$0xff]  }
 0x431   :  { %5485 = vmatprep.subr.bf16.mxu0 %v6944_v53  ;;  %v7033_v53 = vld [vmem:[#allocation7 + $0x2c8] ss:$16 sps:$4 sm:$0xff]  }
 0x434   :  { %5486 = vmatpush1.bf16.msra.mxu0 %v6942_v52  ;;  %v7036_v52 = vld [vmem:[%s7708_s14 + $0x30] sm:$0xff]  }
 0x435   :  { %5487 = vmatprep.subr.bf16.mxu0 %v6950_v54  ;;  %v7039_v54 = vld [vmem:[#allocation7 + $0x2ac] ss:$16 sps:$4 sm:$0xff]  }
 0x438   :  { %5488 = vmatpush1.bf16.msra.mxu0 %v6948_v32  ;;  %v7040_v32 = vld [vmem:[%s7708_s14 + $0x28] sm:$0xff]  }
 0x439   :  { %5489 = vmatprep.subr.bf16.mxu0 %v6956_v55  ;;  %v7043_v55 = vld [vmem:[#allocation7 + $0x28c] ss:$16 sps:$4 sm:$0xff]  }
 0x43c   :  { %5490 = vmatpush1.bf16.msra.mxu0 %v6954_v56  ;;  %v7041_v56 = vld [vmem:[#allocation7 + $0x288] ss:$16 sps:$4 sm:$0xff]  }
 0x43d   :  { %5491 = vmatprep.subr.bf16.mxu0 %v6962_v57  ;;  %v7044_v57 = vld [vmem:[%s7708_s14 + $0x20] sm:$0xff]  }
 0x440   :  { %5492 = vmatpush1.bf16.msra.mxu0 %v6960_v58  ;;  %v7047_v58 = vld [vmem:[#allocation7 + $0x26c] ss:$16 sps:$4 sm:$0xff]  }
 0x441   :  { %5493 = vmatprep.subr.bf16.mxu0 %v6968_v26  ;;  %v7045_v26 = vld [vmem:[#allocation7 + $0x268] ss:$16 sps:$4 sm:$0xff]  }
 0x444   :  { %5494 = vmatpush1.bf16.msra.mxu0 %v6966_v59  ;;  %v7048_v59 = vld [vmem:[%s7708_s14 + $0x18] sm:$0xff]  }
 0x445   :  { %5495 = vmatprep.subr.bf16.mxu0 %v6974_v60  ;;  %v7051_v60 = vld [vmem:[#allocation7 + $0x24c] ss:$16 sps:$4 sm:$0xff]  }
 0x448   :  { %5496 = vmatpush1.bf16.msra.mxu0 %v6972_v61  ;;  %v7049_v61 = vld [vmem:[#allocation7 + $0x248] ss:$16 sps:$4 sm:$0xff]  }
 0x449   :  { %5497 = vmatprep.subr.bf16.mxu0 %v6980_v62  ;;  %v7052_v62 = vld [vmem:[%s7708_s14 + $0x10] sm:$0xff]  }
 0x44c   :  { %5498 = vmatpush1.bf16.msra.mxu0 %v6978_v63  ;;  %v7055_v63 = vld [vmem:[#allocation7 + $0x22c] ss:$16 sps:$4 sm:$0xff]  }
 0x44d   :  { %5499 = vmatprep.subr.bf16.mxu0 %v6986_v2  ;;  %v7053_v2 = vld [vmem:[#allocation7 + $0x228] ss:$16 sps:$4 sm:$0xff]  }
 0x450   :  { %5500 = vmatpush2.bf16.msra.mxu0 %v6984_v3  ;;  %v7056_v3 = vld [vmem:[%s7708_s14 + $0x8] sm:$0xff]  }
 0x451   :  { %5501 = vmatprep.subr.bf16.mxu0 %v6992_v4  ;;  %v7059_v4 = vld [vmem:[#allocation7 + $0x20c] ss:$16 sps:$4 sm:$0xff]  }
 0x454   :  { %5502 = vmatpush2.bf16.msra.mxu0 %v6990_v5  ;;  %v7057_v5 = vld [vmem:[#allocation7 + $0x208] ss:$16 sps:$4 sm:$0xff]  }
 0x455   :  { %5503 = vmatprep.subr.bf16.mxu0 %v6998_v9  ;;  %v7060_v9 = vld [vmem:[%s7708_s14] sm:$0xff]  }
 0x458   :  { %5504 = vmatpush2.bf16.msra.mxu0 %v6996_v17  ;;  %v7063_v17 = vld [vmem:[#allocation7 + $0x3ec] ss:$16 sps:$4 sm:$0xff]  }
 0x459   :  { %5505 = vmatprep.subr.bf16.mxu0 %v7004_v15  ;;  %v7061_v15 = vld [vmem:[#allocation7 + $0x3e8] ss:$16 sps:$4 sm:$0xff]  }
 0x45c   :  { %5506 = vmatpush2.bf16.msra.mxu0 %v7002_v18  ;;  %v7066_v18 = vld [vmem:[#allocation7 + $0x3cc] ss:$16 sps:$4 sm:$0xff]  }
 0x45d   :  { %5507 = vmatprep.subr.bf16.mxu0 %v7010_v19  ;;  %v7064_v19 = vld [vmem:[#allocation7 + $0x3c8] ss:$16 sps:$4 sm:$0xff]  }
 0x45f   :  { %v4550_v38 = vpop.f32.mrf.mxu1 }
 0x460   :  { %v4551_v45 = vadd.f32 %v4550_v38, %v7535_v16  ;;  %5508 = vmatpush2.bf16.msra.mxu0 %v7008_v24  ;;  %v7072_v24 = vld [vmem:[#allocation7 + $0x38c] ss:$16 sps:$4 sm:$0xff]  }
 0x461   :  { %v4552_v20 = vpop.f32.mrf.mxu1  ;;  %5509 = vmatprep.subr.bf16.mxu0 %v7016_v34  ;;  %v7070_v34 = vld [vmem:[#allocation7 + $0x388] ss:$16 sps:$4 sm:$0xff]   ;;  %v7078_v38 = vld [vmem:[#allocation7 + $0x34c] ss:$16 sps:$4 sm:$0xff]  }
 0x462   :  { %v4615_v51 = vmul.f32 %v4571_v30, %v4551_v45  ;;  %v4553_v14 = vadd.f32 %v4552_v20, %v7537_v41  ;;  %v7069_v30 = vld [vmem:[#allocation7 + $0x3ac] ss:$16 sps:$4 sm:$0xff]  }
 0x463   :  { %v4554_v21 = vpop.f32.mrf.mxu1  ;;  %v7084_v45 = vld [vmem:[#allocation7 + $0x30c] ss:$16 sps:$4 sm:$0xff]  }
 0x464   :  { %v4619_v27 = vadd.f32 %v4615_v51, %v4596_v37  ;;  %v4616_v42 = vmul.f32 %v4575_v22, %v4553_v14  ;;  %5510 = vmatpush2.bf16.msra.mxu0 %v7014_v46  ;;  %v7067_v22 = vld [vmem:[#allocation7 + $0x3a8] ss:$16 sps:$4 sm:$0xff]   ;;  %v7088_v51 = vld [vmem:[%s7711_s17] sm:$0xff]  }
 0x465   :  { %v4555_v50 = vpop.f32.mrf.mxu1  ;;  %5511 = vmatprep.subr.bf16.mxu0 %v7022_v47  ;;  %v7073_v37 = vld [vmem:[#allocation7 + $0x368] ss:$16 sps:$4 sm:$0xff]   ;;  %v7086_v47 = vld [vmem:[%s7711_s17 + $0x10] sm:$0xff]  }
 0x466   :  { %v4623_v16 = vmax.f32 %v4619_v27, 0.0  ;;  %v4620_v7 = vadd.f32 %v4616_v42, %v4600_v40  ;;  %v7079_v40 = vld [vmem:[#allocation7 + $0x328] ss:$16 sps:$4 sm:$0xff]  }
 0x467   :  { %v7082_v46 = vld [vmem:[#allocation7 + $0x308] ss:$16 sps:$4 sm:$0xff]  }
 0x468   :  { %v4627_v33 = vmax.f32 %v4611_v31, %v4623_v16  ;;  %v4624_v10 = vmax.f32 %v4620_v7, 0.0  ;;  %5512 = vmatpush2.bf16.msra.mxu0 %v7020_v1  ;;  %v7085_v20 = vld [vmem:[%s7711_s17 + $0x18] sm:$0xff]  }
 0x469   :  { %5513 = vmatprep.subr.bf16.mxu0 %v7028_v29 }
 0x46a   :  { %v4628_v6 = vmax.f32 %v4612_v8, %v4624_v10  ;;  %v7558_v44 = vpack.c.bf16 %v4627_v33, %v4627_v33 }
 0x46c   :  { %5514 = vmatpush2.bf16.msra.mxu0 %v7026_v12  ;;  %v4632_v41 = vpack.c.bf16 %v4628_v6, %v4628_v6  ;;  %v6770_v12 = vld [vmem:[%s7709_s15] ss:$0 sm:$0xff] }
 0x46d   :  { %6836 = vmatprep.subr.bf16.mxu0 %v7201_v43 }
 0x46e   :  { %5474 = vmatprep.mubr.bf16.mxu1 %v4632_v41 }
 0x46f   :  { %5516 = vmatmul.mubr.bf16.vlgmr.msra.gmra.mxu0 %v7539_v36  ;;  %5475 = vmatmul.mubr.bf16.vlgmr.msra.gmra.mxu1 %v7558_v44  ;;  %v7037_v36 = vld [vmem:[#allocation7 + $0x2a8] ss:$16 sps:$4 sm:$0xff]  }
 0x470   :  { %5525 = vmatpush1.bf16.msra.mxu1 %v7029_v11  ;;  %6837 = vmatpush3.bf16.msra.mxu0 %v7032_v23 }
 0x471   :  { %5556 = vmatprep.mubr.bf16.mxu1 %v4632_v41  ;;  %5526 = vmatprep.subr.bf16.mxu1 %v7035_v48  ;;  %v6771_v41 = vld [vmem:[%s7710_s16] ss:$0 sm:$0xff] }
 0x472   :  { %6838 = vmatprep.subr.bf16.mxu0 %v7201_v43  ;;  %6852 = vmatprep.mubr.msk.bf16.mxu0 %vm7202_vm0, %v7201_v43 }
 0x474   :  { %5527 = vmatpush1.bf16.msra.mxu1 %v7033_v53  ;;  %6839 = vmatpush3.bf16.msra.mxu0 %v7036_v52 }
 0x475   :  { %5528 = vmatprep.subr.bf16.mxu1 %v7039_v54  ;;  %6840 = vmatprep.subr.bf16.mxu0 %v7201_v43  ;;  %v5565_v54 = vld [vmem:[%s7705_s11] sm:$0x3] }
 0x478   :  { %5529 = vmatpush1.bf16.msra.mxu1 %v7037_v36  ;;  %6841 = vmatpush3.bf16.msra.mxu0 %v7040_v32  ;;  %v5571_v36 = vrot.slane %v5565_v54, %v7359_v25  ;;  %v5566_v32 = vld [vmem:[%s7706_s12] sm:$0x3] }
 0x479   :  { %5530 = vmatprep.subr.bf16.mxu1 %v7043_v55  ;;  %6842 = vmatprep.subr.bf16.mxu0 %v7201_v43  ;;  %v5575_v55 = vrot.slane %v5565_v54, %v7366_v28 }
 0x47c   :  { %5531 = vmatpush1.bf16.msra.mxu1 %v7041_v56  ;;  %6843 = vmatpush3.bf16.msra.mxu0 %v7044_v57  ;;  %v5584_v57 = vrot.slane %v5566_v32, %v7359_v25 }
 0x47d   :  { %5532 = vmatprep.subr.bf16.mxu1 %v7047_v58  ;;  %6844 = vmatprep.subr.bf16.mxu0 %v7201_v43 }
 0x480   :  { %5533 = vmatpush1.bf16.msra.mxu1 %v7045_v26  ;;  %6845 = vmatpush3.bf16.msra.mxu0 %v7048_v59  ;;  %v5588_v59 = vrot.slane %v5566_v32, %v7366_v28  ;;  %v7089_v28 = vld [vmem:[%s7714_s20] sm:$0xff]  }
 0x481   :  { %5534 = vmatprep.subr.bf16.mxu1 %v7051_v60  ;;  %6846 = vmatprep.subr.bf16.mxu0 %v7201_v43 }
 0x484   :  { %5535 = vmatpush1.bf16.msra.mxu1 %v7049_v61  ;;  %6847 = vmatpush3.bf16.msra.mxu0 %v7052_v62 }
 0x485   :  { %5536 = vmatprep.subr.bf16.mxu1 %v7055_v63  ;;  %6848 = vmatprep.subr.bf16.mxu0 %v7201_v43 }
 0x488   :  { %5537 = vmatpush1.bf16.msra.mxu1 %v7053_v2  ;;  %6849 = vmatpush3.bf16.msra.mxu0 %v7056_v3 }
 0x489   :  { %5538 = vmatprep.subr.bf16.mxu1 %v7059_v4  ;;  %6850 = vmatprep.subr.bf16.mxu0 %v7201_v43 }
 0x48c   :  { %5539 = vmatpush1.bf16.msra.mxu1 %v7057_v5  ;;  %6851 = vmatpush3.bf16.msra.mxu0 %v7060_v9 }
 0x48d   :  { %5540 = vmatprep.subr.bf16.mxu1 %v7063_v17  ;;  %6856 = vmatprep.subr.bf16.mxu0 %v7201_v43 }
 0x48f   :  { %6853 = vmatmul.mubr.bf16.vlgmr.msra.gmra.mxu0 %v7335_v13  ;;  %v7076_v13 = vld [vmem:[#allocation7 + $0x348] ss:$16 sps:$4 sm:$0xff]  }
 0x490   :  { %5541 = vmatpush2.bf16.msra.mxu1 %v7061_v15  ;;  %6864 = vmatprep.mubr.msk.bf16.mxu0 %vm7202_vm0, %v7201_v43 }
 0x491   :  { %5542 = vmatprep.subr.bf16.mxu1 %v7066_v18  ;;  %6857 = vmatpush3.bf16.msra.mxu0 %v7085_v20 }
 0x492   :  { %6858 = vmatprep.subr.bf16.mxu0 %v7201_v43 }
 0x494   :  { %5543 = vmatpush2.bf16.msra.mxu1 %v7064_v19 }
 0x495   :  { %5544 = vmatprep.subr.bf16.mxu1 %v7069_v30  ;;  %6859 = vmatpush3.bf16.msra.mxu0 %v7086_v47  ;;  %v7091_v47 = vld [vmem:[%s7707_s13 + $0x38] sm:$0xff]  }
 0x496   :  { %6860 = vmatprep.subr.bf16.mxu0 %v7201_v43 }
 0x498   :  { %5545 = vmatpush2.bf16.msra.mxu1 %v7067_v22 }
 0x499   :  { %5546 = vmatprep.subr.bf16.mxu1 %v7072_v24  ;;  %6861 = vmatpush3.bf16.msra.mxu0 %v7087_v49 }
 0x49a   :  { %6862 = vmatprep.subr.bf16.mxu0 %v7201_v43 }
 0x49c   :  { %5547 = vmatpush2.bf16.msra.mxu1 %v7070_v34  ;;  %v7090_v34 = vld [vmem:[%s7707_s13 + $0x78] sm:$0xff]  }
 0x49d   :  { %5548 = vmatprep.subr.bf16.mxu1 %v7075_v35  ;;  %6863 = vmatpush3.bf16.msra.mxu0 %v7088_v51  ;;  %v6777_v35 = vld [vmem:[%s7712_s18] ss:$0 sm:$0xff]  ;;  %v7092_v51 = vld [vmem:[%s7707_s13 + $0x70] sm:$0xff]   ;;  %s7732_s18 = sld [smem:[#allocation19_spill]] }
 0x4a0   :  { %5549 = vmatpush2.bf16.msra.mxu1 %v7073_v37 }
 0x4a1   :  { %5550 = vmatprep.subr.bf16.mxu1 %v7078_v38  ;;  %v6778_v38 = vld [vmem:[%s7713_s19] ss:$0 sm:$0xff] }
 0x4a4   :  { %5551 = vmatpush2.bf16.msra.mxu1 %v7076_v13 }
 0x4a5   :  { %5552 = vmatprep.subr.bf16.mxu1 %v7081_v39 }
 0x4a8   :  { %5553 = vmatpush2.bf16.msra.mxu1 %v7079_v40 }
 0x4a9   :  { %5554 = vmatprep.subr.bf16.mxu1 %v7084_v45 }
 0x4ac   :  { %5555 = vmatpush2.bf16.msra.mxu1 %v7082_v46 }
 0x4ad   :  { %6868 = vmatprep.subr.bf16.mxu1 %v7201_v43 }
 0x4af   :  { %5557 = vmatmul.mubr.bf16.vlgmr.msra.gmra.mxu1 %v7558_v44 }
 0x4b0   :  { %6870 = vmatprep.mubr.msk.bf16.mxu1 %vm7202_vm0, %v7201_v43  ;;  %6869 = vmatpush3.bf16.msra.mxu1 %v7089_v28 }
 0x4b1   :  { %6814 = vmatprep.subr.bf16.mxu1 %v7090_v34 }
 0x4ef   :  { %v5435_v14 = vpop.f32.mrf.mxu0 }
 0x4f1   :  { %v5437_v21 = vpop.f32.mrf.mxu0 }
 0x4f3   :  { %v5439_v0 = vpop.f32.mrf.mxu0 }
 0x4f4   :  { %v7094_v0 = vld [vmem:[%s7707_s13 + $0x68] sm:$0xff]  }
 0x4f5   :  { %v5440_v27 = vpop.f32.mrf.mxu0 }
 0x4f6   :  { %v7095_v27 = vld [vmem:[%s7707_s13 + $0x28] sm:$0xff]  }
 0x52f   :  { %v5517_v42 = vpop.f32.mrf.mxu0  ;;  %v5476_v1 = vpop.f32.mrf.mxu1 }
 0x530   :  { %v5477_v50 = vadd.f32 %v5476_v1, %v5435_v14  ;;  %v7097_v1 = vld [vmem:[%s7707_s13 + $0x20] sm:$0xff]  }
 0x531   :  { %v5519_v29 = vpop.f32.mrf.mxu0  ;;  %v5478_v31 = vpop.f32.mrf.mxu1 }
 0x532   :  { %v5479_v16 = vadd.f32 %v5478_v31, %v5437_v21  ;;  %v5578_v56 = vmul.f32 %v5571_v36, %v5477_v50  ;;  %v7093_v21 = vld [vmem:[%s7707_s13 + $0x30] sm:$0xff]   ;;  %v7098_v50 = vld [vmem:[%s7707_s13 + $0x58] sm:$0xff]  }
 0x533   :  { %v5521_v7 = vpop.f32.mrf.mxu0  ;;  %v5480_v8 = vpop.f32.mrf.mxu1  ;;  %v7100_v31 = vld [vmem:[%s7707_s13 + $0x50] sm:$0xff]  }
 0x534   :  { %v5579_v26 = vmul.f32 %v5575_v55, %v5479_v16  ;;  %v5591_v62 = vadd.f32 %v5584_v57, %v5578_v56  ;;  %v7101_v16 = vld [vmem:[%s7707_s13 + $0x10] sm:$0xff]   ;;  %v7102_v7 = vld [vmem:[%s7707_s13 + $0x48] sm:$0xff]  }
 0x535   :  { %v5522_v33 = vpop.f32.mrf.mxu0  ;;  %v5481_v10 = vpop.f32.mrf.mxu1  ;;  %v7103_v8 = vld [vmem:[%s7707_s13 + $0x8] sm:$0xff]  }
 0x536   :  { %v5592_v4 = vadd.f32 %v5588_v59, %v5579_v26  ;;  %v5593_v15 = vmax.f32 %v5591_v62, 0.0  ;;  %v7104_v33 = vld [vmem:[%s7707_s13 + $0x40] sm:$0xff]  }
 0x537   :  { %v7105_v10 = vld [vmem:[%s7707_s13] sm:$0xff]  }
 0x538   :  { %v5594_v30 = vmax.f32 %v5592_v4, 0.0 }
 0x54f   :  { %v5735_v6 = vpop.f32.mrf.mxu0 }
 0x550   :  { %v5748_v11 = vmul.f32 %v6770_v12, %v5735_v6 }
 0x551   :  { %v6854_v23 = vpop.f32.mrf.mxu0 }
 0x552   :  { %v5756_v43 = vadd.f32 %v6771_v41, %v5748_v11 }
 0x553   :  { %v5738_v44 = vpop.f32.mrf.mxu0 }
 0x554   :  { %v5757_v48 = vmax.f32 %v5756_v43, 0.0 }
 0x555   :  { %v6855_v53 = vpop.f32.mrf.mxu0 }
 0x556   :  { %v5758_v52 = vpack.c.bf16 %v5757_v48, %v5757_v48  ;;  %v6797_v53 = vld [vmem:[%s7715_s21] ss:$0 sm:$0xff] }
 0x558   :  { %6865 = vmatmul.mubr.msk.bf16.vlgmr.msra.gmra.mxu0 %vm5791_vm1, %v5758_v52 }
 0x56f   :  { %v5558_v58 = vpop.f32.mrf.mxu1 }
 0x570   :  { %v5559_v60 = vadd.f32 %v5558_v58, %v5517_v42  ;;  %v7096_v42 = vld [vmem:[%s7707_s13 + $0x60] sm:$0xff]  }
 0x571   :  { %v5560_v61 = vpop.f32.mrf.mxu1 }
 0x572   :  { %v5595_v63 = vmul.f32 %v5571_v36, %v5559_v60  ;;  %v5561_v2 = vadd.f32 %v5560_v61, %v5519_v29  ;;  %v7099_v29 = vld [vmem:[%s7707_s13 + $0x18] sm:$0xff]  }
 0x573   :  { %v5562_v3 = vpop.f32.mrf.mxu1 }
 0x574   :  { %v5597_v5 = vadd.f32 %v5595_v63, %v5584_v57  ;;  %v5596_v9 = vmul.f32 %v5575_v55, %v5561_v2 }
 0x575   :  { %v5563_v17 = vpop.f32.mrf.mxu1 }
 0x576   :  { %v5599_v18 = vmax.f32 %v5597_v5, 0.0  ;;  %v5598_v19 = vadd.f32 %v5596_v9, %v5588_v59 }
 0x578   :  { %v5601_v22 = vmax.f32 %v5593_v15, %v5599_v18  ;;  %v5600_v25 = vmax.f32 %v5598_v19, 0.0 }
 0x57a   :  { %v5602_v24 = vmax.f32 %v5594_v30, %v5600_v25  ;;  %v5603_v12 = vpack.c.bf16 %v5601_v22, %v5601_v22 }
 0x57c   :  { %v5604_v14 = vpack.c.bf16 %v5602_v24, %v5602_v24 }
 0x618   :  { %v5829_v37 = vpop.f32.mrf.mxu0 }
 0x619   :  { %v5842_v13 = vmul.f32 %v6777_v35, %v5829_v37 }
 0x61a   :  { %v6866_v39 = vpop.f32.mrf.mxu0 }
 0x61b   :  { %v5850_v40 = vadd.f32 %v6778_v38, %v5842_v13 }
 0x61c   :  { %v5832_v45 = vpop.f32.mrf.mxu0 }
 0x61d   :  { %v5851_v46 = vmax.f32 %v5850_v40, 0.0 }
 0x61e   :  { %v6867_v20 = vpop.f32.mrf.mxu0 }
 0x61f   :  { %v5852_v49 = vpack.c.bf16 %v5851_v46, %v5851_v46 }
 0x621   :  { %6871 = vmatmul.mubr.msk.bf16.vlgmr.msra.gmra.mxu1 %vm5861_vm2, %v5852_v49 }
 0x622   :  { %6815 = vmatpush3.bf16.msra.mxu1 %v7091_v47  ;;  %6033 = vmatprep.mubr.bf16.mxu1 %v5604_v14 }
 0x623   :  { %6816 = vmatprep.subr.bf16.mxu1 %v7092_v51 }
 0x626   :  { %6817 = vmatpush3.bf16.msra.mxu1 %v7093_v21 }
 0x627   :  { %6818 = vmatprep.subr.bf16.mxu1 %v7094_v0 }
 0x62a   :  { %6819 = vmatpush3.bf16.msra.mxu1 %v7095_v27 }
 0x62b   :  { %6820 = vmatprep.subr.bf16.mxu1 %v7096_v42 }
 0x62e   :  { %6821 = vmatpush3.bf16.msra.mxu1 %v7097_v1 }
 0x62f   :  { %6822 = vmatprep.subr.bf16.mxu1 %v7098_v50 }
 0x632   :  { %6823 = vmatpush3.bf16.msra.mxu1 %v7099_v29 }
 0x633   :  { %6824 = vmatprep.subr.bf16.mxu1 %v7100_v31 }
 0x636   :  { %6825 = vmatpush3.bf16.msra.mxu1 %v7101_v16 }
 0x637   :  { %6826 = vmatprep.subr.bf16.mxu1 %v7102_v7 }
 0x63a   :  { %6827 = vmatpush3.bf16.msra.mxu1 %v7103_v8 }
 0x63b   :  { %6828 = vmatprep.subr.bf16.mxu1 %v7104_v33 }
 0x63e   :  { %6829 = vmatpush3.bf16.msra.mxu1 %v7105_v10 }
 0x641   :  { %6034 = vmatmul.mubr.bf16.vlgmr.msra.gmra.mxu1 %v5603_v12 }
 0x6e1   :  { %v5899_v6 = vpop.f32.mrf.mxu1 }
 0x6e3   :  { %v6872_v41 = vpop.f32.mrf.mxu1 }
 0x6e5   :  { %v5902_v11 = vpop.f32.mrf.mxu1 }
 0x6e7   :  { %v6873_v23 = vpop.f32.mrf.mxu1 }
 0x701   :  { %v6830_v43 = vpop.f32.mrf.mxu1 }
 0x703   :  { %v6831_v44 = vpop.f32.mrf.mxu1 }
 0x704   :  { %v6832_v48 = vadd.f32 %v6831_v44, %v6830_v43 }
 0x705   :  { %v6833_v52 = vpop.f32.mrf.mxu1 }
 0x706   :  { %v6036_v54 = vadd.f32 %v6832_v48, %v5899_v6 }
 0x707   :  { %v6834_v36 = vpop.f32.mrf.mxu1 }
 0x708   :  { %v6048_v32 = vadd.f32 %v6797_v53, %v6036_v54 }
 0x70a   :  { %6050 = vst.msk [vmem:[%s7732_s18] sm:$0xff] %vm6049_vm3, %v6048_v32 }
 0x70b   :  { %6055 = vsyncpa [#allocation3], 1 }
 0x70c   :  { %6056 = vsyncpa [#allocation5], 1 }
 0x70d   :  { %6057 = vsyncpa [#allocation8], 1 }

</bundles_post_ra>
